<compile_context>
chip_gen: v7x
topology: tpu7x:2x2x1
jax: 0.10.0
libtpu: 0.0.40
codegen_flags: <defaults>
</compile_context>

<pallas_src>
import functools
import math

import jax
import jax.numpy as jnp
from jax import lax
from jax.experimental import pallas as pl
from jax.experimental.pallas import tpu as pltpu

# ------------------------- small ViT configuration -------------------------
IMG = 16          # img_size
PATCH = 4         # patch_size
IN_CH = 3         # in_chans
EMBED = 32        # embed_dim
DEPTH = 2         # depth
HEADS = 4         # num_heads
MLP_RATIO = 4.0
NUM_CLASSES = 10
HEAD_DIM = EMBED // HEADS
N_PATCH = (IMG // PATCH) * (IMG // PATCH)    # 16
T = N_PATCH + 1                              # tokens incl. cls = 17
T_PAD = 24                                   # tokens padded to multiple of 8
P = IN_CH * PATCH * PATCH                    # flattened patch dim = 48
P_PAD = 128                                  # lane-dense token slab width
MLP_HID = int(EMBED * MLP_RATIO)             # 128
NC_PAD = 128                                 # lane-dense logits slab
SCALE = HEAD_DIM ** (-0.5)
LN_EPS = 1e-5
HT = HEADS * T_PAD                           # fused-head score width = 96
SLAB_W = 128                                 # packed-constant slab lane width
_GELU_C = math.sqrt(2.0 / math.pi)
NEG_BIG = -1e30

assert P + T_PAD <= P_PAD


# ------------------------------ math helpers -------------------------------
def _layernorm(x, w, b):
    mu = jnp.mean(x, axis=-1, keepdims=True)
    var = jnp.mean(jnp.square(x - mu), axis=-1, keepdims=True)
    return (x - mu) * lax.rsqrt(var + LN_EPS) * w + b


def _gelu_tanh(x):
    # tanh-approximate GELU (EUP tanh); deviates < ~1e-3 from exact erf GELU.
    return 0.5 * x * (1.0 + jnp.tanh(_GELU_C * (x + 0.044715 * x * x * x)))


def _softmax(x):  # reference only
    m = jnp.max(x, axis=-1, keepdims=True)
    e = jnp.exp(x - m)
    return e / jnp.sum(e, axis=-1, keepdims=True)


# ------------------------------ Pallas kernel ------------------------------
def vit_kernel(tok_ref,        # (b_blk, T_PAD, P_PAD) bf16  [patches | onehot(pos)]
               w_ref,          # (WR, 128) bf16   packed weight slab
               f_ref,          # (FR, 128) f32    packed LN / bias slab
               out_ref,        # (b_blk, NC_PAD) f32
               q_sc, k_sc, v_sc, attn_sc,   # (rows, E) f32 VMEM scratch
               *, b_blk, wo, fo):
    rows = b_blk * T_PAD
    bf16 = jnp.bfloat16

    def wsl(name, nr, nc):                       # static slab slice (bf16)
        r0 = wo[name]
        return w_ref[r0:r0 + nr, :nc]

    def frow(name, nc=EMBED):                    # static slab row (f32)
        r0 = fo[name]
        return f_ref[r0:r0 + 1, :nc]

    # hoisted constants (loaded once per grid step)
    hm = wsl('head_mask', HT, EMBED)             # (HT, E) bf16 block-diag mask
    hm_b = hm != 0                               # bool mask for f32 selects
    kb = frow('key_bias', HT)                    # (1, HT) f32  0 / -1e30

    # ---- patch embedding; cls/pos/conv-bias folded in via one-hot columns ----
    x = jnp.dot(tok_ref[...].reshape(rows, P_PAD), wsl('patch', P_PAD, EMBED),
                preferred_element_type=jnp.float32)          # (rows, E) f32

    def attn_image(off):
        q = q_sc[pl.ds(off, T_PAD), :]                       # (T_PAD, E) f32
        k = k_sc[pl.ds(off, T_PAD), :]
        v = v_sc[pl.ds(off, T_PAD), :]
        # per-head block-diagonal K / V; f32 elementwise, cast at the dots (v5e)
        k_bd = jnp.where(hm_b, jnp.tile(k, (HEADS, 1)), 0.0)  # (HT, E) f32
        v_bd = jnp.where(hm_b, jnp.tile(v, (HEADS, 1)), 0.0)
        # all-head scores in one matmul: (T_PAD, E) x (HT, E)^T -> (T_PAD, HT)
        s = lax.dot_general(q.astype(bf16), k_bd.astype(bf16),
                            (((1,), (1,)), ((), ())),
                            preferred_element_type=jnp.float32)
        s = s + kb                                           # mask padded keys
        s = s - jnp.max(s, axis=-1, keepdims=True)           # shared shift: safe
        e = jnp.exp(s).astype(bf16)                          # (T_PAD, HT)
        # unnormalized per-head AV + per-head denominators (segmented sum on MXU)
        o_un = jnp.dot(e, v_bd.astype(bf16), preferred_element_type=jnp.float32)
        den = jnp.dot(e, hm, preferred_element_type=jnp.float32)
        attn_sc[pl.ds(off, T_PAD), :] = o_un * pl.reciprocal(den, approx=True)

    # TODO(synk): at real ViT sizes, stream layer weights via a depth grid axis.
    for d in range(DEPTH):
        L = f'l{d}_'
        # ------------------------ attention branch ------------------------
        xn = _layernorm(x, frow(L + 'ln1_w'), frow(L + 'ln1_b'))
        xn_b = xn.astype(bf16)
        # pre-split qkv weights (SCALE folded into wq) -> no in-kernel lane splits
        q_sc[...] = jnp.dot(xn_b, wsl(L + 'wq', EMBED, EMBED),
                            preferred_element_type=jnp.float32)
        k_sc[...] = jnp.dot(xn_b, wsl(L + 'wk', EMBED, EMBED),
                            preferred_element_type=jnp.float32)
        v_sc[...] = jnp.dot(xn_b, wsl(L + 'wv', EMBED, EMBED),
                            preferred_element_type=jnp.float32)

        if b_blk <= 8:                     # small block: full unroll is fine
            for b in range(b_blk):
                attn_image(b * T_PAD)
        else:                              # large block: bounded live ranges
            def body(b, carry):
                attn_image(pl.multiple_of(b * T_PAD, 8))
                return carry
            lax.fori_loop(0, b_blk, body, 0)

        attn = jnp.dot(attn_sc[...].astype(bf16), wsl(L + 'proj_w', EMBED, EMBED),
                       preferred_element_type=jnp.float32) + frow(L + 'proj_b')
        x = x + attn

        # --------------------------- MLP branch ---------------------------
        xn = _layernorm(x, frow(L + 'ln2_w'), frow(L + 'ln2_b'))
        h = jnp.dot(xn.astype(bf16), wsl(L + 'fc1_w', EMBED, MLP_HID),
                    preferred_element_type=jnp.float32) + frow(L + 'fc1_b', MLP_HID)
        h = _gelu_tanh(h)
        h = jnp.dot(h.astype(bf16), wsl(L + 'fc2_w', MLP_HID, EMBED),
                    preferred_element_type=jnp.float32) + frow(L + 'fc2_b')
        x = x + h

    # ---- final norm on cls tokens only + classification head (lane-dense) ----
    cls = x.reshape(b_blk, T_PAD, EMBED)[:, 0, :]            # (b_blk, E) f32
    cls = _layernorm(cls, frow('norm_w'), frow('norm_b'))
    out_ref[...] = jnp.dot(cls.astype(bf16), wsl('head_w', EMBED, NC_PAD),
                           preferred_element_type=jnp.float32) + frow('head_b', NC_PAD)


# ------------------------------- glue (JAX) --------------------------------
def extract_patches(x_nchw):
    """(B, C, H, W) -> (B, N_PATCH, C*ph*pw), feature order (c, dh, dw)."""
    B, C, H, W = x_nchw.shape
    hp, wp = H // PATCH, W // PATCH
    x = x_nchw.reshape(B, C, hp, PATCH, wp, PATCH)
    x = x.transpose(0, 2, 4, 1, 3, 5)              # (B, hp, wp, C, ph, pw)
    return x.reshape(B, hp * wp, C * PATCH * PATCH)


def _pick_block(B):
    """Images per grid step: full batch when tiny, else mult-of-8, <=32, >=2 steps."""
    if B <= 8:
        return B
    return min(32, ((B + 15) // 16) * 8)


def _pack_slab(entries, dtype):
    """Pack 2-D constants row-wise into one (R, 128) slab; returns (slab, offsets)."""
    offs, bands, r = {}, [], 0
    for name, arr in entries:
        arr = jnp.asarray(arr, jnp.float32)
        nr, nc = arr.shape
        band = jnp.zeros((nr, SLAB_W), jnp.float32).at[:, :nc].set(arr)
        offs[name] = r
        bands.append(band)
        r += nr
    return jnp.concatenate(bands, axis=0).astype(dtype), offs


def init_params(key):
    # Deterministic synthetic init (stands in for orthogonal_/trunc_normal_).
    ks = jax.random.split(key, 12)

    def nrm(k, shape, std=0.02):
        return (jax.random.normal(k, shape, jnp.float32) * std).astype(jnp.float32)

    return dict(
        patch_w=nrm(ks[0], (EMBED, P)),                  # conv weight (E, C*ph*pw)
        patch_b=nrm(ks[1], (1, EMBED), 1e-3),
        cls=jnp.zeros((1, EMBED), jnp.float32),          # cls_token stays zero
        pos=nrm(ks[2], (T, EMBED)),                      # trunc_normal(std=0.02)
        ln1_w=jnp.ones((DEPTH, 1, EMBED), jnp.float32),
        ln1_b=jnp.zeros((DEPTH, 1, EMBED), jnp.float32),
        qkv_w=nrm(ks[3], (DEPTH, 3 * EMBED, EMBED)),     # qkv_bias=False
        proj_w=nrm(ks[4], (DEPTH, EMBED, EMBED)),
        proj_b=nrm(ks[5], (DEPTH, 1, EMBED), 1e-3),
        ln2_w=jnp.ones((DEPTH, 1, EMBED), jnp.float32),
        ln2_b=jnp.zeros((DEPTH, 1, EMBED), jnp.float32),
        fc1_w=nrm(ks[6], (DEPTH, MLP_HID, EMBED)),
        fc1_b=nrm(ks[7], (DEPTH, 1, MLP_HID), 1e-3),
        fc2_w=nrm(ks[8], (DEPTH, EMBED, MLP_HID)),
        fc2_b=nrm(ks[9], (DEPTH, 1, EMBED), 1e-3),
        norm_w=jnp.ones((1, EMBED), jnp.float32),
        norm_b=jnp.zeros((1, EMBED), jnp.float32),
        head_w=nrm(ks[10], (NUM_CLASSES, EMBED)),
        head_b=nrm(ks[11], (1, NUM_CLASSES), 1e-3),
    )


def vit_forward(x_nchw, params):
    B = x_nchw.shape[0]
    b_blk = _pick_block(B)
    n_blk = -(-B // b_blk)
    B_pad = n_blk * b_blk
    rows = b_blk * T_PAD

    # ---- token slab: [patch pixels | one-hot(token idx) | zero pad] (128 lanes) ----
    patches = extract_patches(x_nchw)                                  # (B, N, P)
    tok = jnp.zeros((B_pad, T_PAD, P_PAD), jnp.float32)
    tok = tok.at[:B, 1:T, :P].set(patches)
    tok = tok.at[:, :, P:P + T_PAD].set(jnp.eye(T_PAD, dtype=jnp.float32)[None])
    tok = tok.astype(jnp.bfloat16)

    # ---- bf16 weight slab (patch embed + folded addtok, head mask, all matmuls) ----
    addtok = jnp.zeros((T_PAD, EMBED), jnp.float32)
    addtok = addtok.at[0].set(params['cls'][0] + params['pos'][0])
    addtok = addtok.at[1:T].set(params['pos'][1:] + params['patch_b'])
    patch_band = jnp.zeros((P_PAD, EMBED), jnp.float32)
    patch_band = patch_band.at[:P].set(params['patch_w'].T)
    patch_band = patch_band.at[P:P + T_PAD].set(addtok)      # one-hot cols pick this up

    r_head = jnp.arange(HT)[:, None] // T_PAD
    f_head = jnp.arange(EMBED)[None, :] // HEAD_DIM
    head_mask = (r_head == f_head).astype(jnp.float32)       # (HT, E) block-diag

    w_entries = [('patch', patch_band),
                 ('head_mask', head_mask),
                 ('head_w', params['head_w'].T)]
    for d in range(DEPTH):
        qkv = params['qkv_w'][d]
        w_entries += [
            (f'l{d}_wq', qkv[:EMBED].T * SCALE),             # scale folded into Q
            (f'l{d}_wk', qkv[EMBED:2 * EMBED].T),
            (f'l{d}_wv', qkv[2 * EMBED:].T),
            (f'l{d}_proj_w', params['proj_w'][d].T),
            (f'l{d}_fc1_w', params['fc1_w'][d].T),
            (f'l{d}_fc2_w', params['fc2_w'][d].T),
        ]
    wslab, wo = _pack_slab(w_entries, jnp.bfloat16)

    # ---- f32 LN / bias slab ----
    key_bias = jnp.where((jnp.arange(HT) % T_PAD) < T, 0.0, NEG_BIG).reshape(1, HT)
    f_entries = [('key_bias', key_bias),
                 ('norm_w', params['norm_w']), ('norm_b', params['norm_b']),
                 ('head_b', params['head_b'])]
    for d in range(DEPTH):
        f_entries += [
            (f'l{d}_ln1_w', params['ln1_w'][d]), (f'l{d}_ln1_b', params['ln1_b'][d]),
            (f'l{d}_proj_b', params['proj_b'][d]),
            (f'l{d}_ln2_w', params['ln2_w'][d]), (f'l{d}_ln2_b', params['ln2_b'][d]),
            (f'l{d}_fc1_b', params['fc1_b'][d]), (f'l{d}_fc2_b', params['fc2_b'][d]),
        ]
    fslab, fo = _pack_slab(f_entries, jnp.float32)

    kernel = functools.partial(vit_kernel, b_blk=b_blk, wo=wo, fo=fo)
    out = pl.pallas_call(
        kernel,
        out_shape=jax.ShapeDtypeStruct((B_pad, NC_PAD), jnp.float32),
        grid_spec=pltpu.PrefetchScalarGridSpec(
            num_scalar_prefetch=0,
            grid=(n_blk,),
            in_specs=[
                pl.BlockSpec((b_blk, T_PAD, P_PAD), lambda i: (i, 0, 0)),
                pl.BlockSpec(wslab.shape, lambda i: (0, 0)),
                pl.BlockSpec(fslab.shape, lambda i: (0, 0)),
            ],
            out_specs=pl.BlockSpec((b_blk, NC_PAD), lambda i: (i, 0)),
            scratch_shapes=[pltpu.VMEM((rows, EMBED), jnp.float32)
                            for _ in range(4)],
        ),
        compiler_params=pltpu.CompilerParams(
            dimension_semantics=("parallel",)),              # v7x: 2 TensorCores
    )(tok, wslab, fslab)
    return out[:B, :NUM_CLASSES]


# ----------------------- pure-JAX reference (checking) ----------------------
def vit_reference(x_nchw, params):
    hp = lax.Precision.HIGHEST
    B = x_nchw.shape[0]
    patches = extract_patches(x_nchw)
    emb = jnp.einsum('bnp,ep->bne', patches, params['patch_w'],
                     precision=hp) + params['patch_b']
    cls = jnp.broadcast_to(params['cls'][None], (B, 1, EMBED))
    x = jnp.concatenate([cls, emb], axis=1) + params['pos'][None]
    for d in range(DEPTH):
        xn = _layernorm(x, params['ln1_w'][d], params['ln1_b'][d])
        qkv = jnp.einsum('bte,fe->btf', xn, params['qkv_w'][d], precision=hp)
        q = qkv[..., :EMBED].reshape(B, T, HEADS, HEAD_DIM).transpose(0, 2, 1, 3)
        k = qkv[..., EMBED:2 * EMBED].reshape(B, T, HEADS, HEAD_DIM).transpose(0, 2, 1, 3)
        v = qkv[..., 2 * EMBED:].reshape(B, T, HEADS, HEAD_DIM).transpose(0, 2, 1, 3)
        a = jnp.einsum('bhqd,bhkd->bhqk', q, k, precision=hp) * SCALE
        a = _softmax(a)
        o = jnp.einsum('bhqk,bhkd->bhqd', a, v,
                       precision=hp).transpose(0, 2, 1, 3).reshape(B, T, EMBED)
        o = jnp.einsum('bte,fe->btf', o, params['proj_w'][d],
                       precision=hp) + params['proj_b'][d]
        x = x + o
        xn = _layernorm(x, params['ln2_w'][d], params['ln2_b'][d])
        h1 = jax.nn.gelu(jnp.einsum('bte,fe->btf', xn, params['fc1_w'][d],
                                    precision=hp) + params['fc1_b'][d],
                         approximate=False)
        h2 = jnp.einsum('bth,fh->btf', h1, params['fc2_w'][d],
                        precision=hp) + params['fc2_b'][d]
        x = x + h2
    x = _layernorm(x, params['norm_w'], params['norm_b'])
    cls_feat = x[:, 0]
    return jnp.einsum('be,ce->bc', cls_feat, params['head_w'],
                      precision=hp) + params['head_b']


# ---------------------------------- main ------------------------------------
if __name__ == "__main__":
    key = jax.random.PRNGKey(0)
    k_x, k_p, k_x2 = jax.random.split(key, 3)
    params = init_params(k_p)

    # Small batch (single grid step, unrolled attention path).
    x = jax.random.normal(k_x, (2, IN_CH, IMG, IMG), jnp.float32)     # NCHW input
    logits = jax.block_until_ready(vit_forward(x, params))
    ref = jax.block_until_ready(vit_reference(x, params))
    assert logits.shape == (2, NUM_CLASSES), logits.shape
    max_diff = float(jnp.max(jnp.abs(logits - ref)))
    if not jnp.all(jnp.isfinite(logits)) or max_diff > 2e-2:
        raise RuntimeError(f"kernel/reference mismatch (B=2), max_diff={max_diff}")

    # Larger batch: exercises multi-step grid, fori_loop attention and padding.
    x2 = jax.random.normal(k_x2, (20, IN_CH, IMG, IMG), jnp.float32)
    logits2 = jax.block_until_ready(vit_forward(x2, params))
    ref2 = jax.block_until_ready(vit_reference(x2, params))
    assert logits2.shape == (20, NUM_CLASSES), logits2.shape
    max_diff2 = float(jnp.max(jnp.abs(logits2 - ref2)))
    if not jnp.all(jnp.isfinite(logits2)) or max_diff2 > 2e-2:
        raise RuntimeError(f"kernel/reference mismatch (B=20), max_diff={max_diff2}")

    print("KERNEL_OK")
</pallas_src>

<mosaic_0001>
module attributes {stable_mosaic.version = 11 : i64} {
  func.func @vit_kernel(%arg0: i32, %arg1: memref<2x24x128xbf16, #tpu.memory_space<vmem>>, %arg2: memref<832x128xbf16, #tpu.memory_space<vmem>>, %arg3: memref<18x128xf32, #tpu.memory_space<vmem>>, %arg4: memref<2x128xf32, #tpu.memory_space<vmem>>, %arg5: memref<48x32xf32, #tpu.memory_space<vmem>>, %arg6: memref<48x32xf32, #tpu.memory_space<vmem>>, %arg7: memref<48x32xf32, #tpu.memory_space<vmem>>, %arg8: memref<48x32xf32, #tpu.memory_space<vmem>>) attributes {dimension_semantics = [#tpu.dimension_semantics<parallel>], iteration_bounds = array<i64: 1>, scalar_prefetch = 0 : i64, scratch_operands = 4 : i64, tpu.core_type = #tpu.core_type<tc>, window_params = [{transform_indices = @transform_0, window_bounds = array<i64: 2, 24, 128>}, {pipeline_mode = #tpu.pipeline_mode<synchronous>, transform_indices = @transform_1, window_bounds = array<i64: 832, 128>}, {pipeline_mode = #tpu.pipeline_mode<synchronous>, transform_indices = @transform_2, window_bounds = array<i64: 18, 128>}, {transform_indices = @transform_3, window_bounds = array<i64: 2, 128>}]} {
    %c128 = arith.constant 128 : index
    %c0 = arith.constant 0 : index
    %0 = vector.load %arg2[%c128, %c0] : memref<832x128xbf16, #tpu.memory_space<vmem>>, vector<96x32xbf16>
    %cst = arith.constant 0.000000e+00 : bf16
    %1 = vector.broadcast %cst : bf16 to vector<96x32xbf16>
    %2 = arith.cmpf one, %0, %1 : vector<96x32xbf16>
    %c0_0 = arith.constant 0 : index
    %c0_1 = arith.constant 0 : index
    %3 = vector.load %arg3[%c0_0, %c0_1] : memref<18x128xf32, #tpu.memory_space<vmem>>, vector<1x96xf32>
    %c0_2 = arith.constant 0 : index
    %c0_3 = arith.constant 0 : index
    %c0_4 = arith.constant 0 : index
    %4 = vector.load %arg1[%c0_2, %c0_3, %c0_4] : memref<2x24x128xbf16, #tpu.memory_space<vmem>>, vector<2x24x128xbf16>
    %5 = vector.shape_cast %4 : vector<2x24x128xbf16> to vector<48x128xbf16>
    %c0_5 = arith.constant 0 : index
    %c0_6 = arith.constant 0 : index
    %6 = vector.load %arg2[%c0_5, %c0_6] : memref<832x128xbf16, #tpu.memory_space<vmem>>, vector<128x32xbf16>
    %cst_7 = arith.constant dense<0.000000e+00> : vector<48x32xf32>
    %7 = tpu.matmul %5, %6, %cst_7 {dimension_numbers = #tpu.dot_dimension_numbers<[1], [0], [0], [1], [0, 0, 1, 1], [], []>} : vector<48x128xbf16>, vector<128x32xbf16>, vector<48x32xf32> -> vector<48x32xf32>
    %c4 = arith.constant 4 : index
    %c0_8 = arith.constant 0 : index
    %8 = vector.load %arg3[%c4, %c0_8] : memref<18x128xf32, #tpu.memory_space<vmem>>, vector<1x32xf32>
    %c5 = arith.constant 5 : index
    %c0_9 = arith.constant 0 : index
    %9 = vector.load %arg3[%c5, %c0_9] : memref<18x128xf32, #tpu.memory_space<vmem>>, vector<1x32xf32>
    %cst_10 = arith.constant dense<0.000000e+00> : vector<48xf32>
    %10 = vector.multi_reduction <add>, %7, %cst_10 [1] : vector<48x32xf32> to vector<48xf32>
    %11 = vector.shape_cast %10 : vector<48xf32> to vector<48x1xf32>
    %cst_11 = arith.constant 3.200000e+01 : f32
    %12 = vector.broadcast %cst_11 : f32 to vector<48x1xf32>
    %13 = arith.divf %11, %12 : vector<48x1xf32>
    %14 = vector.broadcast %13 : vector<48x1xf32> to vector<48x32xf32>
    %15 = arith.subf %7, %14 : vector<48x32xf32>
    %16 = arith.mulf %15, %15 : vector<48x32xf32>
    %cst_12 = arith.constant dense<0.000000e+00> : vector<48xf32>
    %17 = vector.multi_reduction <add>, %16, %cst_12 [1] : vector<48x32xf32> to vector<48xf32>
    %18 = vector.shape_cast %17 : vector<48xf32> to vector<48x1xf32>
    %cst_13 = arith.constant 3.200000e+01 : f32
    %19 = vector.broadcast %cst_13 : f32 to vector<48x1xf32>
    %20 = arith.divf %18, %19 : vector<48x1xf32>
    %21 = vector.broadcast %13 : vector<48x1xf32> to vector<48x32xf32>
    %22 = arith.subf %7, %21 : vector<48x32xf32>
    %cst_14 = arith.constant 9.99999974E-6 : f32
    %23 = vector.broadcast %cst_14 : f32 to vector<48x1xf32>
    %24 = arith.addf %20, %23 : vector<48x1xf32>
    %25 = math.rsqrt %24 : vector<48x1xf32>
    %26 = vector.broadcast %25 : vector<48x1xf32> to vector<48x32xf32>
    %27 = arith.mulf %22, %26 : vector<48x32xf32>
    %28 = vector.broadcast %8 : vector<1x32xf32> to vector<48x32xf32>
    %29 = arith.mulf %27, %28 : vector<48x32xf32>
    %30 = vector.broadcast %9 : vector<1x32xf32> to vector<48x32xf32>
    %31 = arith.addf %29, %30 : vector<48x32xf32>
    %32 = arith.truncf %31 : vector<48x32xf32> to vector<48x32xbf16>
    %c256 = arith.constant 256 : index
    %c0_15 = arith.constant 0 : index
    %33 = vector.load %arg2[%c256, %c0_15] : memref<832x128xbf16, #tpu.memory_space<vmem>>, vector<32x32xbf16>
    %cst_16 = arith.constant dense<0.000000e+00> : vector<48x32xf32>
    %34 = tpu.matmul %32, %33, %cst_16 {dimension_numbers = #tpu.dot_dimension_numbers<[1], [0], [0], [1], [0, 0, 1, 1], [], []>} : vector<48x32xbf16>, vector<32x32xbf16>, vector<48x32xf32> -> vector<48x32xf32>
    %c0_17 = arith.constant 0 : index
    %c0_18 = arith.constant 0 : index
    %35 = vector.load %arg5[%c0_17, %c0_18] : memref<48x32xf32, #tpu.memory_space<vmem>>, vector<48x32xf32>
    tpu.vector_store %arg5[%c0_17, %c0_18], %34 {strides = array<i32>} : memref<48x32xf32, #tpu.memory_space<vmem>>, vector<48x32xf32>,
    %c288 = arith.constant 288 : index
    %c0_19 = arith.constant 0 : index
    %36 = vector.load %arg2[%c288, %c0_19] : memref<832x128xbf16, #tpu.memory_space<vmem>>, vector<32x32xbf16>
    %cst_20 = arith.constant dense<0.000000e+00> : vector<48x32xf32>
    %37 = tpu.matmul %32, %36, %cst_20 {dimension_numbers = #tpu.dot_dimension_numbers<[1], [0], [0], [1], [0, 0, 1, 1], [], []>} : vector<48x32xbf16>, vector<32x32xbf16>, vector<48x32xf32> -> vector<48x32xf32>
    %c0_21 = arith.constant 0 : index
    %c0_22 = arith.constant 0 : index
    %38 = vector.load %arg6[%c0_21, %c0_22] : memref<48x32xf32, #tpu.memory_space<vmem>>, vector<48x32xf32>
    tpu.vector_store %arg6[%c0_21, %c0_22], %37 {strides = array<i32>} : memref<48x32xf32, #tpu.memory_space<vmem>>, vector<48x32xf32>,
    %c320 = arith.constant 320 : index
    %c0_23 = arith.constant 0 : index
    %39 = vector.load %arg2[%c320, %c0_23] : memref<832x128xbf16, #tpu.memory_space<vmem>>, vector<32x32xbf16>
    %cst_24 = arith.constant dense<0.000000e+00> : vector<48x32xf32>
    %40 = tpu.matmul %32, %39, %cst_24 {dimension_numbers = #tpu.dot_dimension_numbers<[1], [0], [0], [1], [0, 0, 1, 1], [], []>} : vector<48x32xbf16>, vector<32x32xbf16>, vector<48x32xf32> -> vector<48x32xf32>
    %c0_25 = arith.constant 0 : index
    %c0_26 = arith.constant 0 : index
    %41 = vector.load %arg7[%c0_25, %c0_26] : memref<48x32xf32, #tpu.memory_space<vmem>>, vector<48x32xf32>
    tpu.vector_store %arg7[%c0_25, %c0_26], %40 {strides = array<i32>} : memref<48x32xf32, #tpu.memory_space<vmem>>, vector<48x32xf32>,
    %c0_27 = arith.constant 0 : index
    %c0_28 = arith.constant 0 : index
    %42 = vector.load %arg5[%c0_27, %c0_28] : memref<48x32xf32, #tpu.memory_space<vmem>>, vector<24x32xf32>
    %c0_29 = arith.constant 0 : index
    %c0_30 = arith.constant 0 : index
    %43 = vector.load %arg6[%c0_29, %c0_30] : memref<48x32xf32, #tpu.memory_space<vmem>>, vector<24x32xf32>
    %c0_31 = arith.constant 0 : index
    %c0_32 = arith.constant 0 : index
    %44 = vector.load %arg7[%c0_31, %c0_32] : memref<48x32xf32, #tpu.memory_space<vmem>>, vector<24x32xf32>
    %45 = tpu.concatenate %43, %43, %43, %43 in 0 : vector<24x32xf32>, vector<24x32xf32>, vector<24x32xf32>, vector<24x32xf32> -> vector<96x32xf32>
    %cst_33 = arith.constant 0.000000e+00 : f32
    %46 = vector.broadcast %cst_33 : f32 to vector<96x32xf32>
    %47 = arith.select %2, %45, %46 : vector<96x32xi1>, vector<96x32xf32>
    %48 = tpu.concatenate %44, %44, %44, %44 in 0 : vector<24x32xf32>, vector<24x32xf32>, vector<24x32xf32>, vector<24x32xf32> -> vector<96x32xf32>
    %cst_34 = arith.constant 0.000000e+00 : f32
    %49 = vector.broadcast %cst_34 : f32 to vector<96x32xf32>
    %50 = arith.select %2, %48, %49 : vector<96x32xi1>, vector<96x32xf32>
    %51 = arith.truncf %42 : vector<24x32xf32> to vector<24x32xbf16>
    %52 = arith.truncf %47 : vector<96x32xf32> to vector<96x32xbf16>
    %cst_35 = arith.constant dense<0.000000e+00> : vector<24x96xf32>
    %53 = tpu.matmul %51, %52, %cst_35 {dimension_numbers = #tpu.dot_dimension_numbers<[1], [1], [0], [0], [0, 0, 1, 0], [], []>} : vector<24x32xbf16>, vector<96x32xbf16>, vector<24x96xf32> -> vector<24x96xf32>
    %54 = vector.broadcast %3 : vector<1x96xf32> to vector<24x96xf32>
    %55 = arith.addf %53, %54 : vector<24x96xf32>
    %cst_36 = arith.constant dense<0xFF800000> : vector<24xf32>
    %56 = vector.multi_reduction <maximumf>, %55, %cst_36 [1] : vector<24x96xf32> to vector<24xf32>
    %57 = vector.shape_cast %56 : vector<24xf32> to vector<24x1xf32>
    %58 = vector.broadcast %57 : vector<24x1xf32> to vector<24x96xf32>
    %59 = arith.subf %55, %58 : vector<24x96xf32>
    %60 = math.exp %59 : vector<24x96xf32>
    %61 = arith.truncf %60 : vector<24x96xf32> to vector<24x96xbf16>
    %62 = arith.truncf %50 : vector<96x32xf32> to vector<96x32xbf16>
    %cst_37 = arith.constant dense<0.000000e+00> : vector<24x32xf32>
    %63 = tpu.matmul %61, %62, %cst_37 {dimension_numbers = #tpu.dot_dimension_numbers<[1], [0], [0], [1], [0, 0, 1, 1], [], []>} : vector<24x96xbf16>, vector<96x32xbf16>, vector<24x32xf32> -> vector<24x32xf32>
    %cst_38 = arith.constant dense<0.000000e+00> : vector<24x32xf32>
    %64 = tpu.matmul %61, %0, %cst_38 {dimension_numbers = #tpu.dot_dimension_numbers<[1], [0], [0], [1], [0, 0, 1, 1], [], []>} : vector<24x96xbf16>, vector<96x32xbf16>, vector<24x32xf32> -> vector<24x32xf32>
    %65 = tpu.reciprocal %64 {approx = true} : vector<24x32xf32> -> vector<24x32xf32>
    %66 = arith.mulf %63, %65 : vector<24x32xf32>
    %c0_39 = arith.constant 0 : index
    %c0_40 = arith.constant 0 : index
    %67 = vector.load %arg8[%c0_39, %c0_40] : memref<48x32xf32, #tpu.memory_space<vmem>>, vector<24x32xf32>
    tpu.vector_store %arg8[%c0_39, %c0_40], %66 {strides = array<i32>} : memref<48x32xf32, #tpu.memory_space<vmem>>, vector<24x32xf32>,
    %c24 = arith.constant 24 : index
    %c0_41 = arith.constant 0 : index
    %68 = vector.load %arg5[%c24, %c0_41] : memref<48x32xf32, #tpu.memory_space<vmem>>, vector<24x32xf32>
    %c24_42 = arith.constant 24 : index
    %c0_43 = arith.constant 0 : index
    %69 = vector.load %arg6[%c24_42, %c0_43] : memref<48x32xf32, #tpu.memory_space<vmem>>, vector<24x32xf32>
    %c24_44 = arith.constant 24 : index
    %c0_45 = arith.constant 0 : index
    %70 = vector.load %arg7[%c24_44, %c0_45] : memref<48x32xf32, #tpu.memory_space<vmem>>, vector<24x32xf32>
    %71 = tpu.concatenate %69, %69, %69, %69 in 0 : vector<24x32xf32>, vector<24x32xf32>, vector<24x32xf32>, vector<24x32xf32> -> vector<96x32xf32>
    %cst_46 = arith.constant 0.000000e+00 : f32
    %72 = vector.broadcast %cst_46 : f32 to vector<96x32xf32>
    %73 = arith.select %2, %71, %72 : vector<96x32xi1>, vector<96x32xf32>
    %74 = tpu.concatenate %70, %70, %70, %70 in 0 : vector<24x32xf32>, vector<24x32xf32>, vector<24x32xf32>, vector<24x32xf32> -> vector<96x32xf32>
    %cst_47 = arith.constant 0.000000e+00 : f32
    %75 = vector.broadcast %cst_47 : f32 to vector<96x32xf32>
    %76 = arith.select %2, %74, %75 : vector<96x32xi1>, vector<96x32xf32>
    %77 = arith.truncf %68 : vector<24x32xf32> to vector<24x32xbf16>
    %78 = arith.truncf %73 : vector<96x32xf32> to vector<96x32xbf16>
    %cst_48 = arith.constant dense<0.000000e+00> : vector<24x96xf32>
    %79 = tpu.matmul %77, %78, %cst_48 {dimension_numbers = #tpu.dot_dimension_numbers<[1], [1], [0], [0], [0, 0, 1, 0], [], []>} : vector<24x32xbf16>, vector<96x32xbf16>, vector<24x96xf32> -> vector<24x96xf32>
    %80 = vector.broadcast %3 : vector<1x96xf32> to vector<24x96xf32>
    %81 = arith.addf %79, %80 : vector<24x96xf32>
    %cst_49 = arith.constant dense<0xFF800000> : vector<24xf32>
    %82 = vector.multi_reduction <maximumf>, %81, %cst_49 [1] : vector<24x96xf32> to vector<24xf32>
    %83 = vector.shape_cast %82 : vector<24xf32> to vector<24x1xf32>
    %84 = vector.broadcast %83 : vector<24x1xf32> to vector<24x96xf32>
    %85 = arith.subf %81, %84 : vector<24x96xf32>
    %86 = math.exp %85 : vector<24x96xf32>
    %87 = arith.truncf %86 : vector<24x96xf32> to vector<24x96xbf16>
    %88 = arith.truncf %76 : vector<96x32xf32> to vector<96x32xbf16>
    %cst_50 = arith.constant dense<0.000000e+00> : vector<24x32xf32>
    %89 = tpu.matmul %87, %88, %cst_50 {dimension_numbers = #tpu.dot_dimension_numbers<[1], [0], [0], [1], [0, 0, 1, 1], [], []>} : vector<24x96xbf16>, vector<96x32xbf16>, vector<24x32xf32> -> vector<24x32xf32>
    %cst_51 = arith.constant dense<0.000000e+00> : vector<24x32xf32>
    %90 = tpu.matmul %87, %0, %cst_51 {dimension_numbers = #tpu.dot_dimension_numbers<[1], [0], [0], [1], [0, 0, 1, 1], [], []>} : vector<24x96xbf16>, vector<96x32xbf16>, vector<24x32xf32> -> vector<24x32xf32>
    %91 = tpu.reciprocal %90 {approx = true} : vector<24x32xf32> -> vector<24x32xf32>
    %92 = arith.mulf %89, %91 : vector<24x32xf32>
    %c24_52 = arith.constant 24 : index
    %c0_53 = arith.constant 0 : index
    %93 = vector.load %arg8[%c24_52, %c0_53] : memref<48x32xf32, #tpu.memory_space<vmem>>, vector<24x32xf32>
    tpu.vector_store %arg8[%c24_52, %c0_53], %92 {strides = array<i32>} : memref<48x32xf32, #tpu.memory_space<vmem>>, vector<24x32xf32>,
    %c0_54 = arith.constant 0 : index
    %c0_55 = arith.constant 0 : index
    %94 = vector.load %arg8[%c0_54, %c0_55] : memref<48x32xf32, #tpu.memory_space<vmem>>, vector<48x32xf32>
    %95 = arith.truncf %94 : vector<48x32xf32> to vector<48x32xbf16>
    %c352 = arith.constant 352 : index
    %c0_56 = arith.constant 0 : index
    %96 = vector.load %arg2[%c352, %c0_56] : memref<832x128xbf16, #tpu.memory_space<vmem>>, vector<32x32xbf16>
    %cst_57 = arith.constant dense<0.000000e+00> : vector<48x32xf32>
    %97 = tpu.matmul %95, %96, %cst_57 {dimension_numbers = #tpu.dot_dimension_numbers<[1], [0], [0], [1], [0, 0, 1, 1], [], []>} : vector<48x32xbf16>, vector<32x32xbf16>, vector<48x32xf32> -> vector<48x32xf32>
    %c6 = arith.constant 6 : index
    %c0_58 = arith.constant 0 : index
    %98 = vector.load %arg3[%c6, %c0_58] : memref<18x128xf32, #tpu.memory_space<vmem>>, vector<1x32xf32>
    %99 = vector.broadcast %98 : vector<1x32xf32> to vector<48x32xf32>
    %100 = arith.addf %97, %99 : vector<48x32xf32>
    %101 = arith.addf %7, %100 : vector<48x32xf32>
    %c7 = arith.constant 7 : index
    %c0_59 = arith.constant 0 : index
    %102 = vector.load %arg3[%c7, %c0_59] : memref<18x128xf32, #tpu.memory_space<vmem>>, vector<1x32xf32>
    %c8 = arith.constant 8 : index
    %c0_60 = arith.constant 0 : index
    %103 = vector.load %arg3[%c8, %c0_60] : memref<18x128xf32, #tpu.memory_space<vmem>>, vector<1x32xf32>
    %cst_61 = arith.constant dense<0.000000e+00> : vector<48xf32>
    %104 = vector.multi_reduction <add>, %101, %cst_61 [1] : vector<48x32xf32> to vector<48xf32>
    %105 = vector.shape_cast %104 : vector<48xf32> to vector<48x1xf32>
    %cst_62 = arith.constant 3.200000e+01 : f32
    %106 = vector.broadcast %cst_62 : f32 to vector<48x1xf32>
    %107 = arith.divf %105, %106 : vector<48x1xf32>
    %108 = vector.broadcast %107 : vector<48x1xf32> to vector<48x32xf32>
    %109 = arith.subf %101, %108 : vector<48x32xf32>
    %110 = arith.mulf %109, %109 : vector<48x32xf32>
    %cst_63 = arith.constant dense<0.000000e+00> : vector<48xf32>
    %111 = vector.multi_reduction <add>, %110, %cst_63 [1] : vector<48x32xf32> to vector<48xf32>
    %112 = vector.shape_cast %111 : vector<48xf32> to vector<48x1xf32>
    %cst_64 = arith.constant 3.200000e+01 : f32
    %113 = vector.broadcast %cst_64 : f32 to vector<48x1xf32>
    %114 = arith.divf %112, %113 : vector<48x1xf32>
    %115 = vector.broadcast %107 : vector<48x1xf32> to vector<48x32xf32>
    %116 = arith.subf %101, %115 : vector<48x32xf32>
    %cst_65 = arith.constant 9.99999974E-6 : f32
    %117 = vector.broadcast %cst_65 : f32 to vector<48x1xf32>
    %118 = arith.addf %114, %117 : vector<48x1xf32>
    %119 = math.rsqrt %118 : vector<48x1xf32>
    %120 = vector.broadcast %119 : vector<48x1xf32> to vector<48x32xf32>
    %121 = arith.mulf %116, %120 : vector<48x32xf32>
    %122 = vector.broadcast %102 : vector<1x32xf32> to vector<48x32xf32>
    %123 = arith.mulf %121, %122 : vector<48x32xf32>
    %124 = vector.broadcast %103 : vector<1x32xf32> to vector<48x32xf32>
    %125 = arith.addf %123, %124 : vector<48x32xf32>
    %126 = arith.truncf %125 : vector<48x32xf32> to vector<48x32xbf16>
    %c384 = arith.constant 384 : index
    %c0_66 = arith.constant 0 : index
    %127 = vector.load %arg2[%c384, %c0_66] : memref<832x128xbf16, #tpu.memory_space<vmem>>, vector<32x128xbf16>
    %cst_67 = arith.constant dense<0.000000e+00> : vector<48x128xf32>
    %128 = tpu.matmul %126, %127, %cst_67 {dimension_numbers = #tpu.dot_dimension_numbers<[1], [0], [0], [1], [0, 0, 1, 1], [], []>} : vector<48x32xbf16>, vector<32x128xbf16>, vector<48x128xf32> -> vector<48x128xf32>
    %c9 = arith.constant 9 : index
    %c0_68 = arith.constant 0 : index
    %129 = vector.load %arg3[%c9, %c0_68] : memref<18x128xf32, #tpu.memory_space<vmem>>, vector<1x128xf32>
    %130 = vector.broadcast %129 : vector<1x128xf32> to vector<48x128xf32>
    %131 = arith.addf %128, %130 : vector<48x128xf32>
    %cst_69 = arith.constant 5.000000e-01 : f32
    %132 = vector.broadcast %cst_69 : f32 to vector<48x128xf32>
    %133 = arith.mulf %132, %131 : vector<48x128xf32>
    %cst_70 = arith.constant 4.471500e-02 : f32
    %134 = vector.broadcast %cst_70 : f32 to vector<48x128xf32>
    %135 = arith.mulf %134, %131 : vector<48x128xf32>
    %136 = arith.mulf %135, %131 : vector<48x128xf32>
    %137 = arith.mulf %136, %131 : vector<48x128xf32>
    %138 = arith.addf %131, %137 : vector<48x128xf32>
    %cst_71 = arith.constant 0.797884583 : f32
    %139 = vector.broadcast %cst_71 : f32 to vector<48x128xf32>
    %140 = arith.mulf %139, %138 : vector<48x128xf32>
    %141 = math.tanh %140 : vector<48x128xf32>
    %cst_72 = arith.constant 1.000000e+00 : f32
    %142 = vector.broadcast %cst_72 : f32 to vector<48x128xf32>
    %143 = arith.addf %142, %141 : vector<48x128xf32>
    %144 = arith.mulf %133, %143 : vector<48x128xf32>
    %145 = arith.truncf %144 : vector<48x128xf32> to vector<48x128xbf16>
    %c416 = arith.constant 416 : index
    %c0_73 = arith.constant 0 : index
    %146 = vector.load %arg2[%c416, %c0_73] : memref<832x128xbf16, #tpu.memory_space<vmem>>, vector<128x32xbf16>
    %cst_74 = arith.constant dense<0.000000e+00> : vector<48x32xf32>
    %147 = tpu.matmul %145, %146, %cst_74 {dimension_numbers = #tpu.dot_dimension_numbers<[1], [0], [0], [1], [0, 0, 1, 1], [], []>} : vector<48x128xbf16>, vector<128x32xbf16>, vector<48x32xf32> -> vector<48x32xf32>
    %c10 = arith.constant 10 : index
    %c0_75 = arith.constant 0 : index
    %148 = vector.load %arg3[%c10, %c0_75] : memref<18x128xf32, #tpu.memory_space<vmem>>, vector<1x32xf32>
    %149 = vector.broadcast %148 : vector<1x32xf32> to vector<48x32xf32>
    %150 = arith.addf %147, %149 : vector<48x32xf32>
    %151 = arith.addf %101, %150 : vector<48x32xf32>
    %c11 = arith.constant 11 : index
    %c0_76 = arith.constant 0 : index
    %152 = vector.load %arg3[%c11, %c0_76] : memref<18x128xf32, #tpu.memory_space<vmem>>, vector<1x32xf32>
    %c12 = arith.constant 12 : index
    %c0_77 = arith.constant 0 : index
    %153 = vector.load %arg3[%c12, %c0_77] : memref<18x128xf32, #tpu.memory_space<vmem>>, vector<1x32xf32>
    %cst_78 = arith.constant dense<0.000000e+00> : vector<48xf32>
    %154 = vector.multi_reduction <add>, %151, %cst_78 [1] : vector<48x32xf32> to vector<48xf32>
    %155 = vector.shape_cast %154 : vector<48xf32> to vector<48x1xf32>
    %cst_79 = arith.constant 3.200000e+01 : f32
    %156 = vector.broadcast %cst_79 : f32 to vector<48x1xf32>
    %157 = arith.divf %155, %156 : vector<48x1xf32>
    %158 = vector.broadcast %157 : vector<48x1xf32> to vector<48x32xf32>
    %159 = arith.subf %151, %158 : vector<48x32xf32>
    %160 = arith.mulf %159, %159 : vector<48x32xf32>
    %cst_80 = arith.constant dense<0.000000e+00> : vector<48xf32>
    %161 = vector.multi_reduction <add>, %160, %cst_80 [1] : vector<48x32xf32> to vector<48xf32>
    %162 = vector.shape_cast %161 : vector<48xf32> to vector<48x1xf32>
    %cst_81 = arith.constant 3.200000e+01 : f32
    %163 = vector.broadcast %cst_81 : f32 to vector<48x1xf32>
    %164 = arith.divf %162, %163 : vector<48x1xf32>
    %165 = vector.broadcast %157 : vector<48x1xf32> to vector<48x32xf32>
    %166 = arith.subf %151, %165 : vector<48x32xf32>
    %cst_82 = arith.constant 9.99999974E-6 : f32
    %167 = vector.broadcast %cst_82 : f32 to vector<48x1xf32>
    %168 = arith.addf %164, %167 : vector<48x1xf32>
    %169 = math.rsqrt %168 : vector<48x1xf32>
    %170 = vector.broadcast %169 : vector<48x1xf32> to vector<48x32xf32>
    %171 = arith.mulf %166, %170 : vector<48x32xf32>
    %172 = vector.broadcast %152 : vector<1x32xf32> to vector<48x32xf32>
    %173 = arith.mulf %171, %172 : vector<48x32xf32>
    %174 = vector.broadcast %153 : vector<1x32xf32> to vector<48x32xf32>
    %175 = arith.addf %173, %174 : vector<48x32xf32>
    %176 = arith.truncf %175 : vector<48x32xf32> to vector<48x32xbf16>
    %c544 = arith.constant 544 : index
    %c0_83 = arith.constant 0 : index
    %177 = vector.load %arg2[%c544, %c0_83] : memref<832x128xbf16, #tpu.memory_space<vmem>>, vector<32x32xbf16>
    %cst_84 = arith.constant dense<0.000000e+00> : vector<48x32xf32>
    %178 = tpu.matmul %176, %177, %cst_84 {dimension_numbers = #tpu.dot_dimension_numbers<[1], [0], [0], [1], [0, 0, 1, 1], [], []>} : vector<48x32xbf16>, vector<32x32xbf16>, vector<48x32xf32> -> vector<48x32xf32>
    %c0_85 = arith.constant 0 : index
    %c0_86 = arith.constant 0 : index
    %179 = vector.load %arg5[%c0_85, %c0_86] : memref<48x32xf32, #tpu.memory_space<vmem>>, vector<48x32xf32>
    tpu.vector_store %arg5[%c0_85, %c0_86], %178 {strides = array<i32>} : memref<48x32xf32, #tpu.memory_space<vmem>>, vector<48x32xf32>,
    %c576 = arith.constant 576 : index
    %c0_87 = arith.constant 0 : index
    %180 = vector.load %arg2[%c576, %c0_87] : memref<832x128xbf16, #tpu.memory_space<vmem>>, vector<32x32xbf16>
    %cst_88 = arith.constant dense<0.000000e+00> : vector<48x32xf32>
    %181 = tpu.matmul %176, %180, %cst_88 {dimension_numbers = #tpu.dot_dimension_numbers<[1], [0], [0], [1], [0, 0, 1, 1], [], []>} : vector<48x32xbf16>, vector<32x32xbf16>, vector<48x32xf32> -> vector<48x32xf32>
    %c0_89 = arith.constant 0 : index
    %c0_90 = arith.constant 0 : index
    %182 = vector.load %arg6[%c0_89, %c0_90] : memref<48x32xf32, #tpu.memory_space<vmem>>, vector<48x32xf32>
    tpu.vector_store %arg6[%c0_89, %c0_90], %181 {strides = array<i32>} : memref<48x32xf32, #tpu.memory_space<vmem>>, vector<48x32xf32>,
    %c608 = arith.constant 608 : index
    %c0_91 = arith.constant 0 : index
    %183 = vector.load %arg2[%c608, %c0_91] : memref<832x128xbf16, #tpu.memory_space<vmem>>, vector<32x32xbf16>
    %cst_92 = arith.constant dense<0.000000e+00> : vector<48x32xf32>
    %184 = tpu.matmul %176, %183, %cst_92 {dimension_numbers = #tpu.dot_dimension_numbers<[1], [0], [0], [1], [0, 0, 1, 1], [], []>} : vector<48x32xbf16>, vector<32x32xbf16>, vector<48x32xf32> -> vector<48x32xf32>
    %c0_93 = arith.constant 0 : index
    %c0_94 = arith.constant 0 : index
    %185 = vector.load %arg7[%c0_93, %c0_94] : memref<48x32xf32, #tpu.memory_space<vmem>>, vector<48x32xf32>
    tpu.vector_store %arg7[%c0_93, %c0_94], %184 {strides = array<i32>} : memref<48x32xf32, #tpu.memory_space<vmem>>, vector<48x32xf32>,
    %c0_95 = arith.constant 0 : index
    %c0_96 = arith.constant 0 : index
    %186 = vector.load %arg5[%c0_95, %c0_96] : memref<48x32xf32, #tpu.memory_space<vmem>>, vector<24x32xf32>
    %c0_97 = arith.constant 0 : index
    %c0_98 = arith.constant 0 : index
    %187 = vector.load %arg6[%c0_97, %c0_98] : memref<48x32xf32, #tpu.memory_space<vmem>>, vector<24x32xf32>
    %c0_99 = arith.constant 0 : index
    %c0_100 = arith.constant 0 : index
    %188 = vector.load %arg7[%c0_99, %c0_100] : memref<48x32xf32, #tpu.memory_space<vmem>>, vector<24x32xf32>
    %189 = tpu.concatenate %187, %187, %187, %187 in 0 : vector<24x32xf32>, vector<24x32xf32>, vector<24x32xf32>, vector<24x32xf32> -> vector<96x32xf32>
    %cst_101 = arith.constant 0.000000e+00 : f32
    %190 = vector.broadcast %cst_101 : f32 to vector<96x32xf32>
    %191 = arith.select %2, %189, %190 : vector<96x32xi1>, vector<96x32xf32>
    %192 = tpu.concatenate %188, %188, %188, %188 in 0 : vector<24x32xf32>, vector<24x32xf32>, vector<24x32xf32>, vector<24x32xf32> -> vector<96x32xf32>
    %cst_102 = arith.constant 0.000000e+00 : f32
    %193 = vector.broadcast %cst_102 : f32 to vector<96x32xf32>
    %194 = arith.select %2, %192, %193 : vector<96x32xi1>, vector<96x32xf32>
    %195 = arith.truncf %186 : vector<24x32xf32> to vector<24x32xbf16>
    %196 = arith.truncf %191 : vector<96x32xf32> to vector<96x32xbf16>
    %cst_103 = arith.constant dense<0.000000e+00> : vector<24x96xf32>
    %197 = tpu.matmul %195, %196, %cst_103 {dimension_numbers = #tpu.dot_dimension_numbers<[1], [1], [0], [0], [0, 0, 1, 0], [], []>} : vector<24x32xbf16>, vector<96x32xbf16>, vector<24x96xf32> -> vector<24x96xf32>
    %198 = vector.broadcast %3 : vector<1x96xf32> to vector<24x96xf32>
    %199 = arith.addf %197, %198 : vector<24x96xf32>
    %cst_104 = arith.constant dense<0xFF800000> : vector<24xf32>
    %200 = vector.multi_reduction <maximumf>, %199, %cst_104 [1] : vector<24x96xf32> to vector<24xf32>
    %201 = vector.shape_cast %200 : vector<24xf32> to vector<24x1xf32>
    %202 = vector.broadcast %201 : vector<24x1xf32> to vector<24x96xf32>
    %203 = arith.subf %199, %202 : vector<24x96xf32>
    %204 = math.exp %203 : vector<24x96xf32>
    %205 = arith.truncf %204 : vector<24x96xf32> to vector<24x96xbf16>
    %206 = arith.truncf %194 : vector<96x32xf32> to vector<96x32xbf16>
    %cst_105 = arith.constant dense<0.000000e+00> : vector<24x32xf32>
    %207 = tpu.matmul %205, %206, %cst_105 {dimension_numbers = #tpu.dot_dimension_numbers<[1], [0], [0], [1], [0, 0, 1, 1], [], []>} : vector<24x96xbf16>, vector<96x32xbf16>, vector<24x32xf32> -> vector<24x32xf32>
    %cst_106 = arith.constant dense<0.000000e+00> : vector<24x32xf32>
    %208 = tpu.matmul %205, %0, %cst_106 {dimension_numbers = #tpu.dot_dimension_numbers<[1], [0], [0], [1], [0, 0, 1, 1], [], []>} : vector<24x96xbf16>, vector<96x32xbf16>, vector<24x32xf32> -> vector<24x32xf32>
    %209 = tpu.reciprocal %208 {approx = true} : vector<24x32xf32> -> vector<24x32xf32>
    %210 = arith.mulf %207, %209 : vector<24x32xf32>
    %c0_107 = arith.constant 0 : index
    %c0_108 = arith.constant 0 : index
    %211 = vector.load %arg8[%c0_107, %c0_108] : memref<48x32xf32, #tpu.memory_space<vmem>>, vector<24x32xf32>
    tpu.vector_store %arg8[%c0_107, %c0_108], %210 {strides = array<i32>} : memref<48x32xf32, #tpu.memory_space<vmem>>, vector<24x32xf32>,
    %c24_109 = arith.constant 24 : index
    %c0_110 = arith.constant 0 : index
    %212 = vector.load %arg5[%c24_109, %c0_110] : memref<48x32xf32, #tpu.memory_space<vmem>>, vector<24x32xf32>
    %c24_111 = arith.constant 24 : index
    %c0_112 = arith.constant 0 : index
    %213 = vector.load %arg6[%c24_111, %c0_112] : memref<48x32xf32, #tpu.memory_space<vmem>>, vector<24x32xf32>
    %c24_113 = arith.constant 24 : index
    %c0_114 = arith.constant 0 : index
    %214 = vector.load %arg7[%c24_113, %c0_114] : memref<48x32xf32, #tpu.memory_space<vmem>>, vector<24x32xf32>
    %215 = tpu.concatenate %213, %213, %213, %213 in 0 : vector<24x32xf32>, vector<24x32xf32>, vector<24x32xf32>, vector<24x32xf32> -> vector<96x32xf32>
    %cst_115 = arith.constant 0.000000e+00 : f32
    %216 = vector.broadcast %cst_115 : f32 to vector<96x32xf32>
    %217 = arith.select %2, %215, %216 : vector<96x32xi1>, vector<96x32xf32>
    %218 = tpu.concatenate %214, %214, %214, %214 in 0 : vector<24x32xf32>, vector<24x32xf32>, vector<24x32xf32>, vector<24x32xf32> -> vector<96x32xf32>
    %cst_116 = arith.constant 0.000000e+00 : f32
    %219 = vector.broadcast %cst_116 : f32 to vector<96x32xf32>
    %220 = arith.select %2, %218, %219 : vector<96x32xi1>, vector<96x32xf32>
    %221 = arith.truncf %212 : vector<24x32xf32> to vector<24x32xbf16>
    %222 = arith.truncf %217 : vector<96x32xf32> to vector<96x32xbf16>
    %cst_117 = arith.constant dense<0.000000e+00> : vector<24x96xf32>
    %223 = tpu.matmul %221, %222, %cst_117 {dimension_numbers = #tpu.dot_dimension_numbers<[1], [1], [0], [0], [0, 0, 1, 0], [], []>} : vector<24x32xbf16>, vector<96x32xbf16>, vector<24x96xf32> -> vector<24x96xf32>
    %224 = vector.broadcast %3 : vector<1x96xf32> to vector<24x96xf32>
    %225 = arith.addf %223, %224 : vector<24x96xf32>
    %cst_118 = arith.constant dense<0xFF800000> : vector<24xf32>
    %226 = vector.multi_reduction <maximumf>, %225, %cst_118 [1] : vector<24x96xf32> to vector<24xf32>
    %227 = vector.shape_cast %226 : vector<24xf32> to vector<24x1xf32>
    %228 = vector.broadcast %227 : vector<24x1xf32> to vector<24x96xf32>
    %229 = arith.subf %225, %228 : vector<24x96xf32>
    %230 = math.exp %229 : vector<24x96xf32>
    %231 = arith.truncf %230 : vector<24x96xf32> to vector<24x96xbf16>
    %232 = arith.truncf %220 : vector<96x32xf32> to vector<96x32xbf16>
    %cst_119 = arith.constant dense<0.000000e+00> : vector<24x32xf32>
    %233 = tpu.matmul %231, %232, %cst_119 {dimension_numbers = #tpu.dot_dimension_numbers<[1], [0], [0], [1], [0, 0, 1, 1], [], []>} : vector<24x96xbf16>, vector<96x32xbf16>, vector<24x32xf32> -> vector<24x32xf32>
    %cst_120 = arith.constant dense<0.000000e+00> : vector<24x32xf32>
    %234 = tpu.matmul %231, %0, %cst_120 {dimension_numbers = #tpu.dot_dimension_numbers<[1], [0], [0], [1], [0, 0, 1, 1], [], []>} : vector<24x96xbf16>, vector<96x32xbf16>, vector<24x32xf32> -> vector<24x32xf32>
    %235 = tpu.reciprocal %234 {approx = true} : vector<24x32xf32> -> vector<24x32xf32>
    %236 = arith.mulf %233, %235 : vector<24x32xf32>
    %c24_121 = arith.constant 24 : index
    %c0_122 = arith.constant 0 : index
    %237 = vector.load %arg8[%c24_121, %c0_122] : memref<48x32xf32, #tpu.memory_space<vmem>>, vector<24x32xf32>
    tpu.vector_store %arg8[%c24_121, %c0_122], %236 {strides = array<i32>} : memref<48x32xf32, #tpu.memory_space<vmem>>, vector<24x32xf32>,
    %c0_123 = arith.constant 0 : index
    %c0_124 = arith.constant 0 : index
    %238 = vector.load %arg8[%c0_123, %c0_124] : memref<48x32xf32, #tpu.memory_space<vmem>>, vector<48x32xf32>
    %239 = arith.truncf %238 : vector<48x32xf32> to vector<48x32xbf16>
    %c640 = arith.constant 640 : index
    %c0_125 = arith.constant 0 : index
    %240 = vector.load %arg2[%c640, %c0_125] : memref<832x128xbf16, #tpu.memory_space<vmem>>, vector<32x32xbf16>
    %cst_126 = arith.constant dense<0.000000e+00> : vector<48x32xf32>
    %241 = tpu.matmul %239, %240, %cst_126 {dimension_numbers = #tpu.dot_dimension_numbers<[1], [0], [0], [1], [0, 0, 1, 1], [], []>} : vector<48x32xbf16>, vector<32x32xbf16>, vector<48x32xf32> -> vector<48x32xf32>
    %c13 = arith.constant 13 : index
    %c0_127 = arith.constant 0 : index
    %242 = vector.load %arg3[%c13, %c0_127] : memref<18x128xf32, #tpu.memory_space<vmem>>, vector<1x32xf32>
    %243 = vector.broadcast %242 : vector<1x32xf32> to vector<48x32xf32>
    %244 = arith.addf %241, %243 : vector<48x32xf32>
    %245 = arith.addf %151, %244 : vector<48x32xf32>
    %c14 = arith.constant 14 : index
    %c0_128 = arith.constant 0 : index
    %246 = vector.load %arg3[%c14, %c0_128] : memref<18x128xf32, #tpu.memory_space<vmem>>, vector<1x32xf32>
    %c15 = arith.constant 15 : index
    %c0_129 = arith.constant 0 : index
    %247 = vector.load %arg3[%c15, %c0_129] : memref<18x128xf32, #tpu.memory_space<vmem>>, vector<1x32xf32>
    %cst_130 = arith.constant dense<0.000000e+00> : vector<48xf32>
    %248 = vector.multi_reduction <add>, %245, %cst_130 [1] : vector<48x32xf32> to vector<48xf32>
    %249 = vector.shape_cast %248 : vector<48xf32> to vector<48x1xf32>
    %cst_131 = arith.constant 3.200000e+01 : f32
    %250 = vector.broadcast %cst_131 : f32 to vector<48x1xf32>
    %251 = arith.divf %249, %250 : vector<48x1xf32>
    %252 = vector.broadcast %251 : vector<48x1xf32> to vector<48x32xf32>
    %253 = arith.subf %245, %252 : vector<48x32xf32>
    %254 = arith.mulf %253, %253 : vector<48x32xf32>
    %cst_132 = arith.constant dense<0.000000e+00> : vector<48xf32>
    %255 = vector.multi_reduction <add>, %254, %cst_132 [1] : vector<48x32xf32> to vector<48xf32>
    %256 = vector.shape_cast %255 : vector<48xf32> to vector<48x1xf32>
    %cst_133 = arith.constant 3.200000e+01 : f32
    %257 = vector.broadcast %cst_133 : f32 to vector<48x1xf32>
    %258 = arith.divf %256, %257 : vector<48x1xf32>
    %259 = vector.broadcast %251 : vector<48x1xf32> to vector<48x32xf32>
    %260 = arith.subf %245, %259 : vector<48x32xf32>
    %cst_134 = arith.constant 9.99999974E-6 : f32
    %261 = vector.broadcast %cst_134 : f32 to vector<48x1xf32>
    %262 = arith.addf %258, %261 : vector<48x1xf32>
    %263 = math.rsqrt %262 : vector<48x1xf32>
    %264 = vector.broadcast %263 : vector<48x1xf32> to vector<48x32xf32>
    %265 = arith.mulf %260, %264 : vector<48x32xf32>
    %266 = vector.broadcast %246 : vector<1x32xf32> to vector<48x32xf32>
    %267 = arith.mulf %265, %266 : vector<48x32xf32>
    %268 = vector.broadcast %247 : vector<1x32xf32> to vector<48x32xf32>
    %269 = arith.addf %267, %268 : vector<48x32xf32>
    %270 = arith.truncf %269 : vector<48x32xf32> to vector<48x32xbf16>
    %c672 = arith.constant 672 : index
    %c0_135 = arith.constant 0 : index
    %271 = vector.load %arg2[%c672, %c0_135] : memref<832x128xbf16, #tpu.memory_space<vmem>>, vector<32x128xbf16>
    %cst_136 = arith.constant dense<0.000000e+00> : vector<48x128xf32>
    %272 = tpu.matmul %270, %271, %cst_136 {dimension_numbers = #tpu.dot_dimension_numbers<[1], [0], [0], [1], [0, 0, 1, 1], [], []>} : vector<48x32xbf16>, vector<32x128xbf16>, vector<48x128xf32> -> vector<48x128xf32>
    %c16 = arith.constant 16 : index
    %c0_137 = arith.constant 0 : index
    %273 = vector.load %arg3[%c16, %c0_137] : memref<18x128xf32, #tpu.memory_space<vmem>>, vector<1x128xf32>
    %274 = vector.broadcast %273 : vector<1x128xf32> to vector<48x128xf32>
    %275 = arith.addf %272, %274 : vector<48x128xf32>
    %cst_138 = arith.constant 5.000000e-01 : f32
    %276 = vector.broadcast %cst_138 : f32 to vector<48x128xf32>
    %277 = arith.mulf %276, %275 : vector<48x128xf32>
    %cst_139 = arith.constant 4.471500e-02 : f32
    %278 = vector.broadcast %cst_139 : f32 to vector<48x128xf32>
    %279 = arith.mulf %278, %275 : vector<48x128xf32>
    %280 = arith.mulf %279, %275 : vector<48x128xf32>
    %281 = arith.mulf %280, %275 : vector<48x128xf32>
    %282 = arith.addf %275, %281 : vector<48x128xf32>
    %cst_140 = arith.constant 0.797884583 : f32
    %283 = vector.broadcast %cst_140 : f32 to vector<48x128xf32>
    %284 = arith.mulf %283, %282 : vector<48x128xf32>
    %285 = math.tanh %284 : vector<48x128xf32>
    %cst_141 = arith.constant 1.000000e+00 : f32
    %286 = vector.broadcast %cst_141 : f32 to vector<48x128xf32>
    %287 = arith.addf %286, %285 : vector<48x128xf32>
    %288 = arith.mulf %277, %287 : vector<48x128xf32>
    %289 = arith.truncf %288 : vector<48x128xf32> to vector<48x128xbf16>
    %c704 = arith.constant 704 : index
    %c0_142 = arith.constant 0 : index
    %290 = vector.load %arg2[%c704, %c0_142] : memref<832x128xbf16, #tpu.memory_space<vmem>>, vector<128x32xbf16>
    %cst_143 = arith.constant dense<0.000000e+00> : vector<48x32xf32>
    %291 = tpu.matmul %289, %290, %cst_143 {dimension_numbers = #tpu.dot_dimension_numbers<[1], [0], [0], [1], [0, 0, 1, 1], [], []>} : vector<48x128xbf16>, vector<128x32xbf16>, vector<48x32xf32> -> vector<48x32xf32>
    %c17 = arith.constant 17 : index
    %c0_144 = arith.constant 0 : index
    %292 = vector.load %arg3[%c17, %c0_144] : memref<18x128xf32, #tpu.memory_space<vmem>>, vector<1x32xf32>
    %293 = vector.broadcast %292 : vector<1x32xf32> to vector<48x32xf32>
    %294 = arith.addf %291, %293 : vector<48x32xf32>
    %295 = arith.addf %245, %294 : vector<48x32xf32>
    %296 = vector.shape_cast %295 : vector<48x32xf32> to vector<2x24x32xf32>
    %297 = vector.extract_strided_slice %296 {offsets = [0, 0, 0], sizes = [2, 1, 32], strides = [1, 1, 1]} : vector<2x24x32xf32> to vector<2x1x32xf32>
    %298 = vector.shape_cast %297 : vector<2x1x32xf32> to vector<2x32xf32>
    %c1 = arith.constant 1 : index
    %c0_145 = arith.constant 0 : index
    %299 = vector.load %arg3[%c1, %c0_145] : memref<18x128xf32, #tpu.memory_space<vmem>>, vector<1x32xf32>
    %c2 = arith.constant 2 : index
    %c0_146 = arith.constant 0 : index
    %300 = vector.load %arg3[%c2, %c0_146] : memref<18x128xf32, #tpu.memory_space<vmem>>, vector<1x32xf32>
    %cst_147 = arith.constant dense<0.000000e+00> : vector<2xf32>
    %301 = vector.multi_reduction <add>, %298, %cst_147 [1] : vector<2x32xf32> to vector<2xf32>
    %302 = vector.shape_cast %301 : vector<2xf32> to vector<2x1xf32>
    %cst_148 = arith.constant 3.200000e+01 : f32
    %303 = vector.broadcast %cst_148 : f32 to vector<2x1xf32>
    %304 = arith.divf %302, %303 : vector<2x1xf32>
    %305 = vector.broadcast %304 : vector<2x1xf32> to vector<2x32xf32>
    %306 = arith.subf %298, %305 : vector<2x32xf32>
    %307 = arith.mulf %306, %306 : vector<2x32xf32>
    %cst_149 = arith.constant dense<0.000000e+00> : vector<2xf32>
    %308 = vector.multi_reduction <add>, %307, %cst_149 [1] : vector<2x32xf32> to vector<2xf32>
    %309 = vector.shape_cast %308 : vector<2xf32> to vector<2x1xf32>
    %cst_150 = arith.constant 3.200000e+01 : f32
    %310 = vector.broadcast %cst_150 : f32 to vector<2x1xf32>
    %311 = arith.divf %309, %310 : vector<2x1xf32>
    %312 = vector.broadcast %304 : vector<2x1xf32> to vector<2x32xf32>
    %313 = arith.subf %298, %312 : vector<2x32xf32>
    %cst_151 = arith.constant 9.99999974E-6 : f32
    %314 = vector.broadcast %cst_151 : f32 to vector<2x1xf32>
    %315 = arith.addf %311, %314 : vector<2x1xf32>
    %316 = math.rsqrt %315 : vector<2x1xf32>
    %317 = vector.broadcast %316 : vector<2x1xf32> to vector<2x32xf32>
    %318 = arith.mulf %313, %317 : vector<2x32xf32>
    %319 = vector.broadcast %299 : vector<1x32xf32> to vector<2x32xf32>
    %320 = arith.mulf %318, %319 : vector<2x32xf32>
    %321 = vector.broadcast %300 : vector<1x32xf32> to vector<2x32xf32>
    %322 = arith.addf %320, %321 : vector<2x32xf32>
    %323 = arith.truncf %322 : vector<2x32xf32> to vector<2x32xbf16>
    %c224 = arith.constant 224 : index
    %c0_152 = arith.constant 0 : index
    %324 = vector.load %arg2[%c224, %c0_152] : memref<832x128xbf16, #tpu.memory_space<vmem>>, vector<32x128xbf16>
    %cst_153 = arith.constant dense<0.000000e+00> : vector<2x128xf32>
    %325 = tpu.matmul %323, %324, %cst_153 {dimension_numbers = #tpu.dot_dimension_numbers<[1], [0], [0], [1], [0, 0, 1, 1], [], []>} : vector<2x32xbf16>, vector<32x128xbf16>, vector<2x128xf32> -> vector<2x128xf32>
    %c3 = arith.constant 3 : index
    %c0_154 = arith.constant 0 : index
    %326 = vector.load %arg3[%c3, %c0_154] : memref<18x128xf32, #tpu.memory_space<vmem>>, vector<1x128xf32>
    %327 = vector.broadcast %326 : vector<1x128xf32> to vector<2x128xf32>
    %328 = arith.addf %325, %327 : vector<2x128xf32>
    %c0_155 = arith.constant 0 : index
    %c0_156 = arith.constant 0 : index
    %329 = vector.load %arg4[%c0_155, %c0_156] : memref<2x128xf32, #tpu.memory_space<vmem>>, vector<2x128xf32>
    tpu.vector_store %arg4[%c0_155, %c0_156], %328 {strides = array<i32>} : memref<2x128xf32, #tpu.memory_space<vmem>>, vector<2x128xf32>,
    return
  }
  func.func @transform_0(%arg0: i32) -> (i32, i32, i32) {
    %c0_i32 = arith.constant 0 : i32
    %c0_i32_0 = arith.constant 0 : i32
    %c0_i32_1 = arith.constant 0 : i32
    return %arg0, %c0_i32, %c0_i32_0 : i32, i32, i32
  }
  func.func @transform_1(%arg0: i32) -> (i32, i32) {
    %c0_i32 = arith.constant 0 : i32
    %c0_i32_0 = arith.constant 0 : i32
    %c0_i32_1 = arith.constant 0 : i32
    return %c0_i32, %c0_i32_0 : i32, i32
  }
  func.func @transform_2(%arg0: i32) -> (i32, i32) {
    %c0_i32 = arith.constant 0 : i32
    %c0_i32_0 = arith.constant 0 : i32
    %c0_i32_1 = arith.constant 0 : i32
    return %c0_i32, %c0_i32_0 : i32, i32
  }
  func.func @transform_3(%arg0: i32) -> (i32, i32) {
    %c0_i32 = arith.constant 0 : i32
    %c0_i32_0 = arith.constant 0 : i32
    return %arg0, %c0_i32 : i32, i32
  }
}

</mosaic_0001>

<bundles_post_ra>
// kernel: tpu_custom_call.1
= control target key start
LH: loop header
LB: loop body
LE: loop exit
PB: predicated region body
PF: predicated region fallthrough
CT: control target
= control target key end

     0   :  { %8 = vsyncpa [#allocation7], 0  ;;  %s5241_s0 = inlined_call_operand.hbm [shape: bf16[2,24,128], index: 0, kind: input, shape index: {}]   ;;  %s5242_s1 = inlined_call_operand.hbm [shape: bf16[832,128], index: 1, kind: input, shape index: {}]   ;;  %s5243_s2 = inlined_call_operand.hbm [shape: f32[18,128], index: 2, kind: input, shape index: {}]   ;;  %s5244_s3 = inlined_call_operand.hbm [shape: f32[2,128], index: 3, kind: output, shape index: {}]  }
   0x1   :  { %9 = vsyncpa [#allocation10], 0 }
   0x2   :  { %10 = vsyncpa [#allocation8], 0  ;;  %s4233_s12 = smov [#allocation9]   ;;  %s4234_s14 = smov [#allocation6]  }
   0x3   :  { %s28_s13 = sshll.u32 %s4233_s12, 4  ;;  %s16_s15 = sshll.u32 %s4234_s14, 4  ;;  %s29_s13 = int_to_ptr.vmem [resolvable:$true] %s28_s13  ;;  %s4264_s15 = int_to_ptr.vmem [resolvable:$true] %s16_s15 }
   0x4   :  { %s4139_s18 = scalar_lea.hbm %s5242_s1, 6656 }
   0x5   :  { %p4140_p0 = scmp.ne.s32.totalorder %s5242_s1, %s4139_s18  ;;  %p4143_p1 = scmp.lt.u32.totalorder %s4139_s18, %s5242_s1 }
   0x7   :  { %p4145_p2 = pnand %p4143_p1, %p4140_p0 }
   0x9   :  { %4148 = shalt.err (!%p4145_p2)
}
   0xa   :  { %s4149_s23 = scalar_lea.vmem %s29_s13, 6656  ;;  %p4154_p4 = scmp.lt.s32.totalorder %s29_s13, %s29_s13 }
   0xb   :  { %p4150_p3 = scmp.ne.s32.totalorder %s29_s13, %s4149_s23  ;;  %p4155_p5 = scmp.lt.s32.totalorder %s4149_s23, %s4149_s23 }
   0xd   :  { %p4156_p6 = por %p4155_p5, %p4154_p4 }
   0xf   :  { %p4157_p7 = pnand %p4156_p6, %p4150_p3 }
  0x11   :  { %4160 = shalt.err (!%p4157_p7)
}
  0x12   :  { %s4235_s24 = smov 64   ;;  %s4236_s25 = smov 4  }
  0x13   :  { %34 = dma.hbm_to_vmem [thread:$0]  %s5242_s1, 6656, %s29_s13, [#allocation10], %s4235_s24, %s4235_s24, %s4236_s25  }
  0x14   :  { %s4161_s30 = scalar_lea.hbm %s5241_s0, 384 }
  0x15   :  { %p4162_p8 = scmp.ne.s32.totalorder %s5241_s0, %s4161_s30  ;;  %p4165_p9 = scmp.lt.u32.totalorder %s4161_s30, %s5241_s0 }
  0x17   :  { %p4167_p10 = pnand %p4165_p9, %p4162_p8 }
  0x19   :  { %4170 = shalt.err (!%p4167_p10)
}
  0x1a   :  { %s4171_s8 = scalar_lea.vmem %s4264_s15, 384  ;;  %p4176_p12 = scmp.lt.s32.totalorder %s4264_s15, %s4264_s15 }
  0x1b   :  { %p4172_p11 = scmp.ne.s32.totalorder %s4264_s15, %s4171_s8  ;;  %p4177_p13 = scmp.lt.s32.totalorder %s4171_s8, %s4171_s8 }
  0x1d   :  { %p4178_p0 = por %p4177_p13, %p4176_p12 }
  0x1f   :  { %p4179_p1 = pnand %p4178_p0, %p4172_p11 }
  0x21   :  { %4182 = shalt.err (!%p4179_p1)
}
  0x22   :  { %22 = dma.hbm_to_vmem [thread:$0]  %s5241_s0, 384, %s4264_s15, [#allocation7], %s4235_s24, %s4235_s24, %s4236_s25  }
  0x23   :  { %s4237_s10 = smov [#allocation11]   ;;  %s4183_s14 = scalar_lea.hbm %s5243_s2, 384 }
  0x24   :  { %s40_s11 = sshll.u32 %s4237_s10, 4  ;;  %p4184_p2 = scmp.ne.s32.totalorder %s5243_s2, %s4183_s14  ;;  %s41_s11 = int_to_ptr.vmem [resolvable:$true] %s40_s11 }
  0x25   :  { %p4187_p3 = scmp.lt.u32.totalorder %s4183_s14, %s5243_s2 }
  0x27   :  { %p4189_p4 = pnand %p4187_p3, %p4184_p2 }
  0x29   :  { %4192 = shalt.err (!%p4189_p4)
}
  0x2a   :  { %s4193_s20 = scalar_lea.vmem %s41_s11, 384  ;;  %p4198_p6 = scmp.lt.s32.totalorder %s41_s11, %s41_s11 }
  0x2b   :  { %p4194_p5 = scmp.ne.s32.totalorder %s41_s11, %s4193_s20  ;;  %p4199_p7 = scmp.lt.s32.totalorder %s4193_s20, %s4193_s20 }
  0x2d   :  { %p4200_p8 = por %p4199_p7, %p4198_p6 }
  0x2f   :  { %p4201_p9 = pnand %p4200_p8, %p4194_p5 }
  0x31   :  { %4204 = shalt.err (!%p4201_p9)
}
  0x32   :  { %s4238_s0 = smov 128   ;;  %s4239_s15 = smov 8  }
  0x33   :  { %46 = dma.hbm_to_vmem [thread:$0]  %s5243_s2, 384, %s41_s11, [#allocation10], %s4238_s0, %s4238_s0, %s4239_s15  }
  0x34   :  { %4227 = dma.done.wait [#allocation7], 384  }
  0x35   :  { %4228 = vsyncadd [#allocation7], 4294966912 }
  0x36   :  { %4229 = dma.done.wait [#allocation10], 7040  }
  0x37   :  { %4230 = vsyncadd [#allocation10], 4294960256  ;;  %v4240_v0 = vmov 0.0   ;;  %vm5245_vm0 = vmmov 0   ;;  %v3961_v1 = vld [vmem:[#allocation9] sm:$0xff]   ;;  %v3962_v2 = vld [vmem:[#allocation9 + $0x8] sm:$0xff]  }
  0x38   :  { %3482 = vmatprep.subr.bf16.mxu0 %v4240_v0  ;;  %3498 = vmatprep.mubr.msk.bf16.mxu0 %vm5245_vm0, %v4240_v0  ;;  %v3963_v3 = vld [vmem:[#allocation9 + $0x10] sm:$0xff]   ;;  %v3964_v4 = vld [vmem:[#allocation9 + $0x18] sm:$0xff]   ;;  %v3965_v5 = vld [vmem:[#allocation9 + $0x20] sm:$0xff]   ;;  %vm5251_vm1 = vcmask 261120   ;;  %s4243_s2 = smov [#allocation12]  }
  0x39   :  { %3510 = vmatprep.subr.bf16.mxu1 %v4240_v0  ;;  %3514 = vmatprep.mubr.msk.bf16.mxu1 %vm5245_vm0, %v4240_v0  ;;  %v3966_v6 = vld [vmem:[#allocation9 + $0x28] sm:$0xff]   ;;  %v3967_v7 = vld [vmem:[#allocation9 + $0x30] sm:$0xff]   ;;  %v3968_v8 = vld [vmem:[#allocation9 + $0x38] sm:$0xff]   ;;  %s3090_s23 = sshll.u32 %s4243_s2, 4  ;;  %s3091_s23 = int_to_ptr.vmem [resolvable:$true] %s3090_s23 }
  0x3a   :  { %3483 = vmatpush3.bf16.msra.mxu0 %v3961_v1  ;;  %v3969_v9 = vld [vmem:[#allocation6] sm:$0xff]   ;;  %v3970_v10 = vld [vmem:[#allocation6 + $0x8] sm:$0xff]   ;;  %v3971_v11 = vld [vmem:[#allocation6 + $0x10] sm:$0xff]   ;;  %s4205_s24 = scalar_lea.vmem %s3091_s23, 32  ;;  %p4210_p11 = scmp.lt.s32.totalorder %s3091_s23, %s3091_s23 }
  0x3b   :  { %3484 = vmatprep.subr.bf16.mxu0 %v4240_v0  ;;  %v3972_v60 = vld [vmem:[#allocation9 + $0x80] sm:$0xff]   ;;  %v3974_v62 = vld [vmem:[#allocation9 + $0x88] sm:$0xff]   ;;  %p4206_p10 = scmp.ne.s32.totalorder %s3091_s23, %s4205_s24  ;;  %p4211_p12 = scmp.lt.s32.totalorder %s4205_s24, %s4205_s24 }
  0x3c   :  { %v3973_v61 = vld [vmem:[#allocation9 + $0xa0] sm:$0xff]   ;;  %3511 = vmatpush3.bf16.msra.mxu1 %v3972_v60  ;;  %v3975_v63 = vld [vmem:[#allocation9 + $0xa8] sm:$0xff]   ;;  %v64_v60 = vld [vmem:[#allocation9 + $0x54] sm:$0xf] }
  0x3d   :  { %3512 = vmatprep.subr.bf16.mxu1 %v4240_v0  ;;  %vm76_vm7 = vcmp.ne.bf16.partialorder %v64_v60, 0  ;;  %p4212_p13 = por %p4211_p12, %p4210_p11 }
  0x3e   :  { %3485 = vmatpush3.bf16.msra.mxu0 %v3962_v2 }
  0x3f   :  { %3486 = vmatprep.subr.bf16.mxu0 %v4240_v0  ;;  %p4213_p0 = pnand %p4212_p13, %p4206_p10 }
  0x40   :  { %3513 = vmatpush3.bf16.msra.mxu1 %v3974_v62  ;;  %v4419_v62 = vld [vmem:[#allocation9 + $0x58] sm:$0xf] }
  0x41   :  { %3526 = vmatprep.subr.bf16.mxu1 %v4240_v0  ;;  %vm77_vm10 = vcmp.ne.bf16.partialorder %v4419_v62, 0 }
  0x42   :  { %3487 = vmatpush3.bf16.msra.mxu0 %v3963_v3 }
  0x43   :  { %3488 = vmatprep.subr.bf16.mxu0 %v4240_v0 }
  0x46   :  { %3489 = vmatpush3.bf16.msra.mxu0 %v3964_v4 }
  0x47   :  { %3490 = vmatprep.subr.bf16.mxu0 %v4240_v0 }
  0x4a   :  { %3491 = vmatpush3.bf16.msra.mxu0 %v3965_v5 }
  0x4b   :  { %3492 = vmatprep.subr.bf16.mxu0 %v4240_v0 }
  0x4e   :  { %3493 = vmatpush3.bf16.msra.mxu0 %v3966_v6 }
  0x4f   :  { %3494 = vmatprep.subr.bf16.mxu0 %v4240_v0 }
  0x52   :  { %3495 = vmatpush3.bf16.msra.mxu0 %v3967_v7 }
  0x53   :  { %3496 = vmatprep.subr.bf16.mxu0 %v4240_v0 }
  0x56   :  { %3497 = vmatpush3.bf16.msra.mxu0 %v3968_v8 }
  0x57   :  { %3542 = vmatprep.subr.bf16.mxu0 %v4240_v0 }
  0x59   :  { %3499 = vmatmul.mubr.bf16.vlgmr.msra.gmra.mrb[0].mxu0 %v3969_v9 }
  0x5a   :  { %3502 = vmatprep.mubr.msk.bf16.mxu0 %vm5245_vm0, %v4240_v0  ;;  %3543 = vmatpush3.bf16.msra.mxu0 %v3973_v61 }
  0x5b   :  { %3544 = vmatprep.subr.bf16.mxu0 %v4240_v0 }
  0x5e   :  { %3545 = vmatpush3.bf16.msra.mxu0 %v3975_v63  ;;  %v4421_v63 = vld [vmem:[#allocation9 + $0x5c] sm:$0xf] }
  0x5f   :  { %vm78_vm12 = vcmp.ne.bf16.partialorder %v4421_v63, 0 }
  0x61   :  { %3503 = vmatmul.mubr.bf16.gmra.mrb[4].mxu0 %v3970_v10 }
  0x62   :  { %3506 = vmatprep.mubr.msk.bf16.mxu0 %vm5245_vm0, %v4240_v0 }
  0x69   :  { %3507 = vmatmul.mubr.bf16.gmra.mrb[8].mxu0 %v3971_v11 }
  0x6a   :  { %3546 = vmatprep.mubr.msk.bf16.mxu0 %vm5245_vm0, %v4240_v0 }
 0x12c   :  { %v4327_v12 = vpop.f32.mrb[0].mxu0 }
 0x12d   :  { %v3500_v13 = vpop.f32.mrb[1].mxu0  ;;  %v232_v14 = vsel %vm5251_vm1, %v4327_v12, 0.0 }
 0x12e   :  { %233 = vadd.xlane.f32.xlu0 %v232_v14  ;;  %v4331_v15 = vpop.f32.mrb[2].mxu0 }
 0x12f   :  { %v3501_v16 = vpop.f32.mrb[3].mxu0  ;;  %v235_v17 = vsel %vm5251_vm1, %v4331_v15, 0.0 }
 0x132   :  { %236 = vadd.xlane.f32.xlu0 %v235_v17 }
 0x134   :  { %v4335_v18 = vpop.f32.mrb[4].mxu0 }
 0x135   :  { %v3504_v19 = vpop.f32.mrb[5].mxu0  ;;  %v238_v20 = vsel %vm5251_vm1, %v4335_v18, 0.0 }
 0x136   :  { %239 = vadd.xlane.f32.xlu1 %v238_v20  ;;  %v4339_v21 = vpop.f32.mrb[6].mxu0  ;;  %v3111_v20 = vld [vmem:[#allocation11 + $0x4] ss:$0 sm:$0xff] }
 0x137   :  { %v3505_v22 = vpop.f32.mrb[7].mxu0  ;;  %v241_v23 = vsel %vm5251_vm1, %v4339_v21, 0.0 }
 0x13a   :  { %242 = vadd.xlane.f32.xlu1 %v241_v23 }
 0x13c   :  { %v4343_v24 = vpop.f32.mrb[8].mxu0 }
 0x13d   :  { %v3508_v25 = vpop.f32.mrb[9].mxu0  ;;  %v244_v26 = vsel %vm5251_vm1, %v4343_v24, 0.0 }
 0x13e   :  { %245 = vadd.xlane.f32.xlu0 %v244_v26  ;;  %v4347_v27 = vpop.f32.mrb[10].mxu0 }
 0x13f   :  { %v3509_v28 = vpop.f32.mrb[11].mxu0  ;;  %v247_v29 = vsel %vm5251_vm1, %v4347_v27, 0.0 }
 0x140   :  { %248 = vadd.xlane.f32.xlu1 %v247_v29 }
 0x1bb   :  { %v234_v30 = vpop.xlane.xlu0 %233 }
 0x1bc   :  { %v251_v31 = vmul.f32 0.03125, %v234_v30 }
 0x1be   :  { %v257_v32 = vsub.f32 %v4327_v12, %v251_v31  ;;  %v3112_v31 = vld [vmem:[#allocation11 + $0x5] ss:$0 sm:$0xff] }
 0x1bf   :  { %v237_v33 = vpop.xlane.xlu0 %236 }
 0x1c0   :  { %v252_v34 = vmul.f32 0.03125, %v237_v33  ;;  %v263_v35 = vmul.f32 %v257_v32, %v257_v32 }
 0x1c2   :  { %v4353_v36 = vsub.f32 %v4331_v15, %v252_v34  ;;  %v269_v37 = vsel %vm5251_vm1, %v263_v35, 0.0 }
 0x1c3   :  { %v240_v38 = vpop.xlane.xlu1 %239  ;;  %270 = vadd.xlane.f32.xlu0 %v269_v37 }
 0x1c4   :  { %v253_v39 = vmul.f32 0.03125, %v240_v38  ;;  %v264_v40 = vmul.f32 %v4353_v36, %v4353_v36  ;;  %v3976_v38 = vld [vmem:[#allocation9 + $0x90] sm:$0xff]  }
 0x1c6   :  { %v4359_v41 = vsub.f32 %v4335_v18, %v253_v39  ;;  %v272_v42 = vsel %vm5251_vm1, %v264_v40, 0.0 }
 0x1c7   :  { %v243_v43 = vpop.xlane.xlu1 %242  ;;  %273 = vadd.xlane.f32.xlu1 %v272_v42 }
 0x1c8   :  { %v254_v44 = vmul.f32 0.03125, %v243_v43  ;;  %v265_v45 = vmul.f32 %v4359_v41, %v4359_v41  ;;  %v3977_v43 = vld [vmem:[#allocation9 + $0x98] sm:$0xff]  }
 0x1ca   :  { %v4365_v46 = vsub.f32 %v4339_v21, %v254_v44  ;;  %v275_v47 = vsel %vm5251_vm1, %v265_v45, 0.0 }
 0x1cb   :  { %276 = vadd.xlane.f32.xlu0 %v275_v47  ;;  %v246_v48 = vpop.xlane.xlu0 %245 }
 0x1cc   :  { %v255_v49 = vmul.f32 0.03125, %v246_v48  ;;  %v266_v50 = vmul.f32 %v4365_v46, %v4365_v46 }
 0x1cd   :  { %v249_v51 = vpop.xlane.xlu1 %248 }
 0x1ce   :  { %v4371_v52 = vsub.f32 %v4343_v24, %v255_v49  ;;  %v256_v53 = vmul.f32 0.03125, %v249_v51  ;;  %v278_v54 = vsel %vm5251_vm1, %v266_v50, 0.0 }
 0x1cf   :  { %279 = vadd.xlane.f32.xlu1 %v278_v54 }
 0x1d0   :  { %v4375_v55 = vsub.f32 %v4347_v27, %v256_v53  ;;  %v267_v56 = vmul.f32 %v4371_v52, %v4371_v52 }
 0x1d2   :  { %v281_v57 = vsel %vm5251_vm1, %v267_v56, 0.0  ;;  %v268_v58 = vmul.f32 %v4375_v55, %v4375_v55 }
 0x1d3   :  { %282 = vadd.xlane.f32.xlu0 %v281_v57  ;;  %v62_v57 = vld [vmem:[#allocation9 + $0x4c] sm:$0xf] }
 0x1d4   :  { %v284_v59 = vsel %vm5251_vm1, %v268_v58, 0.0  ;;  %vm74_vm5 = vcmp.ne.bf16.partialorder %v62_v57, 0 }
 0x1d5   :  { %285 = vadd.xlane.f32.xlu1 %v284_v59  ;;  %v63_v59 = vld [vmem:[#allocation9 + $0x50] sm:$0xf] }
 0x1d6   :  { %v4417_v61 = vcombine.low %v63_v59, %v64_v60  ;;  %vm75_vm6 = vcmp.ne.bf16.partialorder %v63_v59, 0 }
 0x250   :  { %v271_v1 = vpop.xlane.xlu0 %270 }
 0x251   :  { %v287_v2 = vmul.f32 0.03125, %v271_v1  ;;  %v4425_v1 = vcombine.low %v4419_v62, %v4421_v63  ;;  %v5291_v62 = vmov 0 }
 0x253   :  { %v293_v3 = vadd.f32 1e-05, %v287_v2  ;;  %v4427_v2 = vld [vmem:[#allocation9 + $0x60] sm:$0xf] }
 0x254   :  { %v274_v4 = vpop.xlane.xlu1 %273  ;;  %vm79_vm15 = vcmp.ne.bf16.partialorder %v4427_v2, 0 }
 0x255   :  { %4016 = vrsqrt.f32 %v293_v3  ;;  %v288_v5 = vmul.f32 0.03125, %v274_v4  ;;  %v4429_v3 = vld [vmem:[#allocation9 + $0x64] sm:$0xf] }
 0x256   :  { %v4433_v4 = vcombine.low %v4427_v2, %v4429_v3  ;;  %v5293_v2 = vmov 0 }
 0x257   :  { %v294_v6 = vadd.f32 1e-05, %v288_v5  ;;  %v4435_v5 = vld [vmem:[#allocation9 + $0x68] sm:$0xf] }
 0x258   :  { %v277_v7 = vpop.xlane.xlu0 %276 }
 0x259   :  { %4018 = vrsqrt.f32 %v294_v6  ;;  %v289_v8 = vmul.f32 0.03125, %v277_v7  ;;  %v4437_v6 = vld [vmem:[#allocation9 + $0x6c] sm:$0xf] }
 0x25a   :  { %v4441_v7 = vcombine.low %v4435_v5, %v4437_v6 }
 0x25b   :  { %v295_v9 = vadd.f32 1e-05, %v289_v8  ;;  %v4443_v8 = vld [vmem:[#allocation9 + $0x40] sm:$0xf] }
 0x25c   :  { %v280_v10 = vpop.xlane.xlu1 %279  ;;  %vm71_vm2 = vcmp.ne.bf16.partialorder %v4443_v8, 0 }
 0x25d   :  { %4020 = vrsqrt.f32 %v295_v9  ;;  %v290_v11 = vmul.f32 0.03125, %v280_v10  ;;  %v4445_v9 = vld [vmem:[#allocation9 + $0x44] sm:$0xf]  ;;  %v4242_v10 = vmov 0  }
 0x25e   :  { %vm72_vm3 = vcmp.ne.bf16.partialorder %v4445_v9, 0 }
 0x25f   :  { %v4017_v13 = vpop.eup %4016  ;;  %v296_v14 = vadd.f32 1e-05, %v290_v11  ;;  %v589_v11 = vsel %vm71_vm2, 65537, %v4242_v10  ;;  %vm80_vm2 = vcmp.ne.bf16.partialorder %v4429_v3, 0  ;;  %v597_v3 = vsel %vm79_vm15, 65537, %v4242_v10 }
 0x260   :  { %v305_v16 = vmul.f32 %v4017_v13, %v257_v32  ;;  %v283_v17 = vpop.xlane.xlu0 %282  ;;  %v590_v13 = vsel %vm72_vm3, 65537, %v4242_v10 }
 0x261   :  { %4022 = vrsqrt.f32 %v296_v14  ;;  %v291_v19 = vmul.f32 0.03125, %v283_v17 }
 0x262   :  { %v286_v22 = vpop.xlane.xlu1 %285  ;;  %v315_v29 = vmul.f32 %v3111_v20, %v305_v16 }
 0x263   :  { %v4019_v23 = vpop.eup %4018  ;;  %v297_v25 = vadd.f32 1e-05, %v291_v19  ;;  %v292_v26 = vmul.f32 0.03125, %v286_v22 }
 0x264   :  { %v306_v28 = vmul.f32 %v4019_v23, %v4353_v36  ;;  %v325_v32 = vadd.f32 %v3112_v31, %v315_v29  ;;  %v601_v23 = vunpack.c.l.b16 %v589_v11 }
 0x265   :  { %4024 = vrsqrt.f32 %v297_v25  ;;  %v298_v30 = vadd.f32 1e-05, %v292_v26  ;;  %v602_v25 = vunpack.c.l.b16 %v590_v13 }
 0x266   :  { %v316_v33 = vmul.f32 %v3111_v20, %v306_v28  ;;  %vm4455_vm8 = vcmp.ne.s32.totalorder %v601_v23, 0 }
 0x267   :  { %v4021_v34 = vpop.eup %4020  ;;  %4026 = vrsqrt.f32 %v298_v30  ;;  %vm4459_vm9 = vcmp.ne.s32.totalorder %v602_v25, 0  ;;  %v5295_v25 = vmov 0 }
 0x268   :  { %v307_v35 = vmul.f32 %v4021_v34, %v4359_v41  ;;  %v326_v37 = vadd.f32 %v3112_v31, %v316_v33  ;;  %v592_v33 = vsel %vm74_vm5, 65537, %v4242_v10  ;;  %v593_v34 = vsel %vm75_vm6, 65537, %v4242_v10  ;;  %vm4474_vm11 = vmpackc.low %vm4459_vm9, %vm4455_vm8 }
 0x269   :  { %vm81_vm6 = vcmp.ne.bf16.partialorder %v4435_v5, 0 }
 0x26a   :  { %v331_v39 = vpack.c.bf16 %v326_v37, %v325_v32  ;;  %v317_v36 = vmul.f32 %v3111_v20, %v307_v35  ;;  %v594_v37 = vsel %vm76_vm7, 65537, %v4242_v10  ;;  %vm82_vm7 = vcmp.ne.bf16.partialorder %v4437_v6, 0 }
 0x26b   :  { %v4023_v40 = vpop.eup %4022 }
 0x26c   :  { %v308_v42 = vmul.f32 %v4023_v40, %v4365_v46  ;;  %3515 = vmatmul.mubr.msk.bf16.vlgmr.msra.gmra.mrb[0].mxu1 %vm5251_vm1, %v331_v39  ;;  %3547 = vmatmul.mubr.msk.bf16.vlgmr.msra.gmra.mrb[12].mxu0 %vm5251_vm1, %v331_v39  ;;  %v327_v46 = vadd.f32 %v3112_v31, %v317_v36 }
 0x26d   :  { %3527 = vmatpush3.bf16.msra.mxu1 %v3976_v38  ;;  %3518 = vmatprep.mubr.msk.bf16.mxu1 %vm5245_vm0, %v4240_v0 }
 0x26e   :  { %3550 = vmatprep.mubr.msk.bf16.mxu0 %vm5245_vm0, %v4240_v0  ;;  %v318_v41 = vmul.f32 %v3111_v20, %v308_v42  ;;  %3528 = vmatprep.subr.bf16.mxu1 %v4240_v0  ;;  %v5283_v42 = vmov 0 }
 0x26f   :  { %v4025_v44 = vpop.eup %4024  ;;  %v5284_v42 = vsel %vm4474_vm11, 4294967295, %v5283_v42 }
 0x270   :  { %v309_v45 = vmul.f32 %v4025_v44, %v4371_v52  ;;  %v328_v47 = vadd.f32 %v3112_v31, %v318_v41 }
 0x271   :  { %v4027_v48 = vpop.eup %4026  ;;  %3529 = vmatpush3.bf16.msra.mxu1 %v3977_v43  ;;  %v604_v43 = vunpack.c.l.b16 %v592_v33 }
 0x272   :  { %v310_v49 = vmul.f32 %v4027_v48, %v4375_v55  ;;  %v332_v50 = vpack.c.bf16 %v328_v47, %v327_v46  ;;  %v319_v51 = vmul.f32 %v3111_v20, %v309_v45  ;;  %v61_v55 = vld [vmem:[#allocation9 + $0x48] sm:$0xf]  ;;  %v605_v48 = vunpack.c.l.b16 %v593_v34 }
 0x273   :  { %v4415_v58 = vcombine.low %v61_v55, %v62_v57  ;;  %vm73_vm4 = vcmp.ne.bf16.partialorder %v61_v55, 0  ;;  %v5285_v55 = vmov 0  ;;  %vm4492_vm14 = vcmp.ne.s32.totalorder %v604_v43, 0 }
 0x274   :  { %3519 = vmatmul.mubr.msk.bf16.gmra.mrb[4].mxu1 %vm5251_vm1, %v332_v50  ;;  %3551 = vmatmul.mubr.msk.bf16.gmra.mrb[16].mxu0 %vm5251_vm1, %v332_v50  ;;  %v320_v53 = vmul.f32 %v3111_v20, %v310_v49  ;;  %v329_v54 = vadd.f32 %v3112_v31, %v319_v51  ;;  %v5287_v57 = vmov 0  ;;  %vm4500_vm3 = vcmp.ne.s32.totalorder %v605_v48, 0 }
 0x275   :  { %3522 = vmatprep.mubr.msk.bf16.mxu1 %vm5245_vm0, %v4240_v0  ;;  %3554 = vmatprep.mubr.msk.bf16.mxu0 %vm5245_vm0, %v4240_v0  ;;  %v5288_v57 = vsel %vm4492_vm14, 4294967295, %v5287_v57  ;;  %v5313_v48 = vmov 0 }
 0x276   :  { %v330_v52 = vadd.f32 %v3112_v31, %v320_v53  ;;  %v591_v31 = vsel %vm73_vm4, 65537, %v4242_v10 }
 0x277   :  { %v603_v36 = vunpack.c.l.b16 %v591_v31 }
 0x278   :  { %v333_v56 = vpack.c.bf16 %v330_v52, %v329_v54  ;;  %v606_v52 = vunpack.c.l.b16 %v594_v37  ;;  %v595_v54 = vsel %vm77_vm10, 65537, %v4242_v10  ;;  %v599_v37 = vsel %vm81_vm6, 65537, %v4242_v10 }
 0x279   :  { %vm4488_vm13 = vcmp.ne.s32.totalorder %v603_v36, 0  ;;  %v607_v59 = vunpack.c.l.b16 %v595_v54  ;;  %v611_v6 = vunpack.c.l.b16 %v599_v37 }
 0x27a   :  { %v5286_v55 = vsel %vm4488_vm13, 4294967295, %v5285_v55  ;;  %vm4504_vm4 = vcmp.ne.s32.totalorder %v606_v52, 0  ;;  %vm4512_vm5 = vmpackc.low %vm4492_vm14, %vm4488_vm13 }
 0x27b   :  { %v5292_v62 = vsel %vm4504_vm4, 4294967295, %v5291_v62  ;;  %v5294_v2 = vsel %vm4512_vm5, 4294967295, %v5293_v2  ;;  %vm4526_vm10 = vmpackc.low %vm4504_vm4, %vm4500_vm3 }
 0x27c   :  { %3523 = vmatmul.mubr.msk.bf16.gmra.mrb[8].mxu1 %vm5251_vm1, %v333_v56  ;;  %3555 = vmatmul.mubr.msk.bf16.gmra.mrb[20].mxu0 %vm5251_vm1, %v333_v56  ;;  %v5296_v25 = vsel %vm4526_vm10, 4294967295, %v5295_v25 }
 0x27d   :  { %3530 = vmatprep.mubr.msk.bf16.mxu1 %vm5245_vm0, %v4240_v0 }
 0x284   :  { %3531 = vmatmul.mubr.msk.bf16.vlgmr.msra.gmra.mrb[12].mxu1 %vm5251_vm1, %v331_v39 }
 0x285   :  { %3534 = vmatprep.mubr.msk.bf16.mxu1 %vm5245_vm0, %v4240_v0 }
 0x28c   :  { %3535 = vmatmul.mubr.msk.bf16.gmra.mrb[16].mxu1 %vm5251_vm1, %v332_v50 }
 0x28d   :  { %3538 = vmatprep.mubr.msk.bf16.mxu1 %vm5245_vm0, %v4240_v0 }
 0x294   :  { %3539 = vmatmul.mubr.msk.bf16.gmra.mrb[20].mxu1 %vm5251_vm1, %v333_v56  ;;  %v596_v56 = vsel %vm78_vm12, 65537, %v4242_v10  ;;  %vm4530_vm12 = vcmp.ne.s32.totalorder %v607_v59, 0 }
 0x295   :  { %v608_v63 = vunpack.c.l.b16 %v596_v56 }
 0x297   :  { %vm4538_vm15 = vcmp.ne.s32.totalorder %v608_v63, 0 }
 0x33f   :  { %v393_v14 = vpop.f32.mrb[0].mxu1  ;;  %v551_v16 = vpop.f32.mrb[12].mxu0 }
 0x340   :  { %416 = vst.msk [vmem:[#allocation2] sm:$0xff] %vm5251_vm1, %v393_v14  ;;  %574 = vst.msk [vmem:[#allocation4] sm:$0xff] %vm5251_vm1, %v551_v16  ;;  %v3516_v17 = vpop.f32.mrb[1].mxu1  ;;  %v3548_v19 = vpop.f32.mrb[13].mxu0  ;;  %v598_v16 = vsel %vm80_vm2, 65537, %v4242_v10 }
 0x341   :  { %v396_v20 = vpop.f32.mrb[2].mxu1  ;;  %v554_v22 = vpop.f32.mrb[14].mxu0  ;;  %vm4556_vm2 = vmpackc.low %vm4538_vm15, %vm4530_vm12 }
 0x342   :  { %417 = vst.msk [vmem:[#allocation2 + $0x8] sm:$0xff] %vm5251_vm1, %v396_v20  ;;  %575 = vst.msk [vmem:[#allocation4 + $0x8] sm:$0xff] %vm5251_vm1, %v554_v22  ;;  %v3517_v26 = vpop.f32.mrb[3].mxu1  ;;  %v3549_v28 = vpop.f32.mrb[15].mxu0 }
 0x347   :  { %v401_v35 = vpop.f32.mrb[4].mxu1  ;;  %v559_v32 = vpop.f32.mrb[16].mxu0  ;;  %v580_v40 = vld [vmem:[#allocation2] sm:$0xff] }
 0x348   :  { %418 = vst.msk [vmem:[#allocation2 + $0x10] sm:$0xff] %vm5251_vm1, %v401_v35  ;;  %576 = vst.msk [vmem:[#allocation4 + $0x10] sm:$0xff] %vm5251_vm1, %v559_v32  ;;  %v3520_v38 = vpop.f32.mrb[5].mxu1  ;;  %v3552_v39 = vpop.f32.mrb[17].mxu0  ;;  %v586_v46 = vld [vmem:[#allocation4] sm:$0xff]  ;;  %v609_v35 = vunpack.c.l.b16 %v597_v3  ;;  %v610_v32 = vunpack.c.l.b16 %v598_v16 }
 0x349   :  { %v404_v41 = vpop.f32.mrb[6].mxu1  ;;  %v562_v44 = vpop.f32.mrb[18].mxu0  ;;  %v581_v45 = vld [vmem:[#allocation2 + $0x8] sm:$0xff]  ;;  %v600_v38 = vsel %vm82_vm7, 65537, %v4242_v10  ;;  %v5301_v39 = vmov 0 }
 0x34a   :  { %v587_v47 = vld [vmem:[#allocation4 + $0x8] sm:$0xff]  ;;  %419 = vst.msk [vmem:[#allocation2 + $0x18] sm:$0xff] %vm5251_vm1, %v404_v41  ;;  %577 = vst.msk [vmem:[#allocation4 + $0x18] sm:$0xff] %vm5251_vm1, %v562_v44  ;;  %v3521_v49 = vpop.f32.mrb[7].mxu1  ;;  %v3553_v50 = vpop.f32.mrb[19].mxu0  ;;  %v649_v51 = vpack.c.bf16 %v581_v45, %v580_v40  ;;  %v5302_v39 = vsel %vm4556_vm2, 4294967295, %v5301_v39  ;;  %v612_v10 = vunpack.c.l.b16 %v600_v38 }
 0x34b   :  { %v3132_v53 = vpack.c.bf16 %v587_v47, %v586_v46  ;;  %vm4560_vm0 = vcmp.ne.s32.totalorder %v609_v35, 0  ;;  %vm4564_vm6 = vcmp.ne.s32.totalorder %v610_v32, 0  ;;  %v5307_v44 = vmov 0 }
 0x34c   :  { %3570 = vmatprep.mubr.msk.bf16.mxu1 %vm5251_vm1, %v649_v51  ;;  %vm4577_vm7 = vmpackc.low %vm4564_vm6, %vm4560_vm0  ;;  %v4606_v51 = vcombine.low %v4443_v8, %v4445_v9 }
 0x34d   :  { %3574 = vmatprep.subr.msk.bf16.mxu0 %vm4474_vm11, %v3132_v53  ;;  %v5308_v44 = vsel %vm4577_vm7, 4294967295, %v5307_v44 }
 0x34e   :  { %3575 = vmatpush3.bf16.msk.msra.mxu0 %vm4474_vm11, %v3132_v53 }
 0x34f   :  { %v409_v11 = vpop.f32.mrb[8].mxu1  ;;  %v567_v13 = vpop.f32.mrb[20].mxu0  ;;  %v588_v14 = vld [vmem:[#allocation4 + $0x10] sm:$0xff] }
 0x350   :  { %420 = vst.msk [vmem:[#allocation2 + $0x20] sm:$0xff] %vm5251_vm1, %v409_v11  ;;  %578 = vst.msk [vmem:[#allocation4 + $0x20] sm:$0xff] %vm5251_vm1, %v567_v13  ;;  %v3524_v17 = vpop.f32.mrb[9].mxu1  ;;  %v3556_v19 = vpop.f32.mrb[21].mxu0  ;;  %v3135_v20 = vpack.c.bf16 %v586_v46, %v588_v14  ;;  %v3138_v33 = vpack.c.bf16 %v588_v14, %v587_v47  ;;  %v5309_v46 = vmov 0  ;;  %v5311_v47 = vmov 0 }
 0x351   :  { %v412_v22 = vpop.f32.mrb[10].mxu1  ;;  %v570_v23 = vpop.f32.mrb[22].mxu0 }
 0x352   :  { %421 = vst.msk [vmem:[#allocation2 + $0x28] sm:$0xff] %vm5251_vm1, %v412_v22  ;;  %579 = vst.msk [vmem:[#allocation4 + $0x28] sm:$0xff] %vm5251_vm1, %v570_v23  ;;  %v3525_v28 = vpop.f32.mrb[11].mxu1  ;;  %v3557_v31 = vpop.f32.mrb[23].mxu0  ;;  %3576 = vmatprep.subr.msk.bf16.mxu0 %vm4512_vm5, %v3135_v20 }
 0x353   :  { %3577 = vmatpush3.bf16.msk.msra.mxu0 %vm4512_vm5, %v3135_v20  ;;  %vm4582_vm5 = vcmp.ne.s32.totalorder %v611_v6, 0 }
 0x354   :  { %3578 = vmatprep.subr.msk.bf16.mxu0 %vm4526_vm10, %v3138_v33  ;;  %v5310_v46 = vsel %vm4582_vm5, 4294967295, %v5309_v46 }
 0x357   :  { %v472_v36 = vpop.f32.mrb[12].mxu1  ;;  %3579 = vmatpush3.bf16.msk.msra.mxu0 %vm4526_vm10, %v3138_v33  ;;  %vm4586_vm10 = vcmp.ne.s32.totalorder %v612_v10, 0 }
 0x358   :  { %495 = vst.msk [vmem:[#allocation3] sm:$0xff] %vm5251_vm1, %v472_v36  ;;  %v3532_v43 = vpop.f32.mrb[13].mxu1  ;;  %3580 = vmatprep.subr.msk.bf16.mxu0 %vm4556_vm2, %v3132_v53  ;;  %v5312_v47 = vsel %vm4586_vm10, 4294967295, %v5311_v47 }
 0x359   :  { %v475_v41 = vpop.f32.mrb[14].mxu1 }
 0x35a   :  { %496 = vst.msk [vmem:[#allocation3 + $0x8] sm:$0xff] %vm5251_vm1, %v475_v41  ;;  %v3533_v45 = vpop.f32.mrb[15].mxu1  ;;  %vm4598_vm1 = vmpackc.low %vm4586_vm10, %vm4582_vm5 }
 0x35b   :  { %3581 = vmatpush3.bf16.msk.msra.mxu0 %vm4556_vm2, %v3132_v53  ;;  %v5314_v48 = vsel %vm4598_vm1, 4294967295, %v5313_v48  ;;  %vm5315_vm2 = vcmask 261120  }
 0x35c   :  { %3582 = vmatprep.subr.msk.bf16.mxu0 %vm4577_vm7, %v3135_v20  ;;  %vm5316_vm11 = vmmov %vm5315_vm2 }
 0x35f   :  { %v480_v49 = vpop.f32.mrb[16].mxu1  ;;  %3583 = vmatpush3.bf16.msk.msra.mxu0 %vm4577_vm7, %v3135_v20  ;;  %v583_v50 = vld [vmem:[#allocation3] sm:$0xff]  ;;  %vm5317_vm7 = vmmov %vm5315_vm2 }
 0x360   :  { %497 = vst.msk [vmem:[#allocation3 + $0x10] sm:$0xff] %vm5315_vm2, %v480_v49  ;;  %v3536_v53 = vpop.f32.mrb[17].mxu1  ;;  %3584 = vmatprep.subr.msk.bf16.mxu0 %vm4598_vm1, %v3138_v33  ;;  %v625_v59 = vsel %vm4455_vm8, %v583_v50, 0.0  ;;  %v628_v16 = vsel %vm4492_vm14, %v583_v50, 0.0  ;;  %v631_v35 = vsel %vm4530_vm12, %v583_v50, 0.0  ;;  %v634_v6 = vsel %vm4564_vm6, %v583_v50, 0.0 }
 0x361   :  { %v483_v52 = vpop.f32.mrb[18].mxu1  ;;  %v584_v54 = vld [vmem:[#allocation3 + $0x8] sm:$0xff] }
 0x362   :  { %498 = vst.msk [vmem:[#allocation3 + $0x18] sm:$0xff] %vm5316_vm11, %v483_v52  ;;  %v3537_v56 = vpop.f32.mrb[19].mxu1  ;;  %v626_v63 = vsel %vm4459_vm9, %v584_v54, 0.0  ;;  %vm5318_vm11 = vmmov %vm5315_vm2  ;;  %v629_v23 = vsel %vm4500_vm3, %v584_v54, 0.0  ;;  %v635_v41 = vsel %vm4582_vm5, %v584_v54, 0.0 }
 0x363   :  { %3585 = vmatpush3.bf16.msk.msra.mxu0 %vm4598_vm1, %v3138_v33  ;;  %v651_v8 = vpack.c.bf16 %v626_v63, %v625_v59  ;;  %vm5319_vm1 = vmmov %vm5315_vm2  ;;  %v632_v33 = vsel %vm4538_vm15, %v584_v54, 0.0 }
 0x364   :  { %3590 = vmatprep.subr.bf16.mxu0 %v4606_v51  ;;  %v654_v37 = vpack.c.bf16 %v632_v33, %v631_v35 }
 0x365   :  { %3926 = vmatprep.subr.msk.bf16.mxu1 %vm5315_vm2, %v651_v8  ;;  %v668_v9 = vsel %vm5317_vm7, %v651_v8, 0  ;;  %vm5320_vm7 = vmmov %vm5319_vm1  ;;  %v582_v8 = vld [vmem:[#allocation2 + $0x10] sm:$0xff] }
 0x366   :  { %3559 = vmatpush3.bf16.xpose.msra.mxu1 %v668_v9  ;;  %vm5321_vm2 = vmmov %vm5319_vm1  ;;  %v908_v9 = vld [vmem:[#allocation2 + $0x20] sm:$0xff] }
 0x367   :  { %v488_v11 = vpop.f32.mrb[20].mxu1  ;;  %v585_v13 = vld [vmem:[#allocation3 + $0x10] sm:$0xff] }
 0x368   :  { %499 = vst.msk [vmem:[#allocation3 + $0x20] sm:$0xff] %vm5318_vm11, %v488_v11  ;;  %v3540_v14 = vpop.f32.mrb[21].mxu1  ;;  %v627_v3 = vsel %vm4488_vm13, %v585_v13, 0.0  ;;  %v630_v22 = vsel %vm4504_vm4, %v585_v13, 0.0  ;;  %vm5322_vm11 = vmmov %vm5319_vm1  ;;  %v633_v38 = vsel %vm4560_vm0, %v585_v13, 0.0  ;;  %v636_v43 = vsel %vm4586_vm10, %v585_v13, 0.0 }
 0x369   :  { %v491_v17 = vpop.f32.mrb[22].mxu1  ;;  %v652_v19 = vpack.c.bf16 %v628_v16, %v627_v3  ;;  %v653_v31 = vpack.c.bf16 %v630_v22, %v629_v23  ;;  %v655_v36 = vpack.c.bf16 %v634_v6, %v633_v38  ;;  %v656_v49 = vpack.c.bf16 %v636_v43, %v635_v41  ;;  %v910_v50 = vld [vmem:[#allocation3 + $0x18] sm:$0xff]  ;;  %v907_v14 = vld [vmem:[#allocation2 + $0x18] sm:$0xff] }
 0x36a   :  { %500 = vst.msk [vmem:[#allocation3 + $0x28] sm:$0xff] %vm5319_vm1, %v491_v17  ;;  %v3541_v20 = vpop.f32.mrb[23].mxu1  ;;  %v916_v56 = vsel %vm4455_vm8, %v910_v50, 0.0  ;;  %v650_v13 = vpack.c.bf16 %v582_v8, %v582_v8  ;;  %v940_v3 = vpack.c.bf16 %v908_v9, %v907_v14  ;;  %v919_v16 = vsel %vm4492_vm14, %v910_v50, 0.0  ;;  %vm5333_vm14 = vmmov %vm5319_vm1 }
 0x36b   :  { %3927 = vmatprep.subr.msk.bf16.mxu1 %vm5320_vm7, %v652_v19  ;;  %v671_v28 = vsel %vm5321_vm2, %v652_v19, 0  ;;  %v674_v32 = vsel %vm5319_vm1, %v653_v31, 0  ;;  %vm5323_vm7 = vmmov %vm5319_vm1  ;;  %v680_v45 = vsel %vm5319_vm1, %v655_v36, 0  ;;  %v922_v33 = vsel %vm4530_vm12, %v910_v50, 0.0 }
 0x36c   :  { %vm5324_vm2 = vmmov %vm5319_vm1  ;;  %v925_v38 = vsel %vm4564_vm6, %v910_v50, 0.0  ;;  %v909_v50 = vld [vmem:[#allocation2 + $0x28] sm:$0xff] }
 0x36d   :  { %v677_v10 = vsel %vm5324_vm2, %v654_v37, 0  ;;  %vm5327_vm2 = vmmov %vm5319_vm1 }
 0x36e   :  { %3561 = vmatpush3.bf16.xpose.msra.mxu1 %v671_v28  ;;  %v683_v59 = vsel %vm5327_vm2, %v656_v49, 0  ;;  %vm5330_vm2 = vmmov %vm5319_vm1 }
 0x36f   :  { %3928 = vmatprep.subr.msk.bf16.mxu1 %vm5322_vm11, %v653_v31  ;;  %vm5325_vm11 = vmmov %vm5319_vm1  ;;  %v911_v53 = vld [vmem:[#allocation3 + $0x20] sm:$0xff] }
 0x370   :  { %v917_v52 = vsel %vm4459_vm9, %v911_v53, 0.0  ;;  %v920_v22 = vsel %vm4500_vm3, %v911_v53, 0.0  ;;  %v923_v31 = vsel %vm4538_vm15, %v911_v53, 0.0  ;;  %v926_v43 = vsel %vm4582_vm5, %v911_v53, 0.0 }
 0x371   :  { %v942_v63 = vpack.c.bf16 %v917_v52, %v916_v56  ;;  %v912_v54 = vld [vmem:[#allocation3 + $0x28] sm:$0xff]  ;;  %v941_v52 = vpack.c.bf16 %v909_v50, %v909_v50  ;;  %vm5346_vm5 = vnez %v5314_v48 }
 0x372   :  { %v918_v11 = vsel %vm4488_vm13, %v912_v54, 0.0  ;;  %v921_v20 = vsel %vm4504_vm4, %v912_v54, 0.0  ;;  %vm5332_vm13 = vmmov %vm5319_vm1  ;;  %v3128_v56 = vld [vmem:[#allocation11] ss:$0 sm:$0xff] }
 0x373   :  { %v943_v19 = vpack.c.bf16 %v919_v16, %v918_v11  ;;  %v944_v28 = vpack.c.bf16 %v921_v20, %v920_v22 }
 0x375   :  { %v958_v23 = vsel %vm5332_vm13, %v943_v19, 0  ;;  %v961_v35 = vsel %vm5319_vm1, %v944_v28, 0  ;;  %vm5335_vm13 = vmmov %vm5319_vm1 }
 0x376   :  { %3563 = vmatpush3.bf16.xpose.msra.mxu1 %v674_v32  ;;  %v945_v32 = vpack.c.bf16 %v923_v31, %v922_v33 }
 0x377   :  { %3929 = vmatprep.subr.msk.bf16.mxu1 %vm5323_vm7, %v654_v37  ;;  %vm5326_vm7 = vmmov %vm5319_vm1  ;;  %v924_v37 = vsel %vm4560_vm0, %v912_v54, 0.0 }
 0x378   :  { %v964_v6 = vsel %vm5335_vm13, %v945_v32, 0  ;;  %vm5340_vm13 = vmmov 0  }
 0x37e   :  { %3565 = vmatpush3.bf16.xpose.msra.mxu1 %v677_v10  ;;  %v946_v10 = vpack.c.bf16 %v925_v38, %v924_v37 }
 0x37f   :  { %3930 = vmatprep.subr.msk.bf16.mxu1 %vm5325_vm11, %v655_v36  ;;  %vm5328_vm11 = vmmov %vm5319_vm1  ;;  %v927_v36 = vsel %vm4586_vm10, %v912_v54, 0.0 }
 0x386   :  { %3567 = vmatpush3.bf16.xpose.msra.mxu1 %v680_v45  ;;  %v947_v45 = vpack.c.bf16 %v927_v36, %v926_v43 }
 0x387   :  { %3931 = vmatprep.subr.msk.bf16.mxu1 %vm5326_vm7, %v656_v49  ;;  %vm5329_vm7 = vmmov %vm5319_vm1 }
 0x388   :  { %v955_v17 = vsel %vm5329_vm7, %v942_v63, 0  ;;  %vm5334_vm7 = vmmov %vm5319_vm1  ;;  %v970_v49 = vsel %vm5319_vm1, %v947_v45, 0 }
 0x38e   :  { %3569 = vmatpush3.bf16.xpose.msra.mxu1 %v683_v59 }
 0x38f   :  { %3932 = vmatprep.subr.msk.bf16.mxu1 %vm5328_vm11, %v942_v63  ;;  %vm5331_vm11 = vmmov %vm5319_vm1 }
 0x395   :  { %3571 = vmatmul.mubr.msk.bf16.vlgmr.msra.gmra.mrb[24].mxu1 %vm5319_vm1, %v650_v13 }
 0x396   :  { %3607 = vmatpush3.bf16.xpose.msra.mxu1 %v955_v17  ;;  %3618 = vmatprep.mubr.msk.bf16.mxu1 %vm5330_vm2, %v940_v3  ;;  %vm5337_vm2 = vmmov %vm5319_vm1 }
 0x397   :  { %3933 = vmatprep.subr.msk.bf16.mxu1 %vm5331_vm11, %v943_v19  ;;  %v967_v41 = vsel %vm5337_vm2, %v946_v10, 0  ;;  %vm5338_vm11 = vmmov %vm5319_vm1  ;;  %vm5341_vm2 = vnez %v5284_v42 }
 0x39e   :  { %3609 = vmatpush3.bf16.xpose.msra.mxu1 %v958_v23 }
 0x39f   :  { %3934 = vmatprep.subr.msk.bf16.mxu1 %vm5333_vm14, %v944_v28  ;;  %vm5336_vm14 = vmmov %vm5319_vm1 }
 0x3a6   :  { %3611 = vmatpush3.bf16.xpose.msra.mxu1 %v961_v35 }
 0x3a7   :  { %3935 = vmatprep.subr.msk.bf16.mxu1 %vm5334_vm7, %v945_v32  ;;  %vm5339_vm7 = vmmov %vm5319_vm1  ;;  %vm5343_vm1 = vnez %v5296_v25 }
 0x3ae   :  { %3613 = vmatpush3.bf16.xpose.msra.mxu1 %v964_v6 }
 0x3af   :  { %3936 = vmatprep.subr.msk.bf16.mxu1 %vm5336_vm14, %v946_v10  ;;  %vm5264_vm14 = vcmask 785408  }
 0x3b6   :  { %3615 = vmatpush3.bf16.xpose.msra.mxu1 %v967_v41 }
 0x3b7   :  { %3937 = vmatprep.subr.msk.bf16.mxu1 %vm5338_vm11, %v947_v45  ;;  %vm5342_vm11 = vnez %v5294_v2 }
 0x3be   :  { %3617 = vmatpush3.bf16.xpose.msra.mxu1 %v970_v49 }
 0x3bf   :  { %3654 = vmatprep.subr.bf16.mxu1 %v4240_v0 }
 0x3c5   :  { %3619 = vmatmul.mubr.msk.bf16.vlgmr.msra.gmra.mrb[28].mxu1 %vm5339_vm7, %v941_v52  ;;  %vm5344_vm7 = vnez %v5302_v39 }
 0x3c6   :  { %3658 = vmatprep.mubr.msk.bf16.mxu1 %vm5340_vm13, %v4240_v0 }
 0x468   :  { %v3572_v53 = vpop.f32.mrb[24].mxu1 }
 0x469   :  { %v719_v59 = vpop.f32.mrb[25].mxu1  ;;  %v728_v9 = vadd.f32 %v3572_v53, %v3128_v56 }
 0x46a   :  { %v720_v63 = vadd.f32 %v3128_v56, %v719_v59  ;;  %v3573_v54 = vpop.f32.mrb[26].mxu1  ;;  %v914_v59 = vld [vmem:[#allocation4 + $0x20] sm:$0xff] }
 0x46b   :  { %v722_v8 = vpop.f32.mrb[27].mxu1  ;;  %v740_v3 = vsel %vm5264_vm14, %v728_v9, -inf }
 0x46c   :  { %v723_v11 = vadd.f32 %v3128_v56, %v722_v8  ;;  %v734_v13 = vsel %vm5264_vm14, %v720_v63, -inf  ;;  %v915_v8 = vld [vmem:[#allocation4 + $0x28] sm:$0xff] }
 0x46d   :  { %735 = vmax.xlane.f32.xlu0 %v734_v13 }
 0x46e   :  { %v737_v14 = vsel %vm5264_vm14, %v723_v11, -inf }
 0x46f   :  { %738 = vmax.xlane.f32.xlu1 %v737_v14 }
 0x471   :  { %741 = vmax.xlane.f32.xlu0 %v740_v3  ;;  %v3168_v3 = vpack.c.bf16 %v915_v8, %v914_v59 }
 0x498   :  { %v3620_v16 = vpop.f32.mrb[28].mxu1 }
 0x499   :  { %v1006_v17 = vpop.f32.mrb[29].mxu1  ;;  %v1015_v23 = vadd.f32 %v3620_v16, %v3128_v56 }
 0x49a   :  { %v1007_v19 = vadd.f32 %v3128_v56, %v1006_v17  ;;  %v3621_v20 = vpop.f32.mrb[30].mxu1 }
 0x49b   :  { %v1009_v22 = vpop.f32.mrb[31].mxu1  ;;  %v1026_v35 = vsel %vm5264_vm14, %v1015_v23, -inf }
 0x49c   :  { %v1010_v28 = vadd.f32 %v3128_v56, %v1009_v22  ;;  %v1020_v31 = vsel %vm5264_vm14, %v1007_v19, -inf }
 0x49d   :  { %1021 = vmax.xlane.f32.xlu1 %v1020_v31 }
 0x49e   :  { %v1023_v33 = vsel %vm5264_vm14, %v1010_v28, -inf }
 0x49f   :  { %1024 = vmax.xlane.f32.xlu0 %v1023_v33 }
 0x4a1   :  { %1027 = vmax.xlane.f32.xlu1 %v1026_v35 }
 0x4fa   :  { %v736_v32 = vpop.xlane.xlu0 %735 }
 0x4fb   :  { %v743_v37 = vsub.f32 %v720_v63, %v736_v32  ;;  %v913_v63 = vld [vmem:[#allocation4 + $0x18] sm:$0xff] }
 0x4fc   :  { %v739_v38 = vpop.xlane.xlu1 %738  ;;  %v3162_v54 = vpack.c.bf16 %v914_v59, %v913_v63 }
 0x4fd   :  { %v746_v6 = vmul.f32 1.442695, %v743_v37  ;;  %v744_v10 = vsub.f32 %v723_v11, %v739_v38  ;;  %v3984_v37 = vld [vmem:[#allocation9 + $0xb0] sm:$0xff]   ;;  %v3985_v38 = vld [vmem:[#allocation9 + $0xb8] sm:$0xff]  }
 0x4fe   :  { %v742_v36 = vpop.xlane.xlu0 %741  ;;  %3655 = vmatpush3.bf16.msra.mxu1 %v3984_v37 }
 0x4ff   :  { %v748_v43 = vmul.f32 1.442695, %v744_v10  ;;  %v745_v41 = vsub.f32 %v728_v9, %v742_v36  ;;  %4028 = vpow2.f32 %v746_v6  ;;  %v3165_v9 = vpack.c.bf16 %v913_v63, %v915_v8  ;;  %3656 = vmatprep.subr.bf16.mxu1 %v4240_v0 }
 0x501   :  { %4030 = vpow2.f32 %v748_v43  ;;  %v750_v45 = vmul.f32 1.442695, %v745_v41 }
 0x502   :  { %3657 = vmatpush3.bf16.msra.mxu1 %v3985_v38 }
 0x503   :  { %4032 = vpow2.f32 %v750_v45  ;;  %3686 = vmatprep.subr.bf16.mxu1 %v4240_v0 }
 0x509   :  { %v4029_v49 = vpop.eup %4028 }
 0x50b   :  { %v4031_v50 = vpop.eup %4030 }
 0x50c   :  { %v752_v52 = vpack.c.bf16 %v4031_v50, %v4029_v49 }
 0x50d   :  { %v4033_v56 = vpop.eup %4032 }
 0x50e   :  { %v753_v53 = vpack.c.bf16 %v4033_v56, %v4033_v56  ;;  %3586 = vmatprep.mubr.msk.bf16.mxu0 %vm5264_vm14, %v752_v52 }
 0x510   :  { %3587 = vmatmul.mubr.msk.bf16.vlgmr.msra.gmra.mrb[24].mxu0 %vm5264_vm14, %v753_v53 }
 0x511   :  { %3591 = vmatpush3.bf16.msra.mxu0 %v4606_v51  ;;  %3602 = vmatprep.mubr.msk.bf16.mxu0 %vm5264_vm14, %v752_v52 }
 0x512   :  { %3592 = vmatprep.subr.bf16.mxu0 %v4415_v58 }
 0x515   :  { %3593 = vmatpush3.bf16.msra.mxu0 %v4415_v58 }
 0x516   :  { %3594 = vmatprep.subr.bf16.mxu0 %v4417_v61 }
 0x519   :  { %3595 = vmatpush3.bf16.msra.mxu0 %v4417_v61 }
 0x51a   :  { %3596 = vmatprep.subr.bf16.mxu0 %v4425_v1 }
 0x51d   :  { %3597 = vmatpush3.bf16.msra.mxu0 %v4425_v1 }
 0x51e   :  { %3598 = vmatprep.subr.bf16.mxu0 %v4433_v4 }
 0x521   :  { %3599 = vmatpush3.bf16.msra.mxu0 %v4433_v4 }
 0x522   :  { %3600 = vmatprep.subr.bf16.mxu0 %v4441_v7 }
 0x525   :  { %3601 = vmatpush3.bf16.msra.mxu0 %v4441_v7 }
 0x526   :  { %3622 = vmatprep.subr.msk.bf16.mxu0 %vm5341_vm2, %v3162_v54 }
 0x528   :  { %3603 = vmatmul.mubr.msk.bf16.vlgmr.msra.gmra.mrb[28].mxu0 %vm5264_vm14, %v753_v53  ;;  %vm5345_vm14 = vnez %v5308_v44 }
 0x529   :  { %3623 = vmatpush3.bf16.msk.msra.mxu0 %vm5341_vm2, %v3162_v54 }
 0x52a   :  { %3624 = vmatprep.subr.msk.bf16.mxu0 %vm5342_vm11, %v3165_v9  ;;  %v1022_v11 = vpop.xlane.xlu1 %1021 }
 0x52b   :  { %v1029_v13 = vsub.f32 %v1007_v19, %v1022_v11 }
 0x52c   :  { %v1025_v14 = vpop.xlane.xlu0 %1024 }
 0x52d   :  { %v1032_v16 = vmul.f32 1.442695, %v1029_v13  ;;  %3625 = vmatpush3.bf16.msk.msra.mxu0 %vm5342_vm11, %v3165_v9  ;;  %v1030_v17 = vsub.f32 %v1010_v28, %v1025_v14 }
 0x52e   :  { %3626 = vmatprep.subr.msk.bf16.mxu0 %vm5343_vm1, %v3168_v3  ;;  %v1028_v20 = vpop.xlane.xlu1 %1027 }
 0x52f   :  { %v1034_v22 = vmul.f32 1.442695, %v1030_v17  ;;  %v1031_v31 = vsub.f32 %v1015_v23, %v1028_v20  ;;  %4034 = vpow2.f32 %v1032_v16 }
 0x531   :  { %4036 = vpow2.f32 %v1034_v22  ;;  %v1036_v33 = vmul.f32 1.442695, %v1031_v31  ;;  %3627 = vmatpush3.bf16.msk.msra.mxu0 %vm5343_vm1, %v3168_v3  ;;  %vm5347_vm1 = vcmask 785408  }
 0x532   :  { %3628 = vmatprep.subr.msk.bf16.mxu0 %vm5344_vm7, %v3162_v54 }
 0x533   :  { %4038 = vpow2.f32 %v1036_v33 }
 0x535   :  { %3629 = vmatpush3.bf16.msk.msra.mxu0 %vm5344_vm7, %v3162_v54  ;;  %vm5348_vm7 = vmmov %vm5347_vm1 }
 0x536   :  { %3630 = vmatprep.subr.msk.bf16.mxu0 %vm5345_vm14, %v3165_v9 }
 0x539   :  { %3631 = vmatpush3.bf16.msk.msra.mxu0 %vm5345_vm14, %v3165_v9  ;;  %v4035_v19 = vpop.eup %4034  ;;  %vm5349_vm14 = vmmov %vm5347_vm1 }
 0x53a   :  { %3632 = vmatprep.subr.msk.bf16.mxu0 %vm5346_vm5, %v3168_v3 }
 0x53b   :  { %v4037_v23 = vpop.eup %4036 }
 0x53c   :  { %v1038_v28 = vpack.c.bf16 %v4037_v23, %v4035_v19 }
 0x53d   :  { %v4039_v35 = vpop.eup %4038  ;;  %3633 = vmatpush3.bf16.msk.msra.mxu0 %vm5346_vm5, %v3168_v3 }
 0x53e   :  { %v1039_v32 = vpack.c.bf16 %v4039_v35, %v4039_v35  ;;  %3634 = vmatprep.mubr.msk.bf16.mxu0 %vm5347_vm1, %v1038_v28  ;;  %3638 = vmatprep.subr.bf16.mxu0 %v4606_v51 }
 0x540   :  { %3635 = vmatmul.mubr.msk.bf16.vlgmr.msra.gmra.mrb[32].mxu0 %vm5348_vm7, %v1039_v32 }
 0x541   :  { %3639 = vmatpush3.bf16.msra.mxu0 %v4606_v51  ;;  %3650 = vmatprep.mubr.msk.bf16.mxu0 %vm5349_vm14, %v1038_v28  ;;  %vm5350_vm14 = vmmov %vm5347_vm1  ;;  %vm5351_vm1 = vcmask 261120  }
 0x542   :  { %3640 = vmatprep.subr.bf16.mxu0 %v4415_v58  ;;  %vm5352_vm7 = vmmov %vm5351_vm1 }
 0x543   :  { %vm5354_vm5 = vmmov %vm5351_vm1 }
 0x544   :  { %vm5358_vm11 = vmmov %vm5351_vm1 }
 0x545   :  { %3641 = vmatpush3.bf16.msra.mxu0 %v4415_v58  ;;  %vm5390_vm10 = vmmov %vm5351_vm1 }
 0x546   :  { %3642 = vmatprep.subr.bf16.mxu0 %v4417_v61 }
 0x549   :  { %3643 = vmatpush3.bf16.msra.mxu0 %v4417_v61 }
 0x54a   :  { %3644 = vmatprep.subr.bf16.mxu0 %v4425_v1 }
 0x54d   :  { %3645 = vmatpush3.bf16.msra.mxu0 %v4425_v1 }
 0x54e   :  { %3646 = vmatprep.subr.bf16.mxu0 %v4433_v4 }
 0x551   :  { %3647 = vmatpush3.bf16.msra.mxu0 %v4433_v4 }
 0x552   :  { %3648 = vmatprep.subr.bf16.mxu0 %v4441_v7 }
 0x555   :  { %3649 = vmatpush3.bf16.msra.mxu0 %v4441_v7 }
 0x556   :  { %3670 = vmatprep.subr.bf16.mxu0 %v4240_v0 }
 0x558   :  { %3651 = vmatmul.mubr.msk.bf16.vlgmr.msra.gmra.mrb[36].mxu0 %vm5350_vm14, %v1039_v32  ;;  %vm5353_vm14 = vmmov %vm5351_vm1 }
 0x559   :  { %3674 = vmatprep.mubr.msk.bf16.mxu0 %vm5340_vm13, %v4240_v0 }
 0x5e3   :  { %v3588_v6 = vpop.f32.mrb[24].mxu0 }
 0x5e4   :  { %v800_v10 = vpop.f32.mrb[25].mxu0 }
 0x5e5   :  { %v3589_v36 = vpop.f32.mrb[26].mxu0 }
 0x5e6   :  { %v803_v43 = vpop.f32.mrb[27].mxu0 }
 0x5fb   :  { %v3604_v41 = vpop.f32.mrb[28].mxu0 }
 0x5fc   :  { %4040 = vrcp.f32 %v3604_v41  ;;  %v884_v45 = vpop.f32.mrb[29].mxu0  ;;  %v3183_v41 = vld [vmem:[#allocation11 + $0x6] ss:$0 sm:$0xff] }
 0x5fd   :  { %4042 = vrcp.f32 %v884_v45  ;;  %v3605_v49 = vpop.f32.mrb[30].mxu0 }
 0x5fe   :  { %v887_v50 = vpop.f32.mrb[31].mxu0 }
 0x5ff   :  { %4044 = vrcp.f32 %v887_v50 }
 0x606   :  { %v4041_v52 = vpop.eup %4040 }
 0x607   :  { %v4043_v56 = vpop.eup %4042  ;;  %v903_v53 = vmul.f32 %v4041_v52, %v3588_v6 }
 0x608   :  { %v901_v59 = vmul.f32 %v4043_v56, %v800_v10 }
 0x609   :  { %v4045_v63 = vpop.eup %4044  ;;  %906 = vst.msk [vmem:[#allocation5 + $0x10] sm:$0xff] %vm5351_vm1, %v903_v53 }
 0x60a   :  { %904 = vst.msk [vmem:[#allocation5] sm:$0xff] %vm5352_vm7, %v901_v59  ;;  %v902_v54 = vmul.f32 %v4045_v63, %v803_v43  ;;  %vm5355_vm7 = vmmov %vm5351_vm1 }
 0x60c   :  { %905 = vst.msk [vmem:[#allocation5 + $0x8] sm:$0xff] %vm5353_vm14, %v902_v54  ;;  %vm5357_vm14 = vmmov %vm5351_vm1 }
 0x610   :  { %v1159_v37 = vld [vmem:[#allocation5 + $0x10] sm:$0xff] }
 0x611   :  { %v1157_v9 = vld [vmem:[#allocation5] sm:$0xff] }
 0x613   :  { %v3636_v8 = vpop.f32.mrb[32].mxu0  ;;  %v1158_v11 = vld [vmem:[#allocation5 + $0x8] sm:$0xff] }
 0x614   :  { %v1086_v13 = vpop.f32.mrb[33].mxu0  ;;  %v1163_v14 = vpack.c.bf16 %v1158_v11, %v1157_v9 }
 0x615   :  { %v3637_v3 = vpop.f32.mrb[34].mxu0 }
 0x616   :  { %3659 = vmatmul.mubr.msk.bf16.vlgmr.msra.gmra.mrb[32].mxu1 %vm5354_vm5, %v1163_v14  ;;  %v1089_v16 = vpop.f32.mrb[35].mxu0  ;;  %vm5356_vm5 = vmmov %vm5351_vm1 }
 0x617   :  { %3662 = vmatprep.mubr.msk.bf16.mxu1 %vm5340_vm13, %v4240_v0 }
 0x62b   :  { %v3652_v17 = vpop.f32.mrb[36].mxu0 }
 0x62c   :  { %4046 = vrcp.f32 %v3652_v17  ;;  %v1134_v20 = vpop.f32.mrb[37].mxu0 }
 0x62d   :  { %4048 = vrcp.f32 %v1134_v20  ;;  %v3653_v22 = vpop.f32.mrb[38].mxu0 }
 0x62e   :  { %v1137_v31 = vpop.f32.mrb[39].mxu0 }
 0x62f   :  { %4050 = vrcp.f32 %v1137_v31 }
 0x636   :  { %v4047_v33 = vpop.eup %4046 }
 0x637   :  { %v4049_v19 = vpop.eup %4048  ;;  %v1153_v23 = vmul.f32 %v4047_v33, %v3636_v8 }
 0x638   :  { %v1151_v28 = vmul.f32 %v4049_v19, %v1086_v13 }
 0x639   :  { %v4051_v35 = vpop.eup %4050  ;;  %1156 = vst.msk [vmem:[#allocation5 + $0x28] sm:$0xff] %vm5351_vm1, %v1153_v23 }
 0x63a   :  { %1154 = vst.msk [vmem:[#allocation5 + $0x18] sm:$0xff] %vm5355_vm7, %v1151_v28  ;;  %v1152_v32 = vmul.f32 %v4051_v35, %v1089_v16  ;;  %vm5360_vm7 = vmmov %vm5351_vm1 }
 0x63c   :  { %1155 = vst.msk [vmem:[#allocation5 + $0x20] sm:$0xff] %vm5356_vm5, %v1152_v32  ;;  %vm5361_vm5 = vmmov %vm5351_vm1 }
 0x640   :  { %v1162_v36 = vld [vmem:[#allocation5 + $0x28] sm:$0xff] }
 0x641   :  { %v1160_v38 = vld [vmem:[#allocation5 + $0x18] sm:$0xff] }
 0x642   :  { %v1164_v6 = vpack.c.bf16 %v1160_v38, %v1159_v37 }
 0x643   :  { %v1161_v10 = vld [vmem:[#allocation5 + $0x20] sm:$0xff] }
 0x644   :  { %3663 = vmatmul.mubr.msk.bf16.gmra.mrb[36].mxu1 %vm5357_vm14, %v1164_v6  ;;  %v1165_v43 = vpack.c.bf16 %v1162_v36, %v1161_v10  ;;  %vm5362_vm14 = vmmov %vm5351_vm1 }
 0x645   :  { %3666 = vmatprep.mubr.msk.bf16.mxu1 %vm5340_vm13, %v4240_v0 }
 0x64c   :  { %3667 = vmatmul.mubr.msk.bf16.gmra.mrb[40].mxu1 %vm5358_vm11, %v1165_v43  ;;  %vm5359_vm11 = vmmov %vm5351_vm1 }
 0x64d   :  { %3702 = vmatprep.mubr.msk.bf16.mxu1 %vm5340_vm13, %v4240_v0 }
 0x6e9   :  { %v1230_v45 = vpop.f32.mrb[32].mxu1 }
 0x6ea   :  { %v1231_v49 = vadd.f32 %v3183_v41, %v1230_v45  ;;  %v3660_v50 = vpop.f32.mrb[33].mxu1 }
 0x6eb   :  { %v1233_v52 = vpop.f32.mrb[34].mxu1  ;;  %v3987_v50 = vld [vmem:[#allocation9 + $0xc8] sm:$0xff]  }
 0x6ec   :  { %v4777_v56 = vadd.f32 %v1231_v49, %v4327_v12  ;;  %v1234_v53 = vadd.f32 %v3183_v41, %v1233_v52  ;;  %v3661_v59 = vpop.f32.mrb[35].mxu1  ;;  %v3986_v49 = vld [vmem:[#allocation9 + $0xc0] sm:$0xff]  }
 0x6ed   :  { %3671 = vmatpush3.bf16.msra.mxu0 %v3986_v49 }
 0x6ee   :  { %v4780_v63 = vadd.f32 %v1234_v53, %v4331_v15  ;;  %v1261_v54 = vsel %vm5351_vm1, %v4777_v56, 0.0  ;;  %3672 = vmatprep.subr.bf16.mxu0 %v4240_v0 }
 0x6ef   :  { %1262 = vadd.xlane.f32.xlu0 %v1261_v54 }
 0x6f0   :  { %v1264_v8 = vsel %vm5359_vm11, %v4780_v63, 0.0  ;;  %vm5363_vm11 = vmmov %vm5351_vm1 }
 0x6f1   :  { %1265 = vadd.xlane.f32.xlu1 %v1264_v8  ;;  %3673 = vmatpush3.bf16.msra.mxu0 %v3987_v50 }
 0x6f2   :  { %3714 = vmatprep.subr.bf16.mxu0 %v4240_v0 }
 0x717   :  { %v1238_v9 = vpop.f32.mrb[36].mxu1 }
 0x718   :  { %v1239_v11 = vadd.f32 %v3183_v41, %v1238_v9  ;;  %v3664_v13 = vpop.f32.mrb[37].mxu1 }
 0x719   :  { %v1241_v14 = vpop.f32.mrb[38].mxu1 }
 0x71a   :  { %v4787_v12 = vadd.f32 %v1239_v11, %v4335_v18  ;;  %v1242_v3 = vadd.f32 %v3183_v41, %v1241_v14  ;;  %v3665_v16 = vpop.f32.mrb[39].mxu1 }
 0x71c   :  { %v4790_v15 = vadd.f32 %v1242_v3, %v4339_v21  ;;  %v1267_v17 = vsel %vm5360_vm7, %v4787_v12, 0.0  ;;  %vm5364_vm7 = vmmov %vm5351_vm1 }
 0x71d   :  { %1268 = vadd.xlane.f32.xlu0 %v1267_v17 }
 0x71e   :  { %v1270_v20 = vsel %vm5361_vm5, %v4790_v15, 0.0  ;;  %vm5365_vm5 = vmmov %vm5351_vm1 }
 0x71f   :  { %1271 = vadd.xlane.f32.xlu1 %v1270_v20  ;;  %v1246_v22 = vpop.f32.mrb[40].mxu1 }
 0x720   :  { %v1247_v31 = vadd.f32 %v3183_v41, %v1246_v22  ;;  %v3668_v33 = vpop.f32.mrb[41].mxu1 }
 0x721   :  { %v1249_v19 = vpop.f32.mrb[42].mxu1 }
 0x722   :  { %v4797_v18 = vadd.f32 %v1247_v31, %v4343_v24  ;;  %v1250_v23 = vadd.f32 %v3183_v41, %v1249_v19  ;;  %v3669_v28 = vpop.f32.mrb[43].mxu1 }
 0x724   :  { %v4800_v21 = vadd.f32 %v1250_v23, %v4347_v27  ;;  %v1273_v35 = vsel %vm5362_vm14, %v4797_v18, 0.0  ;;  %vm5366_vm14 = vmmov %vm5351_vm1 }
 0x725   :  { %1274 = vadd.xlane.f32.xlu0 %v1273_v35 }
 0x726   :  { %v1276_v32 = vsel %vm5351_vm1, %v4800_v21, 0.0 }
 0x727   :  { %1277 = vadd.xlane.f32.xlu1 %v1276_v32 }
 0x77c   :  { %v1263_v37 = vpop.xlane.xlu0 %1262 }
 0x77d   :  { %v1279_v38 = vmul.f32 0.03125, %v1263_v37 }
 0x77e   :  { %v1266_v6 = vpop.xlane.xlu1 %1265 }
 0x77f   :  { %v1285_v10 = vsub.f32 %v4777_v56, %v1279_v38  ;;  %v1280_v24 = vmul.f32 0.03125, %v1266_v6 }
 0x781   :  { %v1286_v36 = vsub.f32 %v4780_v63, %v1280_v24  ;;  %v1291_v43 = vmul.f32 %v1285_v10, %v1285_v10 }
 0x783   :  { %v1297_v27 = vsel %vm5363_vm11, %v1291_v43, 0.0  ;;  %v1292_v41 = vmul.f32 %v1286_v36, %v1286_v36  ;;  %vm5367_vm11 = vmmov %vm5351_vm1 }
 0x784   :  { %1298 = vadd.xlane.f32.xlu0 %v1297_v27 }
 0x785   :  { %v1300_v45 = vsel %vm5364_vm7, %v1292_v41, 0.0  ;;  %v3189_v41 = vld [vmem:[#allocation11 + $0x7] ss:$0 sm:$0xff]  ;;  %vm5368_vm7 = vmmov %vm5351_vm1 }
 0x786   :  { %1301 = vadd.xlane.f32.xlu1 %v1300_v45 }
 0x7aa   :  { %v1269_v52 = vpop.xlane.xlu0 %1268 }
 0x7ab   :  { %v1281_v53 = vmul.f32 0.03125, %v1269_v52 }
 0x7ac   :  { %v1272_v59 = vpop.xlane.xlu1 %1271 }
 0x7ad   :  { %v1287_v54 = vsub.f32 %v4787_v12, %v1281_v53  ;;  %v1282_v8 = vmul.f32 0.03125, %v1272_v59  ;;  %v3190_v53 = vld [vmem:[#allocation11 + $0x8] ss:$0 sm:$0xff] }
 0x7af   :  { %v1288_v9 = vsub.f32 %v4790_v15, %v1282_v8  ;;  %v1293_v11 = vmul.f32 %v1287_v54, %v1287_v54 }
 0x7b1   :  { %v1303_v13 = vsel %vm5365_vm5, %v1293_v11, 0.0  ;;  %v1294_v14 = vmul.f32 %v1288_v9, %v1288_v9  ;;  %vm5369_vm5 = vmmov %vm5351_vm1 }
 0x7b2   :  { %1304 = vadd.xlane.f32.xlu0 %v1303_v13  ;;  %v1275_v3 = vpop.xlane.xlu0 %1274 }
 0x7b3   :  { %v1283_v16 = vmul.f32 0.03125, %v1275_v3  ;;  %v1306_v17 = vsel %vm5366_vm14, %v1294_v14, 0.0  ;;  %vm5370_vm14 = vmmov %vm5351_vm1 }
 0x7b4   :  { %1307 = vadd.xlane.f32.xlu1 %v1306_v17  ;;  %v1278_v20 = vpop.xlane.xlu1 %1277 }
 0x7b5   :  { %v1289_v22 = vsub.f32 %v4797_v18, %v1283_v16  ;;  %v1284_v31 = vmul.f32 0.03125, %v1278_v20 }
 0x7b7   :  { %v1290_v33 = vsub.f32 %v4800_v21, %v1284_v31  ;;  %v1295_v19 = vmul.f32 %v1289_v22, %v1289_v22 }
 0x7b9   :  { %v1309_v23 = vsel %vm5351_vm1, %v1295_v19, 0.0  ;;  %v1296_v28 = vmul.f32 %v1290_v33, %v1290_v33 }
 0x7ba   :  { %1310 = vadd.xlane.f32.xlu0 %v1309_v23 }
 0x7bb   :  { %v1312_v35 = vsel %vm5367_vm11, %v1296_v28, 0.0  ;;  %vm5371_vm11 = vmmov %vm5351_vm1 }
 0x7bc   :  { %1313 = vadd.xlane.f32.xlu1 %v1312_v35 }
 0x811   :  { %v1299_v32 = vpop.xlane.xlu0 %1298 }
 0x812   :  { %v1315_v37 = vmul.f32 0.03125, %v1299_v32 }
 0x813   :  { %v1302_v38 = vpop.xlane.xlu1 %1301 }
 0x814   :  { %v1321_v6 = vadd.f32 1e-05, %v1315_v37  ;;  %v1316_v24 = vmul.f32 0.03125, %v1302_v38 }
 0x816   :  { %4052 = vrsqrt.f32 %v1321_v6  ;;  %v1322_v43 = vadd.f32 1e-05, %v1316_v24 }
 0x818   :  { %4054 = vrsqrt.f32 %v1322_v43 }
 0x820   :  { %v4053_v27 = vpop.eup %4052 }
 0x821   :  { %v1333_v45 = vmul.f32 %v4053_v27, %v1285_v10 }
 0x822   :  { %v4055_v49 = vpop.eup %4054 }
 0x823   :  { %v1343_v50 = vmul.f32 %v3189_v41, %v1333_v45  ;;  %v1334_v52 = vmul.f32 %v4055_v49, %v1286_v36 }
 0x825   :  { %v1344_v59 = vmul.f32 %v3189_v41, %v1334_v52  ;;  %v1353_v8 = vadd.f32 %v3190_v53, %v1343_v50 }
 0x827   :  { %v1354_v11 = vadd.f32 %v3190_v53, %v1344_v59 }
 0x829   :  { %v1359_v13 = vpack.c.bf16 %v1354_v11, %v1353_v8 }
 0x82b   :  { %3675 = vmatmul.mubr.msk.bf16.vlgmr.msra.gmra.mrb[40].mxu0 %vm5368_vm7, %v1359_v13  ;;  %vm5372_vm7 = vmmov %vm5351_vm1 }
 0x82c   :  { %3678 = vmatprep.mubr.msk.bf16.mxu0 %vm5340_vm13, %v4240_v0 }
 0x83f   :  { %v1305_v14 = vpop.xlane.xlu0 %1304 }
 0x840   :  { %v1317_v3 = vmul.f32 0.03125, %v1305_v14 }
 0x841   :  { %v1308_v16 = vpop.xlane.xlu1 %1307 }
 0x842   :  { %v1323_v17 = vadd.f32 1e-05, %v1317_v3  ;;  %v1318_v20 = vmul.f32 0.03125, %v1308_v16  ;;  %v3993_v16 = vld [vmem:[#allocation9 + $0xf8] sm:$0xff]  }
 0x844   :  { %4056 = vrsqrt.f32 %v1323_v17  ;;  %v1324_v10 = vadd.f32 1e-05, %v1318_v20  ;;  %v3994_v17 = vld [vmem:[#allocation9 + $0x100] sm:$0xff]   ;;  %v3995_v20 = vld [vmem:[#allocation9 + $0x108] sm:$0xff]  }
 0x846   :  { %4058 = vrsqrt.f32 %v1324_v10  ;;  %v3191_v10 = vld [vmem:[#allocation11 + $0x9] ss:$0 sm:$0xff] }
 0x847   :  { %v1311_v31 = vpop.xlane.xlu0 %1310 }
 0x848   :  { %v1319_v36 = vmul.f32 0.03125, %v1311_v31 }
 0x849   :  { %v1314_v19 = vpop.xlane.xlu1 %1313 }
 0x84a   :  { %v1325_v23 = vadd.f32 1e-05, %v1319_v36  ;;  %v1320_v28 = vmul.f32 0.03125, %v1314_v19 }
 0x84c   :  { %4060 = vrsqrt.f32 %v1325_v23  ;;  %v1326_v35 = vadd.f32 1e-05, %v1320_v28 }
 0x84e   :  { %v4057_v32 = vpop.eup %4056  ;;  %4062 = vrsqrt.f32 %v1326_v35 }
 0x84f   :  { %v1335_v37 = vmul.f32 %v4057_v32, %v1287_v54 }
 0x850   :  { %v4059_v38 = vpop.eup %4058 }
 0x851   :  { %v1336_v6 = vmul.f32 %v4059_v38, %v1288_v9  ;;  %v1345_v24 = vmul.f32 %v3189_v41, %v1335_v37  ;;  %v3988_v9 = vld [vmem:[#allocation9 + $0xd0] sm:$0xff]  }
 0x852   :  { %3687 = vmatpush3.bf16.msra.mxu1 %v3988_v9 }
 0x853   :  { %v1346_v43 = vmul.f32 %v3189_v41, %v1336_v6  ;;  %v1355_v27 = vadd.f32 %v3190_v53, %v1345_v24  ;;  %3688 = vmatprep.subr.bf16.mxu1 %v4240_v0 }
 0x855   :  { %v1356_v45 = vadd.f32 %v3190_v53, %v1346_v43 }
 0x856   :  { %v4061_v49 = vpop.eup %4060 }
 0x857   :  { %v1337_v50 = vmul.f32 %v4061_v49, %v1289_v22  ;;  %v1360_v52 = vpack.c.bf16 %v1356_v45, %v1355_v27  ;;  %v3989_v22 = vld [vmem:[#allocation9 + $0xd8] sm:$0xff]  }
 0x858   :  { %v4063_v59 = vpop.eup %4062  ;;  %3689 = vmatpush3.bf16.msra.mxu1 %v3989_v22 }
 0x859   :  { %v1338_v8 = vmul.f32 %v4063_v59, %v1290_v33  ;;  %3679 = vmatmul.mubr.msk.bf16.gmra.mrb[44].mxu0 %vm5369_vm5, %v1360_v52  ;;  %v1347_v11 = vmul.f32 %v3189_v41, %v1337_v50  ;;  %3690 = vmatprep.subr.bf16.mxu1 %v4240_v0  ;;  %v3990_v33 = vld [vmem:[#allocation9 + $0xe0] sm:$0xff]   ;;  %vm5373_vm5 = vmmov %vm5351_vm1 }
 0x85a   :  { %3682 = vmatprep.mubr.msk.bf16.mxu0 %vm5340_vm13, %v4240_v0 }
 0x85b   :  { %v1348_v13 = vmul.f32 %v3189_v41, %v1338_v8  ;;  %v1357_v14 = vadd.f32 %v3190_v53, %v1347_v11  ;;  %v3991_v41 = vld [vmem:[#allocation9 + $0xe8] sm:$0xff]  }
 0x85c   :  { %3691 = vmatpush3.bf16.msra.mxu1 %v3990_v33 }
 0x85d   :  { %v1358_v54 = vadd.f32 %v3190_v53, %v1348_v13  ;;  %3692 = vmatprep.subr.bf16.mxu1 %v4240_v0  ;;  %v3992_v53 = vld [vmem:[#allocation9 + $0xf0] sm:$0xff]  }
 0x85f   :  { %v1361_v3 = vpack.c.bf16 %v1358_v54, %v1357_v14 }
 0x860   :  { %3693 = vmatpush3.bf16.msra.mxu1 %v3991_v41 }
 0x861   :  { %3683 = vmatmul.mubr.msk.bf16.gmra.mrb[48].mxu0 %vm5370_vm14, %v1361_v3  ;;  %3694 = vmatprep.subr.bf16.mxu1 %v4240_v0  ;;  %vm5374_vm14 = vmmov %vm5351_vm1 }
 0x862   :  { %3718 = vmatprep.mubr.msk.bf16.mxu0 %vm5340_vm13, %v4240_v0 }
 0x864   :  { %3695 = vmatpush3.bf16.msra.mxu1 %v3992_v53 }
 0x865   :  { %3696 = vmatprep.subr.bf16.mxu1 %v4240_v0 }
 0x868   :  { %3697 = vmatpush3.bf16.msra.mxu1 %v3993_v16 }
 0x869   :  { %3698 = vmatprep.subr.bf16.mxu1 %v4240_v0 }
 0x86c   :  { %3699 = vmatpush3.bf16.msra.mxu1 %v3994_v17 }
 0x86d   :  { %3700 = vmatprep.subr.bf16.mxu1 %v4240_v0 }
 0x870   :  { %3701 = vmatpush3.bf16.msra.mxu1 %v3995_v20 }
 0x871   :  { %3730 = vmatprep.subr.bf16.mxu1 %v4240_v0 }
 0x8fe   :  { %v1426_v31 = vpop.f32.mrb[40].mxu0 }
 0x8ff   :  { %v1427_v36 = vadd.f32 %v3191_v10, %v1426_v31  ;;  %v3676_v19 = vpop.f32.mrb[41].mxu0 }
 0x900   :  { %v1429_v23 = vpop.f32.mrb[42].mxu0 }
 0x901   :  { %v1455_v28 = vmul.f32 0.044715, %v1427_v36  ;;  %v1430_v35 = vadd.f32 %v3191_v10, %v1429_v23  ;;  %v3677_v32 = vpop.f32.mrb[43].mxu0  ;;  %v1449_v11 = vmul.f32 0.5, %v1427_v36 }
 0x903   :  { %v1461_v37 = vmul.f32 %v1455_v28, %v1427_v36  ;;  %v1456_v38 = vmul.f32 0.044715, %v1430_v35  ;;  %v1450_v13 = vmul.f32 0.5, %v1430_v35 }
 0x905   :  { %v1467_v6 = vmul.f32 %v1461_v37, %v1427_v36  ;;  %v1462_v24 = vmul.f32 %v1456_v38, %v1430_v35 }
 0x907   :  { %v1473_v43 = vadd.f32 %v1467_v6, %v1427_v36  ;;  %v1468_v27 = vmul.f32 %v1462_v24, %v1430_v35 }
 0x909   :  { %v1479_v45 = vmul.f32 0.7978846, %v1473_v43  ;;  %v1474_v49 = vadd.f32 %v1468_v27, %v1430_v35 }
 0x90b   :  { %4064 = vtanh.f32 %v1479_v45  ;;  %v1480_v50 = vmul.f32 0.7978846, %v1474_v49 }
 0x90d   :  { %4066 = vtanh.f32 %v1480_v50 }
 0x915   :  { %v4065_v52 = vpop.eup %4064 }
 0x916   :  { %v1491_v59 = vadd.f32 1.0, %v4065_v52 }
 0x917   :  { %v4067_v8 = vpop.eup %4066 }
 0x918   :  { %v1492_v14 = vadd.f32 1.0, %v4067_v8  ;;  %v1497_v54 = vmul.f32 %v1491_v59, %v1449_v11 }
 0x91a   :  { %v1498_v3 = vmul.f32 %v1492_v14, %v1450_v13 }
 0x91c   :  { %v1503_v9 = vpack.c.bf16 %v1498_v3, %v1497_v54 }
 0x91e   :  { %3703 = vmatmul.mubr.bf16.vlgmr.msra.gmra.mrb[44].mxu1 %v1503_v9 }
 0x91f   :  { %3706 = vmatprep.mubr.msk.bf16.mxu1 %vm5340_vm13, %v4240_v0 }
 0x92c   :  { %v1434_v22 = vpop.f32.mrb[44].mxu0 }
 0x92d   :  { %v1435_v33 = vadd.f32 %v3191_v10, %v1434_v22  ;;  %v3680_v41 = vpop.f32.mrb[45].mxu0 }
 0x92e   :  { %v1437_v53 = vpop.f32.mrb[46].mxu0 }
 0x92f   :  { %v1457_v16 = vmul.f32 0.044715, %v1435_v33  ;;  %v1438_v17 = vadd.f32 %v3191_v10, %v1437_v53  ;;  %v3681_v20 = vpop.f32.mrb[47].mxu0  ;;  %v1451_v53 = vmul.f32 0.5, %v1435_v33 }
 0x931   :  { %v1463_v31 = vmul.f32 %v1457_v16, %v1435_v33  ;;  %v1458_v19 = vmul.f32 0.044715, %v1438_v17  ;;  %v1452_v16 = vmul.f32 0.5, %v1438_v17 }
 0x933   :  { %v1469_v23 = vmul.f32 %v1463_v31, %v1435_v33  ;;  %v1464_v36 = vmul.f32 %v1458_v19, %v1438_v17 }
 0x934   :  { %v1442_v28 = vpop.f32.mrb[48].mxu0 }
 0x935   :  { %v1470_v35 = vmul.f32 %v1464_v36, %v1438_v17  ;;  %v1443_v32 = vadd.f32 %v3191_v10, %v1442_v28  ;;  %v3684_v37 = vpop.f32.mrb[49].mxu0  ;;  %v1475_v38 = vadd.f32 %v1469_v23, %v1435_v33  ;;  %v3197_v33 = vld [vmem:[#allocation11 + $0xa] ss:$0 sm:$0xff] }
 0x936   :  { %v1445_v6 = vpop.f32.mrb[50].mxu0 }
 0x937   :  { %v1459_v24 = vmul.f32 0.044715, %v1443_v32  ;;  %v1446_v43 = vadd.f32 %v3191_v10, %v1445_v6  ;;  %v3685_v27 = vpop.f32.mrb[51].mxu0  ;;  %v1476_v45 = vadd.f32 %v1470_v35, %v1438_v17  ;;  %v1481_v49 = vmul.f32 0.7978846, %v1475_v38 }
 0x938   :  { %v1453_v37 = vmul.f32 0.5, %v1443_v32 }
 0x939   :  { %v1465_v50 = vmul.f32 %v1459_v24, %v1443_v32  ;;  %v1460_v52 = vmul.f32 0.044715, %v1446_v43  ;;  %v1482_v59 = vmul.f32 0.7978846, %v1476_v45  ;;  %4068 = vtanh.f32 %v1481_v49 }
 0x93a   :  { %v1454_v38 = vmul.f32 0.5, %v1446_v43 }
 0x93b   :  { %v1471_v8 = vmul.f32 %v1465_v50, %v1443_v32  ;;  %v1466_v11 = vmul.f32 %v1460_v52, %v1446_v43  ;;  %4070 = vtanh.f32 %v1482_v59 }
 0x93d   :  { %v1472_v13 = vmul.f32 %v1466_v11, %v1446_v43  ;;  %v1477_v14 = vadd.f32 %v1471_v8, %v1443_v32 }
 0x93f   :  { %v1478_v54 = vadd.f32 %v1472_v13, %v1446_v43  ;;  %v1483_v3 = vmul.f32 0.7978846, %v1477_v14 }
 0x941   :  { %v1484_v9 = vmul.f32 0.7978846, %v1478_v54  ;;  %4072 = vtanh.f32 %v1483_v3 }
 0x943   :  { %v4069_v22 = vpop.eup %4068  ;;  %4074 = vtanh.f32 %v1484_v9 }
 0x944   :  { %v1493_v41 = vadd.f32 1.0, %v4069_v22 }
 0x945   :  { %v4071_v10 = vpop.eup %4070 }
 0x946   :  { %v1494_v20 = vadd.f32 1.0, %v4071_v10  ;;  %v1499_v31 = vmul.f32 %v1493_v41, %v1451_v53 }
 0x948   :  { %v1500_v19 = vmul.f32 %v1494_v20, %v1452_v16 }
 0x94a   :  { %v1504_v23 = vpack.c.bf16 %v1500_v19, %v1499_v31 }
 0x94b   :  { %v4073_v36 = vpop.eup %4072 }
 0x94c   :  { %3707 = vmatmul.mubr.bf16.gmra.mrb[48].mxu1 %v1504_v23  ;;  %v1495_v28 = vadd.f32 1.0, %v4073_v36 }
 0x94d   :  { %v4075_v35 = vpop.eup %4074  ;;  %3710 = vmatprep.mubr.msk.bf16.mxu1 %vm5340_vm13, %v4240_v0 }
 0x94e   :  { %v1496_v6 = vadd.f32 1.0, %v4075_v35  ;;  %v1501_v24 = vmul.f32 %v1495_v28, %v1453_v37 }
 0x950   :  { %v1502_v27 = vmul.f32 %v1496_v6, %v1454_v38 }
 0x952   :  { %v1505_v45 = vpack.c.bf16 %v1502_v27, %v1501_v24 }
 0x954   :  { %3711 = vmatmul.mubr.bf16.gmra.mrb[52].mxu1 %v1505_v45 }
 0x955   :  { %3734 = vmatprep.mubr.msk.bf16.mxu1 %vm5340_vm13, %v4240_v0 }
 0x9f1   :  { %v1609_v17 = vpop.f32.mrb[44].mxu1 }
 0x9f2   :  { %v1610_v49 = vadd.f32 %v3197_v33, %v1609_v17  ;;  %v3704_v50 = vpop.f32.mrb[45].mxu1 }
 0x9f3   :  { %v1612_v52 = vpop.f32.mrb[46].mxu1  ;;  %v3997_v50 = vld [vmem:[#allocation9 + $0x120] sm:$0xff]  }
 0x9f4   :  { %v4844_v59 = vadd.f32 %v1610_v49, %v4777_v56  ;;  %v1613_v8 = vadd.f32 %v3197_v33, %v1612_v52  ;;  %v3705_v11 = vpop.f32.mrb[47].mxu1  ;;  %v3996_v49 = vld [vmem:[#allocation9 + $0x110] sm:$0xff]   ;;  %3731 = vmatpush3.bf16.msra.mxu1 %v3997_v50  ;;  %v3998_v52 = vld [vmem:[#allocation9 + $0x118] sm:$0xff]  }
 0x9f5   :  { %3715 = vmatpush3.bf16.msra.mxu0 %v3996_v49  ;;  %3732 = vmatprep.subr.bf16.mxu1 %v4240_v0  ;;  %v3206_v49 = vld [vmem:[#allocation11 + $0xb] ss:$0 sm:$0xff] }
 0x9f6   :  { %v4847_v32 = vadd.f32 %v1613_v8, %v4780_v63  ;;  %v1640_v43 = vsel %vm5351_vm1, %v4844_v59, 0.0  ;;  %3716 = vmatprep.subr.bf16.mxu0 %v4240_v0  ;;  %v3999_v8 = vld [vmem:[#allocation9 + $0x128] sm:$0xff]  }
 0x9f7   :  { %1641 = vadd.xlane.f32.xlu0 %v1640_v43 }
 0x9f8   :  { %v1643_v13 = vsel %vm5371_vm11, %v4847_v32, 0.0  ;;  %vm5375_vm11 = vmmov %vm5351_vm1  ;;  %3733 = vmatpush3.bf16.msra.mxu1 %v3999_v8 }
 0x9f9   :  { %1644 = vadd.xlane.f32.xlu1 %v1643_v13  ;;  %3717 = vmatpush3.bf16.msra.mxu0 %v3998_v52 }
 0x9fa   :  { %3746 = vmatprep.subr.bf16.mxu0 %v4240_v0 }
 0xa1f   :  { %v1617_v14 = vpop.f32.mrb[48].mxu1 }
 0xa20   :  { %v1618_v54 = vadd.f32 %v3197_v33, %v1617_v14  ;;  %v3708_v3 = vpop.f32.mrb[49].mxu1 }
 0xa21   :  { %v1620_v9 = vpop.f32.mrb[50].mxu1 }
 0xa22   :  { %v4854_v56 = vadd.f32 %v1618_v54, %v4787_v12  ;;  %v1621_v22 = vadd.f32 %v3197_v33, %v1620_v9  ;;  %v3709_v41 = vpop.f32.mrb[51].mxu1 }
 0xa24   :  { %v4857_v63 = vadd.f32 %v1621_v22, %v4790_v15  ;;  %v1646_v10 = vsel %vm5372_vm7, %v4854_v56, 0.0  ;;  %vm5376_vm7 = vmmov %vm5351_vm1 }
 0xa25   :  { %1647 = vadd.xlane.f32.xlu0 %v1646_v10 }
 0xa26   :  { %v1649_v53 = vsel %vm5373_vm5, %v4857_v63, 0.0  ;;  %vm5377_vm5 = vmmov %vm5351_vm1 }
 0xa27   :  { %1650 = vadd.xlane.f32.xlu1 %v1649_v53  ;;  %v1625_v16 = vpop.f32.mrb[52].mxu1 }
 0xa28   :  { %v1626_v20 = vadd.f32 %v3197_v33, %v1625_v16  ;;  %v3712_v31 = vpop.f32.mrb[53].mxu1 }
 0xa29   :  { %v1628_v19 = vpop.f32.mrb[54].mxu1 }
 0xa2a   :  { %v4864_v12 = vadd.f32 %v1626_v20, %v4797_v18  ;;  %v1629_v23 = vadd.f32 %v3197_v33, %v1628_v19  ;;  %v3713_v36 = vpop.f32.mrb[55].mxu1 }
 0xa2c   :  { %v4867_v15 = vadd.f32 %v1629_v23, %v4800_v21  ;;  %v1652_v28 = vsel %vm5374_vm14, %v4864_v12, 0.0  ;;  %vm5378_vm14 = vmmov %vm5351_vm1 }
 0xa2d   :  { %1653 = vadd.xlane.f32.xlu0 %v1652_v28 }
 0xa2e   :  { %v1655_v35 = vsel %vm5351_vm1, %v4867_v15, 0.0 }
 0xa2f   :  { %1656 = vadd.xlane.f32.xlu1 %v1655_v35 }
 0xa84   :  { %v1642_v37 = vpop.xlane.xlu0 %1641 }
 0xa85   :  { %v1658_v38 = vmul.f32 0.03125, %v1642_v37 }
 0xa86   :  { %v1645_v6 = vpop.xlane.xlu1 %1644 }
 0xa87   :  { %v1664_v24 = vsub.f32 %v4844_v59, %v1658_v38  ;;  %v1659_v18 = vmul.f32 0.03125, %v1645_v6 }
 0xa89   :  { %v1665_v27 = vsub.f32 %v4847_v32, %v1659_v18  ;;  %v1670_v45 = vmul.f32 %v1664_v24, %v1664_v24 }
 0xa8b   :  { %v1676_v21 = vsel %vm5375_vm11, %v1670_v45, 0.0  ;;  %v1671_v33 = vmul.f32 %v1665_v27, %v1665_v27  ;;  %vm5379_vm11 = vmmov %vm5351_vm1 }
 0xa8c   :  { %1677 = vadd.xlane.f32.xlu0 %v1676_v21 }
 0xa8d   :  { %v1679_v17 = vsel %vm5376_vm7, %v1671_v33, 0.0  ;;  %vm5380_vm7 = vmmov %vm5351_vm1 }
 0xa8e   :  { %1680 = vadd.xlane.f32.xlu1 %v1679_v17 }
 0xab2   :  { %v1648_v11 = vpop.xlane.xlu0 %1647 }
 0xab3   :  { %v1660_v43 = vmul.f32 0.03125, %v1648_v11 }
 0xab4   :  { %v1651_v13 = vpop.xlane.xlu1 %1650 }
 0xab5   :  { %v4881_v14 = vsub.f32 %v4854_v56, %v1660_v43  ;;  %v1661_v54 = vmul.f32 0.03125, %v1651_v13  ;;  %v3207_v43 = vld [vmem:[#allocation11 + $0xc] ss:$0 sm:$0xff] }
 0xab7   :  { %v4884_v3 = vsub.f32 %v4857_v63, %v1661_v54  ;;  %v1672_v9 = vmul.f32 %v4881_v14, %v4881_v14 }
 0xab9   :  { %v1682_v22 = vsel %vm5377_vm5, %v1672_v9, 0.0  ;;  %v1673_v41 = vmul.f32 %v4884_v3, %v4884_v3  ;;  %vm5381_vm5 = vmmov %vm5351_vm1 }
 0xaba   :  { %1683 = vadd.xlane.f32.xlu0 %v1682_v22  ;;  %v1654_v10 = vpop.xlane.xlu0 %1653 }
 0xabb   :  { %v1662_v53 = vmul.f32 0.03125, %v1654_v10  ;;  %v1685_v16 = vsel %vm5378_vm14, %v1673_v41, 0.0  ;;  %v4000_v41 = vld [vmem:[#allocation9 + $0x130] sm:$0xff]   ;;  %vm5382_vm14 = vmmov %vm5351_vm1 }
 0xabc   :  { %1686 = vadd.xlane.f32.xlu1 %v1685_v16  ;;  %v1657_v20 = vpop.xlane.xlu1 %1656 }
 0xabd   :  { %v1668_v31 = vsub.f32 %v4864_v12, %v1662_v53  ;;  %v1663_v19 = vmul.f32 0.03125, %v1657_v20 }
 0xabf   :  { %v4894_v23 = vsub.f32 %v4867_v15, %v1663_v19  ;;  %v1674_v36 = vmul.f32 %v1668_v31, %v1668_v31 }
 0xac1   :  { %v1688_v28 = vsel %vm5351_vm1, %v1674_v36, 0.0  ;;  %v1675_v35 = vmul.f32 %v4894_v23, %v4894_v23 }
 0xac2   :  { %1689 = vadd.xlane.f32.xlu0 %v1688_v28 }
 0xac3   :  { %v1691_v37 = vsel %vm5379_vm11, %v1675_v35, 0.0  ;;  %vm5383_vm11 = vmmov %vm5351_vm1 }
 0xac4   :  { %1692 = vadd.xlane.f32.xlu1 %v1691_v37 }
 0xb19   :  { %v1678_v38 = vpop.xlane.xlu0 %1677 }
 0xb1a   :  { %v1694_v6 = vmul.f32 0.03125, %v1678_v38 }
 0xb1b   :  { %v1681_v18 = vpop.xlane.xlu1 %1680 }
 0xb1c   :  { %v1700_v45 = vadd.f32 1e-05, %v1694_v6  ;;  %v1695_v21 = vmul.f32 0.03125, %v1681_v18 }
 0xb1e   :  { %4076 = vrsqrt.f32 %v1700_v45  ;;  %v1701_v33 = vadd.f32 1e-05, %v1695_v21 }
 0xb20   :  { %4078 = vrsqrt.f32 %v1701_v33 }
 0xb28   :  { %v4077_v17 = vpop.eup %4076 }
 0xb29   :  { %v1712_v50 = vmul.f32 %v4077_v17, %v1664_v24  ;;  %v4001_v24 = vld [vmem:[#allocation9 + $0x138] sm:$0xff]  }
 0xb2a   :  { %v4079_v52 = vpop.eup %4078 }
 0xb2b   :  { %v1722_v8 = vmul.f32 %v3206_v49, %v1712_v50  ;;  %v1713_v11 = vmul.f32 %v4079_v52, %v1665_v27 }
 0xb2d   :  { %v1723_v13 = vmul.f32 %v3206_v49, %v1713_v11  ;;  %v1732_v54 = vadd.f32 %v3207_v43, %v1722_v8 }
 0xb2f   :  { %v1733_v9 = vadd.f32 %v3207_v43, %v1723_v13 }
 0xb31   :  { %v1738_v22 = vpack.c.bf16 %v1733_v9, %v1732_v54 }
 0xb33   :  { %3719 = vmatmul.mubr.msk.bf16.vlgmr.msra.gmra.mrb[52].mxu0 %vm5380_vm7, %v1738_v22  ;;  %3735 = vmatmul.mubr.msk.bf16.vlgmr.msra.gmra.mrb[56].mxu1 %vm5381_vm5, %v1738_v22  ;;  %vm5384_vm7 = vmmov %vm5351_vm1 }
 0xb34   :  { %3722 = vmatprep.mubr.msk.bf16.mxu0 %vm5340_vm13, %v4240_v0  ;;  %3738 = vmatprep.mubr.msk.bf16.mxu1 %vm5340_vm13, %v4240_v0  ;;  %vm5385_vm5 = vmmov %vm5351_vm1 }
 0xb35   :  { %3747 = vmatpush3.bf16.msra.mxu0 %v4000_v41 }
 0xb36   :  { %3748 = vmatprep.subr.bf16.mxu0 %v4240_v0 }
 0xb39   :  { %3749 = vmatpush3.bf16.msra.mxu0 %v4001_v24 }
 0xb47   :  { %v1684_v27 = vpop.xlane.xlu0 %1683 }
 0xb48   :  { %v1696_v10 = vmul.f32 0.03125, %v1684_v27 }
 0xb49   :  { %v1687_v53 = vpop.xlane.xlu1 %1686 }
 0xb4a   :  { %v1702_v16 = vadd.f32 1e-05, %v1696_v10  ;;  %v1697_v20 = vmul.f32 0.03125, %v1687_v53 }
 0xb4c   :  { %4080 = vrsqrt.f32 %v1702_v16  ;;  %v1703_v19 = vadd.f32 1e-05, %v1697_v20 }
 0xb4e   :  { %4082 = vrsqrt.f32 %v1703_v19 }
 0xb4f   :  { %v1690_v36 = vpop.xlane.xlu0 %1689 }
 0xb50   :  { %v1698_v28 = vmul.f32 0.03125, %v1690_v36 }
 0xb51   :  { %v1693_v35 = vpop.xlane.xlu1 %1692 }
 0xb52   :  { %v1704_v37 = vadd.f32 1e-05, %v1698_v28  ;;  %v1699_v38 = vmul.f32 0.03125, %v1693_v35 }
 0xb54   :  { %4084 = vrsqrt.f32 %v1704_v37  ;;  %v1705_v6 = vadd.f32 1e-05, %v1699_v38 }
 0xb56   :  { %v4081_v18 = vpop.eup %4080  ;;  %4086 = vrsqrt.f32 %v1705_v6 }
 0xb57   :  { %v1714_v45 = vmul.f32 %v4081_v18, %v4881_v14 }
 0xb58   :  { %v4083_v21 = vpop.eup %4082 }
 0xb59   :  { %v1715_v33 = vmul.f32 %v4083_v21, %v4884_v3  ;;  %v1724_v17 = vmul.f32 %v3206_v49, %v1714_v45 }
 0xb5b   :  { %v1725_v50 = vmul.f32 %v3206_v49, %v1715_v33  ;;  %v1734_v52 = vadd.f32 %v3207_v43, %v1724_v17 }
 0xb5d   :  { %v1735_v8 = vadd.f32 %v3207_v43, %v1725_v50 }
 0xb5e   :  { %v4085_v11 = vpop.eup %4084 }
 0xb5f   :  { %v1716_v13 = vmul.f32 %v4085_v11, %v1668_v31  ;;  %v1739_v54 = vpack.c.bf16 %v1735_v8, %v1734_v52 }
 0xb60   :  { %v4087_v9 = vpop.eup %4086 }
 0xb61   :  { %v1717_v41 = vmul.f32 %v4087_v9, %v4894_v23  ;;  %3723 = vmatmul.mubr.msk.bf16.gmra.mrb[56].mxu0 %vm5382_vm14, %v1739_v54  ;;  %3739 = vmatmul.mubr.msk.bf16.gmra.mrb[60].mxu1 %vm5351_vm1, %v1739_v54  ;;  %v1726_v24 = vmul.f32 %v3206_v49, %v1716_v13  ;;  %vm5386_vm14 = vmmov %vm5351_vm1 }
 0xb62   :  { %3726 = vmatprep.mubr.msk.bf16.mxu0 %vm5340_vm13, %v4240_v0  ;;  %3742 = vmatprep.mubr.msk.bf16.mxu1 %vm5340_vm13, %v4240_v0 }
 0xb63   :  { %v1727_v14 = vmul.f32 %v3206_v49, %v1717_v41  ;;  %v1736_v3 = vadd.f32 %v3207_v43, %v1726_v24 }
 0xb65   :  { %v1737_v27 = vadd.f32 %v3207_v43, %v1727_v14 }
 0xb67   :  { %v1740_v10 = vpack.c.bf16 %v1737_v27, %v1736_v3 }
 0xb69   :  { %3727 = vmatmul.mubr.msk.bf16.gmra.mrb[60].mxu0 %vm5383_vm11, %v1740_v10  ;;  %3743 = vmatmul.mubr.msk.bf16.gmra.mrb[64].mxu1 %vm5384_vm7, %v1740_v10  ;;  %vm5387_vm11 = vmmov %vm5351_vm1 }
 0xb6a   :  { %3750 = vmatprep.mubr.msk.bf16.mxu0 %vm5340_vm13, %v4240_v0  ;;  %vm5388_vm7 = vmmov %vm5351_vm1 }
 0xb71   :  { %3751 = vmatmul.mubr.msk.bf16.vlgmr.msra.gmra.mrb[64].mxu0 %vm5385_vm5, %v1738_v22  ;;  %vm5389_vm5 = vmmov %vm5351_vm1 }
 0xb72   :  { %3754 = vmatprep.mubr.msk.bf16.mxu0 %vm5340_vm13, %v4240_v0 }
 0xb79   :  { %3755 = vmatmul.mubr.msk.bf16.gmra.mrb[68].mxu0 %vm5386_vm14, %v1739_v54  ;;  %vm5391_vm14 = vmmov %vm5351_vm1 }
 0xb7a   :  { %3758 = vmatprep.mubr.msk.bf16.mxu0 %vm5340_vm13, %v4240_v0  ;;  %vm5396_vm13 = vmmov %vm5351_vm1 }
 0xb81   :  { %3759 = vmatmul.mubr.msk.bf16.gmra.mrb[72].mxu0 %vm5351_vm1, %v1740_v10 }
 0xc06   :  { %v1800_v31 = vpop.f32.mrb[52].mxu0  ;;  %v1879_v23 = vpop.f32.mrb[56].mxu1 }
 0xc07   :  { %1823 = vst.msk [vmem:[#allocation2] sm:$0xff] %vm5387_vm11, %v1800_v31  ;;  %v3720_v49 = vpop.f32.mrb[53].mxu0  ;;  %v3736_v43 = vpop.f32.mrb[57].mxu1  ;;  %vm5393_vm11 = vmmov %vm5351_vm1 }
 0xc08   :  { %1902 = vst.msk [vmem:[#allocation3] sm:$0xff] %vm5388_vm7, %v1879_v23  ;;  %v1803_v53 = vpop.f32.mrb[54].mxu0  ;;  %v1882_v22 = vpop.f32.mrb[58].mxu1  ;;  %vm5394_vm7 = vmmov %vm5351_vm1 }
 0xc09   :  { %1824 = vst.msk [vmem:[#allocation2 + $0x8] sm:$0xff] %vm5389_vm5, %v1803_v53  ;;  %v3721_v16 = vpop.f32.mrb[55].mxu0  ;;  %v3737_v20 = vpop.f32.mrb[59].mxu1  ;;  %vm5395_vm5 = vmmov %vm5351_vm1 }
 0xc0a   :  { %1903 = vst.msk [vmem:[#allocation3 + $0x8] sm:$0xff] %vm5390_vm10, %v1882_v22  ;;  %vm5392_vm10 = vmmov %vm5351_vm1 }
 0xc0e   :  { %v1987_v36 = vld [vmem:[#allocation2] sm:$0xff] }
 0xc0f   :  { %v4931_v19 = vld [vmem:[#allocation3] sm:$0xff] }
 0xc10   :  { %v1988_v28 = vld [vmem:[#allocation2 + $0x8] sm:$0xff]  ;;  %v1996_v38 = vsel %vm4455_vm8, %v4931_v19, 0.0 }
 0xc11   :  { %v4933_v35 = vld [vmem:[#allocation3 + $0x8] sm:$0xff]  ;;  %v2020_v37 = vpack.c.bf16 %v1988_v28, %v1987_v36 }
 0xc12   :  { %v1997_v6 = vsel %vm4459_vm9, %v4933_v35, 0.0  ;;  %v2000_v22 = vsel %vm4500_vm3, %v4933_v35, 0.0 }
 0xc13   :  { %v2022_v18 = vpack.c.bf16 %v1997_v6, %v1996_v38  ;;  %3774 = vmatprep.mubr.msk.bf16.mxu1 %vm5391_vm14, %v2020_v37  ;;  %vm5397_vm14 = vmmov %vm5351_vm1  ;;  %v2003_v37 = vsel %vm4538_vm15, %v4933_v35, 0.0 }
 0xc15   :  { %3938 = vmatprep.subr.msk.bf16.mxu1 %vm5392_vm10, %v2022_v18  ;;  %v2035_v45 = vsel %vm5351_vm1, %v2022_v18, 0  ;;  %vm5398_vm10 = vmmov %vm5351_vm1  ;;  %vm5399_vm1 = vnez %v5286_v55  ;;  %v2002_v18 = vsel %vm4530_vm12, %v4931_v19, 0.0 }
 0xc16   :  { %3763 = vmatpush3.bf16.xpose.msra.mxu1 %v2035_v45 }
 0xc34   :  { %v1808_v21 = vpop.f32.mrb[56].mxu0  ;;  %v1887_v33 = vpop.f32.mrb[60].mxu1 }
 0xc35   :  { %1825 = vst.msk [vmem:[#allocation2 + $0x10] sm:$0xff] %vm5393_vm11, %v1808_v21  ;;  %v3724_v17 = vpop.f32.mrb[57].mxu0  ;;  %v3740_v50 = vpop.f32.mrb[61].mxu1  ;;  %vm5400_vm11 = vnez %v5288_v57  ;;  %v2025_v21 = vpack.c.bf16 %v2003_v37, %v2002_v18 }
 0xc36   :  { %1904 = vst.msk [vmem:[#allocation3 + $0x10] sm:$0xff] %vm5394_vm7, %v1887_v33  ;;  %v1811_v52 = vpop.f32.mrb[58].mxu0  ;;  %v1890_v8 = vpop.f32.mrb[62].mxu1  ;;  %v1999_v27 = vsel %vm5400_vm11, %v4931_v19, 0.0  ;;  %vm5402_vm7 = vmmov %vm5395_vm5 }
 0xc37   :  { %1826 = vst.msk [vmem:[#allocation2 + $0x18] sm:$0xff] %vm5395_vm5, %v1811_v52  ;;  %v3725_v11 = vpop.f32.mrb[59].mxu0  ;;  %v3741_v13 = vpop.f32.mrb[63].mxu1 }
 0xc38   :  { %1905 = vst.msk [vmem:[#allocation3 + $0x18] sm:$0xff] %vm5396_vm13, %v1890_v8  ;;  %vm5401_vm13 = vmmov %vm5395_vm5 }
 0xc3c   :  { %v1816_v54 = vpop.f32.mrb[60].mxu0  ;;  %v1895_v9 = vpop.f32.mrb[64].mxu1 }
 0xc3d   :  { %v4948_v41 = vld [vmem:[#allocation3 + $0x10] sm:$0xff]  ;;  %1827 = vst.msk [vmem:[#allocation2 + $0x20] sm:$0xff] %vm5397_vm14, %v1816_v54  ;;  %v3728_v24 = vpop.f32.mrb[61].mxu0  ;;  %v3744_v14 = vpop.f32.mrb[65].mxu1  ;;  %vm5403_vm14 = vmmov %vm5395_vm5 }
 0xc3e   :  { %1906 = vst.msk [vmem:[#allocation3 + $0x20] sm:$0xff] %vm5398_vm10, %v1895_v9  ;;  %v1998_v3 = vsel %vm5399_vm1, %v4948_v41, 0.0  ;;  %v2001_v10 = vsel %vm4504_vm4, %v4948_v41, 0.0  ;;  %v1819_v31 = vpop.f32.mrb[62].mxu0  ;;  %v1898_v23 = vpop.f32.mrb[66].mxu1  ;;  %vm5404_vm10 = vmmov %vm5395_vm5  ;;  %v2004_v50 = vsel %vm4560_vm0, %v4948_v41, 0.0 }
 0xc3f   :  { %v2023_v49 = vpack.c.bf16 %v1999_v27, %v1998_v3  ;;  %1828 = vst.msk [vmem:[#allocation2 + $0x28] sm:$0xff] %vm5401_vm13, %v1819_v31  ;;  %v3729_v43 = vpop.f32.mrb[63].mxu0  ;;  %v3745_v53 = vpop.f32.mrb[67].mxu1  ;;  %v2024_v20 = vpack.c.bf16 %v2001_v10, %v2000_v22  ;;  %vm5405_vm4 = vmmov %vm5395_vm5  ;;  %v2005_v9 = vsel %vm4564_vm6, %v4931_v19, 0.0 }
 0xc40   :  { %1907 = vst.msk [vmem:[#allocation3 + $0x28] sm:$0xff] %vm5402_vm7, %v1898_v23  ;;  %vm5406_vm13 = vmmov %vm5405_vm4  ;;  %v2026_v14 = vpack.c.bf16 %v2005_v9, %v2004_v50 }
 0xc41   :  { %3939 = vmatprep.subr.msk.bf16.mxu1 %vm5395_vm5, %v2023_v49  ;;  %v2038_v16 = vsel %vm5403_vm14, %v2023_v49, 0  ;;  %vm5407_vm7 = vmmov %vm5405_vm4 }
 0xc42   :  { %3765 = vmatpush3.bf16.xpose.msra.mxu1 %v2038_v16  ;;  %v2041_v45 = vsel %vm5407_vm7, %v2024_v20, 0  ;;  %vm5408_vm5 = vmmov %vm5405_vm4 }
 0xc43   :  { %3940 = vmatprep.subr.msk.bf16.mxu1 %vm5404_vm10, %v2024_v20  ;;  %vm5409_vm14 = vmmov %vm5405_vm4  ;;  %v2240_v20 = vld [vmem:[#allocation3 + $0x18] sm:$0xff] }
 0xc44   :  { %v1958_v36 = vpop.f32.mrb[64].mxu0  ;;  %vm5410_vm10 = vmmov %vm5405_vm4  ;;  %v2238_v30 = vld [vmem:[#allocation2 + $0x20] sm:$0xff] }
 0xc45   :  { %1981 = vst.msk [vmem:[#allocation4] sm:$0xff] %vm5405_vm4, %v1958_v36  ;;  %v3752_v28 = vpop.f32.mrb[65].mxu0  ;;  %v2044_v24 = vsel %vm5410_vm10, %v2025_v21, 0  ;;  %vm5412_vm7 = vmmov %vm5405_vm4  ;;  %vm5415_vm10 = vnez %v5310_v46  ;;  %v2246_v36 = vsel %vm4455_vm8, %v2240_v20, 0.0  ;;  %vm5422_vm8 = vnez %v5314_v48 }
 0xc46   :  { %v1961_v38 = vpop.f32.mrb[66].mxu0  ;;  %v2006_v53 = vsel %vm5415_vm10, %v4933_v35, 0.0  ;;  %v2239_v5 = vld [vmem:[#allocation2 + $0x28] sm:$0xff] }
 0xc47   :  { %1982 = vst.msk [vmem:[#allocation4 + $0x8] sm:$0xff] %vm5406_vm13, %v1961_v38  ;;  %v3753_v6 = vpop.f32.mrb[67].mxu0  ;;  %vm5411_vm13 = vmmov %vm5405_vm4  ;;  %v2242_v38 = vld [vmem:[#allocation3 + $0x28] sm:$0xff] }
 0xc48   :  { %v1989_v6 = vld [vmem:[#allocation2 + $0x10] sm:$0xff]  ;;  %v2248_v29 = vsel %vm5399_vm1, %v2242_v38, 0.0  ;;  %vm5426_vm1 = vnez %v5292_v62  ;;  %v2254_v60 = vsel %vm4560_vm0, %v2242_v38, 0.0  ;;  %v2255_v62 = vsel %vm4564_vm6, %v2240_v20, 0.0 }
 0xc49   :  { %v2021_v18 = vpack.c.bf16 %v1989_v6, %v1989_v6  ;;  %v2251_v55 = vsel %vm5426_vm1, %v2242_v38, 0.0 }
 0xc4a   :  { %3767 = vmatpush3.bf16.xpose.msra.mxu1 %v2041_v45  ;;  %v2237_v45 = vld [vmem:[#allocation2 + $0x18] sm:$0xff] }
 0xc4b   :  { %3941 = vmatprep.subr.msk.bf16.mxu1 %vm5408_vm5, %v2025_v21  ;;  %vm5413_vm5 = vnez %v5312_v47  ;;  %v2270_v21 = vpack.c.bf16 %v2238_v30, %v2237_v45 }
 0xc4c   :  { %v1966_v33 = vpop.f32.mrb[68].mxu0  ;;  %v1993_v8 = vld [vmem:[#allocation4] sm:$0xff]  ;;  %v2007_v19 = vsel %vm5413_vm5, %v4948_v41, 0.0  ;;  %v2241_v41 = vld [vmem:[#allocation3 + $0x20] sm:$0xff]  ;;  %v2257_v26 = vsel %vm5413_vm5, %v2242_v38, 0.0  ;;  %vm5436_vm5 = vmmov 0  }
 0xc4d   :  { %1983 = vst.msk [vmem:[#allocation4 + $0x10] sm:$0xff] %vm5405_vm4, %v1966_v33  ;;  %v3756_v17 = vpop.f32.mrb[69].mxu0  ;;  %v2027_v16 = vpack.c.bf16 %v2007_v19, %v2006_v53  ;;  %v2247_v35 = vsel %vm4459_vm9, %v2241_v41, 0.0  ;;  %v2249_v33 = vsel %vm5400_vm11, %v2240_v20, 0.0  ;;  %v2250_v57 = vsel %vm4500_vm3, %v2241_v41, 0.0 }
 0xc4e   :  { %v1969_v52 = vpop.f32.mrb[70].mxu0  ;;  %v1994_v11 = vld [vmem:[#allocation4 + $0x8] sm:$0xff]  ;;  %v2272_v37 = vpack.c.bf16 %v2247_v35, %v2246_v36  ;;  %v2273_v50 = vpack.c.bf16 %v2249_v33, %v2248_v29  ;;  %v2256_v34 = vsel %vm5415_vm10, %v2241_v41, 0.0  ;;  %vm5437_vm10 = vcmask 785408  }
 0xc4f   :  { %1984 = vst.msk [vmem:[#allocation4 + $0x18] sm:$0xff] %vm5409_vm14, %v1969_v52  ;;  %v3757_v13 = vpop.f32.mrb[71].mxu0  ;;  %v3226_v54 = vpack.c.bf16 %v1994_v11, %v1993_v8  ;;  %vm5414_vm14 = vnez %v5294_v2  ;;  %vm5438_vm1 = vmmov %vm5437_vm10 }
 0xc50   :  { %v2252_v13 = vsel %vm4530_vm12, %v2240_v20, 0.0 }
 0xc51   :  { %3778 = vmatprep.subr.msk.bf16.mxu0 %vm5341_vm2, %v3226_v54 }
 0xc52   :  { %3769 = vmatpush3.bf16.xpose.msra.mxu1 %v2044_v24  ;;  %3779 = vmatpush3.bf16.msk.msra.mxu0 %vm5341_vm2, %v3226_v54  ;;  %vm5418_vm2 = vnez %v5302_v39 }
 0xc53   :  { %3942 = vmatprep.subr.msk.bf16.mxu1 %vm5411_vm13, %v2026_v14  ;;  %vm5416_vm13 = vmmov %vm5405_vm4 }
 0xc54   :  { %v1974_v3 = vpop.f32.mrb[72].mxu0  ;;  %v1995_v27 = vld [vmem:[#allocation4 + $0x10] sm:$0xff]  ;;  %v2047_v22 = vsel %vm5416_vm13, %v2026_v14, 0  ;;  %vm5419_vm13 = vmmov %vm5405_vm4  ;;  %v2276_v14 = vpack.c.bf16 %v2255_v62, %v2254_v60 }
 0xc55   :  { %1985 = vst.msk [vmem:[#allocation4 + $0x20] sm:$0xff] %vm5412_vm7, %v1974_v3  ;;  %v3760_v10 = vpop.f32.mrb[73].mxu0  ;;  %v3229_v31 = vpack.c.bf16 %v1993_v8, %v1995_v27  ;;  %v3232_v43 = vpack.c.bf16 %v1995_v27, %v1994_v11  ;;  %vm5417_vm7 = vnez %v5296_v25  ;;  %v2050_v28 = vsel %vm5419_vm13, %v2027_v16, 0 }
 0xc56   :  { %v1977_v23 = vpop.f32.mrb[74].mxu0  ;;  %v2274_v8 = vpack.c.bf16 %v2251_v55, %v2250_v57  ;;  %v2253_v11 = vsel %vm4538_vm15, %v2241_v41, 0.0  ;;  %v2277_v27 = vpack.c.bf16 %v2257_v26, %v2256_v34  ;;  %v2271_v10 = vpack.c.bf16 %v2239_v5, %v2239_v5 }
 0xc57   :  { %1986 = vst.msk [vmem:[#allocation4 + $0x28] sm:$0xff] %vm5405_vm4, %v1977_v23  ;;  %v3761_v49 = vpop.f32.mrb[75].mxu0  ;;  %3780 = vmatprep.subr.msk.bf16.mxu0 %vm5414_vm14, %v3229_v31  ;;  %v2275_v9 = vpack.c.bf16 %v2253_v11, %v2252_v13 }
 0xc58   :  { %3781 = vmatpush3.bf16.msk.msra.mxu0 %vm5414_vm14, %v3229_v31 }
 0xc59   :  { %3782 = vmatprep.subr.msk.bf16.mxu0 %vm5417_vm7, %v3232_v43 }
 0xc5a   :  { %3771 = vmatpush3.bf16.xpose.msra.mxu1 %v2047_v22 }
 0xc5b   :  { %3943 = vmatprep.subr.msk.bf16.mxu1 %vm5405_vm4, %v2027_v16  ;;  %vm5420_vm4 = vnez %v5308_v44 }
 0xc5c   :  { %3783 = vmatpush3.bf16.msk.msra.mxu0 %vm5417_vm7, %v3232_v43  ;;  %vm5421_vm7 = vmmov %vm5419_vm13  ;;  %v2244_v62 = vld [vmem:[#allocation4 + $0x20] sm:$0xff] }
 0xc5d   :  { %3784 = vmatprep.subr.msk.bf16.mxu0 %vm5418_vm2, %v3226_v54  ;;  %vm5423_vm9 = vmmov %vm5421_vm7  ;;  %v2285_v17 = vsel %vm5421_vm7, %v2272_v37, 0 }
 0xc5e   :  { %vm5424_vm13 = vmmov %vm5421_vm7  ;;  %v2245_v26 = vld [vmem:[#allocation4 + $0x28] sm:$0xff] }
 0xc5f   :  { %v3256_v5 = vpack.c.bf16 %v2245_v26, %v2244_v62 }
 0xc60   :  { %3785 = vmatpush3.bf16.msk.msra.mxu0 %vm5418_vm2, %v3226_v54 }
 0xc61   :  { %3786 = vmatprep.subr.msk.bf16.mxu0 %vm5420_vm4, %v3229_v31 }
 0xc62   :  { %3773 = vmatpush3.bf16.xpose.msra.mxu1 %v2050_v28 }
 0xc63   :  { %3944 = vmatprep.subr.msk.bf16.mxu1 %vm5421_vm7, %v2272_v37 }
 0xc64   :  { %3787 = vmatpush3.bf16.msk.msra.mxu0 %vm5420_vm4, %v3229_v31  ;;  %vm5425_vm4 = vmmov %vm5421_vm7  ;;  %v4138_v31 = vld [vmem:[#allocation11] ss:$0 sm:$0xff] }
 0xc65   :  { %3788 = vmatprep.subr.msk.bf16.mxu0 %vm5422_vm8, %v3232_v43  ;;  %vm5427_vm11 = vmmov %vm5425_vm4  ;;  %v2291_v54 = vsel %vm5425_vm4, %v2274_v8, 0 }
 0xc66   :  { %v2288_v52 = vsel %vm5427_vm11, %v2273_v50, 0  ;;  %vm5429_vm7 = vmmov %vm5425_vm4 }
 0xc67   :  { %vm5430_vm3 = vmmov %vm5425_vm4 }
 0xc68   :  { %3789 = vmatpush3.bf16.msk.msra.mxu0 %vm5422_vm8, %v3232_v43  ;;  %v2294_v24 = vsel %vm5430_vm3, %v2275_v9, 0  ;;  %vm5431_vm15 = vmmov %vm5430_vm3 }
 0xc69   :  { %3775 = vmatmul.mubr.msk.bf16.vlgmr.msra.gmra.mrb[68].mxu1 %vm5423_vm9, %v2021_v18  ;;  %3794 = vmatprep.subr.bf16.mxu0 %v4606_v51  ;;  %vm5428_vm9 = vmmov %vm5425_vm4 }
 0xc6a   :  { %3811 = vmatpush3.bf16.xpose.msra.mxu1 %v2285_v17  ;;  %3822 = vmatprep.mubr.msk.bf16.mxu1 %vm5424_vm13, %v2270_v21  ;;  %vm5432_vm12 = vmmov %vm5430_vm3 }
 0xc6b   :  { %3945 = vmatprep.subr.msk.bf16.mxu1 %vm5425_vm4, %v2273_v50  ;;  %v2297_v3 = vsel %vm5432_vm12, %v2276_v14, 0  ;;  %vm5433_vm0 = vmmov %vm5430_vm3 }
 0xc6c   :  { %vm5434_vm13 = vmmov %vm5433_vm0 }
 0xc6d   :  { %v2300_v40 = vsel %vm5434_vm13, %v2277_v27, 0  ;;  %vm5435_vm6 = vmmov %vm5433_vm0 }
 0xc6e   :  { %vm5439_vm11 = vmmov %vm5438_vm1 }
 0xc6f   :  { %vm5441_vm4 = vmmov %vm5438_vm1 }
 0xc70   :  { %vm5443_vm3 = vmmov %vm5438_vm1 }
 0xc71   :  { %vm5445_vm12 = vmmov %vm5438_vm1 }
 0xc72   :  { %3813 = vmatpush3.bf16.xpose.msra.mxu1 %v2288_v52  ;;  %vm5447_vm13 = vmmov %vm5438_vm1 }
 0xc73   :  { %3946 = vmatprep.subr.msk.bf16.mxu1 %vm5428_vm9, %v2274_v8  ;;  %vm5440_vm9 = vmmov %vm5438_vm1 }
 0xc7a   :  { %3815 = vmatpush3.bf16.xpose.msra.mxu1 %v2291_v54 }
 0xc7b   :  { %3947 = vmatprep.subr.msk.bf16.mxu1 %vm5429_vm7, %v2275_v9  ;;  %vm5442_vm7 = vmmov %vm5438_vm1 }
 0xc82   :  { %3817 = vmatpush3.bf16.xpose.msra.mxu1 %v2294_v24  ;;  %v2243_v24 = vld [vmem:[#allocation4 + $0x18] sm:$0xff] }
 0xc83   :  { %3948 = vmatprep.subr.msk.bf16.mxu1 %vm5431_vm15, %v2276_v14  ;;  %vm5444_vm15 = vmmov %vm5438_vm1  ;;  %v3250_v14 = vpack.c.bf16 %v2244_v62, %v2243_v24  ;;  %v3253_v34 = vpack.c.bf16 %v2243_v24, %v2245_v26 }
 0xc8a   :  { %3819 = vmatpush3.bf16.xpose.msra.mxu1 %v2297_v3 }
 0xc8b   :  { %3949 = vmatprep.subr.msk.bf16.mxu1 %vm5433_vm0, %v2277_v27  ;;  %vm5446_vm0 = vnez %v5284_v42 }
 0xc92   :  { %3821 = vmatpush3.bf16.xpose.msra.mxu1 %v2300_v40 }
 0xc93   :  { %3858 = vmatprep.subr.bf16.mxu1 %v4240_v0 }
 0xc99   :  { %3823 = vmatmul.mubr.msk.bf16.vlgmr.msra.gmra.mrb[72].mxu1 %vm5435_vm6, %v2271_v10  ;;  %vm5448_vm6 = vnez %v5296_v25 }
 0xc9a   :  { %3862 = vmatprep.mubr.msk.bf16.mxu1 %vm5436_vm5, %v4240_v0 }
 0xd3c   :  { %v3776_v46 = vpop.f32.mrb[68].mxu1 }
 0xd3d   :  { %v2086_v47 = vpop.f32.mrb[69].mxu1  ;;  %v2095_v43 = vadd.f32 %v4138_v31, %v3776_v46 }
 0xd3e   :  { %v2087_v19 = vadd.f32 %v4138_v31, %v2086_v47  ;;  %v3777_v23 = vpop.f32.mrb[70].mxu1 }
 0xd3f   :  { %v2089_v49 = vpop.f32.mrb[71].mxu1  ;;  %v2106_v41 = vsel %vm5439_vm11, %v2095_v43, -inf  ;;  %vm5453_vm11 = vcmask 261120  }
 0xd40   :  { %v2090_v53 = vadd.f32 %v4138_v31, %v2089_v49  ;;  %v2100_v22 = vsel %vm5437_vm10, %v2087_v19, -inf  ;;  %vm5450_vm10 = vmmov %vm5438_vm1 }
 0xd41   :  { %2101 = vmax.xlane.f32.xlu0 %v2100_v22 }
 0xd42   :  { %v2103_v16 = vsel %vm5438_vm1, %v2090_v53, -inf }
 0xd43   :  { %2104 = vmax.xlane.f32.xlu1 %v2103_v16 }
 0xd45   :  { %2107 = vmax.xlane.f32.xlu0 %v2106_v41 }
 0xd6c   :  { %v3824_v20 = vpop.f32.mrb[72].mxu1 }
 0xd6d   :  { %v2336_v35 = vpop.f32.mrb[73].mxu1  ;;  %v2345_v38 = vadd.f32 %v4138_v31, %v3824_v20 }
 0xd6e   :  { %v2337_v36 = vadd.f32 %v4138_v31, %v2336_v35  ;;  %v3825_v28 = vpop.f32.mrb[74].mxu1 }
 0xd6f   :  { %v2339_v37 = vpop.f32.mrb[75].mxu1  ;;  %v2356_v18 = vsel %vm5442_vm7, %v2345_v38, -inf }
 0xd70   :  { %v2340_v6 = vadd.f32 %v4138_v31, %v2339_v37  ;;  %v2350_v30 = vsel %vm5440_vm9, %v2337_v36, -inf  ;;  %vm5454_vm9 = vmmov %vm5453_vm11 }
 0xd71   :  { %2351 = vmax.xlane.f32.xlu1 %v2350_v30 }
 0xd72   :  { %v2353_v29 = vsel %vm5441_vm4, %v2340_v6, -inf  ;;  %vm5455_vm4 = vmmov %vm5454_vm9 }
 0xd73   :  { %2354 = vmax.xlane.f32.xlu0 %v2353_v29  ;;  %vm5456_vm7 = vmmov %vm5455_vm4 }
 0xd75   :  { %2357 = vmax.xlane.f32.xlu1 %v2356_v18 }
 0xdce   :  { %v2102_v45 = vpop.xlane.xlu0 %2101 }
 0xdcf   :  { %v2109_v21 = vsub.f32 %v2087_v19, %v2102_v45 }
 0xdd0   :  { %v2105_v33 = vpop.xlane.xlu1 %2104 }
 0xdd1   :  { %v2112_v17 = vmul.f32 1.442695, %v2109_v21  ;;  %v2110_v50 = vsub.f32 %v2090_v53, %v2105_v33 }
 0xdd2   :  { %v2108_v55 = vpop.xlane.xlu0 %2107 }
 0xdd3   :  { %v2114_v57 = vmul.f32 1.442695, %v2110_v50  ;;  %v2111_v52 = vsub.f32 %v2095_v43, %v2108_v55  ;;  %4088 = vpow2.f32 %v2112_v17 }
 0xdd5   :  { %4090 = vpow2.f32 %v2114_v57  ;;  %v2116_v8 = vmul.f32 1.442695, %v2111_v52 }
 0xdd7   :  { %4092 = vpow2.f32 %v2116_v8 }
 0xddd   :  { %v4089_v11 = vpop.eup %4088 }
 0xddf   :  { %v4091_v13 = vpop.eup %4090 }
 0xde0   :  { %v2118_v54 = vpack.c.bf16 %v4091_v13, %v4089_v11 }
 0xde1   :  { %v4093_v9 = vpop.eup %4092 }
 0xde2   :  { %v2119_v60 = vpack.c.bf16 %v4093_v9, %v4093_v9  ;;  %3790 = vmatprep.mubr.msk.bf16.mxu0 %vm5443_vm3, %v2118_v54  ;;  %vm5457_vm3 = vmmov %vm5455_vm4 }
 0xde4   :  { %3791 = vmatmul.mubr.msk.bf16.vlgmr.msra.gmra.mrb[76].mxu0 %vm5444_vm15, %v2119_v60  ;;  %vm5458_vm15 = vmmov %vm5457_vm3 }
 0xde5   :  { %3795 = vmatpush3.bf16.msra.mxu0 %v4606_v51  ;;  %3806 = vmatprep.mubr.msk.bf16.mxu0 %vm5445_vm12, %v2118_v54  ;;  %vm5459_vm12 = vmmov %vm5457_vm3 }
 0xde6   :  { %3796 = vmatprep.subr.bf16.mxu0 %v4415_v58 }
 0xde9   :  { %3797 = vmatpush3.bf16.msra.mxu0 %v4415_v58 }
 0xdea   :  { %3798 = vmatprep.subr.bf16.mxu0 %v4417_v61 }
 0xded   :  { %3799 = vmatpush3.bf16.msra.mxu0 %v4417_v61 }
 0xdee   :  { %3800 = vmatprep.subr.bf16.mxu0 %v4425_v1 }
 0xdf1   :  { %3801 = vmatpush3.bf16.msra.mxu0 %v4425_v1 }
 0xdf2   :  { %3802 = vmatprep.subr.bf16.mxu0 %v4433_v4 }
 0xdf5   :  { %3803 = vmatpush3.bf16.msra.mxu0 %v4433_v4 }
 0xdf6   :  { %3804 = vmatprep.subr.bf16.mxu0 %v4441_v7 }
 0xdf9   :  { %3805 = vmatpush3.bf16.msra.mxu0 %v4441_v7 }
 0xdfa   :  { %3826 = vmatprep.subr.msk.bf16.mxu0 %vm5446_vm0, %v3250_v14 }
 0xdfc   :  { %3807 = vmatmul.mubr.msk.bf16.vlgmr.msra.gmra.mrb[80].mxu0 %vm5447_vm13, %v2119_v60 }
 0xdfd   :  { %3827 = vmatpush3.bf16.msk.msra.mxu0 %vm5446_vm0, %v3250_v14  ;;  %vm5460_vm0 = vmmov %vm5457_vm3 }
 0xdfe   :  { %3828 = vmatprep.subr.msk.bf16.mxu0 %vm5414_vm14, %v3253_v34  ;;  %v2352_v3 = vpop.xlane.xlu1 %2351  ;;  %vm5461_vm13 = vmmov %vm5460_vm0 }
 0xdff   :  { %v2359_v27 = vsub.f32 %v2337_v36, %v2352_v3 }
 0xe00   :  { %v2355_v40 = vpop.xlane.xlu0 %2354 }
 0xe01   :  { %v2362_v10 = vmul.f32 1.442695, %v2359_v27  ;;  %v2360_v46 = vsub.f32 %v2340_v6, %v2355_v40  ;;  %3829 = vmatpush3.bf16.msk.msra.mxu0 %vm5414_vm14, %v3253_v34  ;;  %vm5449_vm14 = vnez %v5308_v44 }
 0xe02   :  { %3830 = vmatprep.subr.msk.bf16.mxu0 %vm5448_vm6, %v3256_v5  ;;  %v2358_v47 = vpop.xlane.xlu1 %2357 }
 0xe03   :  { %v2364_v31 = vmul.f32 1.442695, %v2360_v46  ;;  %v2361_v19 = vsub.f32 %v2345_v38, %v2358_v47  ;;  %4094 = vpow2.f32 %v2362_v10 }
 0xe05   :  { %4096 = vpow2.f32 %v2364_v31  ;;  %v2366_v42 = vmul.f32 1.442695, %v2361_v19  ;;  %3831 = vmatpush3.bf16.msk.msra.mxu0 %vm5448_vm6, %v3256_v5  ;;  %vm5462_vm6 = vmmov %vm5460_vm0 }
 0xe06   :  { %3832 = vmatprep.subr.msk.bf16.mxu0 %vm5418_vm2, %v3250_v14 }
 0xe07   :  { %4098 = vpow2.f32 %v2366_v42 }
 0xe09   :  { %3833 = vmatpush3.bf16.msk.msra.mxu0 %vm5418_vm2, %v3250_v14  ;;  %vm5451_vm2 = vmmov %vm5438_vm1  ;;  %v3271_v14 = vld [vmem:[#allocation11 + $0xd] ss:$0 sm:$0xff] }
 0xe0a   :  { %3834 = vmatprep.subr.msk.bf16.mxu0 %vm5449_vm14, %v3253_v34 }
 0xe0d   :  { %3835 = vmatpush3.bf16.msk.msra.mxu0 %vm5449_vm14, %v3253_v34  ;;  %v4095_v2 = vpop.eup %4094  ;;  %vm5463_vm14 = vmmov %vm5460_vm0 }
 0xe0e   :  { %3836 = vmatprep.subr.msk.bf16.mxu0 %vm5422_vm8, %v3256_v5 }
 0xe0f   :  { %v4097_v23 = vpop.eup %4096 }
 0xe10   :  { %v2368_v25 = vpack.c.bf16 %v4097_v23, %v4095_v2 }
 0xe11   :  { %v4099_v49 = vpop.eup %4098  ;;  %3837 = vmatpush3.bf16.msk.msra.mxu0 %vm5422_vm8, %v3256_v5  ;;  %vm5452_vm8 = vmmov %vm5438_vm1 }
 0xe12   :  { %v2369_v43 = vpack.c.bf16 %v4099_v49, %v4099_v49  ;;  %3838 = vmatprep.mubr.msk.bf16.mxu0 %vm5450_vm10, %v2368_v25  ;;  %3842 = vmatprep.subr.bf16.mxu0 %v4606_v51  ;;  %vm5464_vm10 = vmmov %vm5460_vm0 }
 0xe14   :  { %3839 = vmatmul.mubr.msk.bf16.vlgmr.msra.gmra.mrb[84].mxu0 %vm5451_vm2, %v2369_v43  ;;  %vm5465_vm2 = vmmov %vm5460_vm0 }
 0xe15   :  { %3843 = vmatpush3.bf16.msra.mxu0 %v4606_v51  ;;  %3854 = vmatprep.mubr.msk.bf16.mxu0 %vm5438_vm1, %v2368_v25  ;;  %vm5466_vm1 = vmmov %vm5460_vm0 }
 0xe16   :  { %3844 = vmatprep.subr.bf16.mxu0 %v4415_v58 }
 0xe19   :  { %3845 = vmatpush3.bf16.msra.mxu0 %v4415_v58  ;;  %v4002_v58 = vld [vmem:[#allocation9 + $0x140] sm:$0xff]  }
 0xe1a   :  { %3846 = vmatprep.subr.bf16.mxu0 %v4417_v61  ;;  %3859 = vmatpush3.bf16.msra.mxu1 %v4002_v58 }
 0xe1b   :  { %3860 = vmatprep.subr.bf16.mxu1 %v4240_v0 }
 0xe1d   :  { %3847 = vmatpush3.bf16.msra.mxu0 %v4417_v61  ;;  %v4003_v61 = vld [vmem:[#allocation9 + $0x148] sm:$0xff]  }
 0xe1e   :  { %3848 = vmatprep.subr.bf16.mxu0 %v4425_v1  ;;  %3861 = vmatpush3.bf16.msra.mxu1 %v4003_v61 }
 0xe1f   :  { %3890 = vmatprep.subr.bf16.mxu1 %v4240_v0 }
 0xe21   :  { %3849 = vmatpush3.bf16.msra.mxu0 %v4425_v1 }
 0xe22   :  { %3850 = vmatprep.subr.bf16.mxu0 %v4433_v4 }
 0xe25   :  { %3851 = vmatpush3.bf16.msra.mxu0 %v4433_v4 }
 0xe26   :  { %3852 = vmatprep.subr.bf16.mxu0 %v4441_v7 }
 0xe29   :  { %3853 = vmatpush3.bf16.msra.mxu0 %v4441_v7 }
 0xe2a   :  { %3874 = vmatprep.subr.bf16.mxu0 %v4240_v0 }
 0xe2c   :  { %3855 = vmatmul.mubr.msk.bf16.vlgmr.msra.gmra.mrb[88].mxu0 %vm5452_vm8, %v2369_v43  ;;  %vm5467_vm8 = vmmov %vm5460_vm0 }
 0xe2d   :  { %3878 = vmatprep.mubr.msk.bf16.mxu0 %vm5436_vm5, %v4240_v0 }
 0xeb7   :  { %v3792_v1 = vpop.f32.mrb[76].mxu0 }
 0xeb8   :  { %v2166_v4 = vpop.f32.mrb[77].mxu0 }
 0xeb9   :  { %v3793_v39 = vpop.f32.mrb[78].mxu0 }
 0xeba   :  { %v2169_v44 = vpop.f32.mrb[79].mxu0 }
 0xecf   :  { %v3808_v7 = vpop.f32.mrb[80].mxu0 }
 0xed0   :  { %4100 = vrcp.f32 %v3808_v7  ;;  %v2214_v48 = vpop.f32.mrb[81].mxu0 }
 0xed1   :  { %4102 = vrcp.f32 %v2214_v48  ;;  %v3809_v51 = vpop.f32.mrb[82].mxu0 }
 0xed2   :  { %v2217_v53 = vpop.f32.mrb[83].mxu0 }
 0xed3   :  { %4104 = vrcp.f32 %v2217_v53 }
 0xeda   :  { %v4101_v22 = vpop.eup %4100 }
 0xedb   :  { %v4103_v16 = vpop.eup %4102  ;;  %v2233_v41 = vmul.f32 %v4101_v22, %v3792_v1 }
 0xedc   :  { %v2231_v20 = vmul.f32 %v4103_v16, %v2166_v4 }
 0xedd   :  { %v4105_v35 = vpop.eup %4104  ;;  %2236 = vst.msk [vmem:[#allocation5 + $0x10] sm:$0xff] %vm5453_vm11, %v2233_v41  ;;  %vm5468_vm11 = vmmov %vm5460_vm0 }
 0xede   :  { %2234 = vst.msk [vmem:[#allocation5] sm:$0xff] %vm5454_vm9, %v2231_v20  ;;  %v2232_v36 = vmul.f32 %v4105_v35, %v2169_v44  ;;  %vm5469_vm9 = vmmov %vm5460_vm0 }
 0xee0   :  { %2235 = vst.msk [vmem:[#allocation5 + $0x8] sm:$0xff] %vm5455_vm4, %v2232_v36  ;;  %v4004_v36 = vld [vmem:[#allocation9 + $0x150] sm:$0xff]   ;;  %vm5470_vm4 = vmmov %vm5460_vm0 }
 0xee1   :  { %3875 = vmatpush3.bf16.msra.mxu0 %v4004_v36  ;;  %v4009_v36 = vld [vmem:[#allocation9 + $0x178] sm:$0xff]  }
 0xee2   :  { %3876 = vmatprep.subr.bf16.mxu0 %v4240_v0 }
 0xee4   :  { %v2489_v13 = vld [vmem:[#allocation5 + $0x10] sm:$0xff] }
 0xee5   :  { %v2487_v37 = vld [vmem:[#allocation5] sm:$0xff] }
 0xee7   :  { %v3840_v28 = vpop.f32.mrb[84].mxu0  ;;  %v2488_v38 = vld [vmem:[#allocation5 + $0x8] sm:$0xff] }
 0xee8   :  { %v2416_v6 = vpop.f32.mrb[85].mxu0  ;;  %v2493_v30 = vpack.c.bf16 %v2488_v38, %v2487_v37 }
 0xee9   :  { %v3841_v29 = vpop.f32.mrb[86].mxu0 }
 0xeea   :  { %3863 = vmatmul.mubr.msk.bf16.vlgmr.msra.gmra.mrb[76].mxu1 %vm5456_vm7, %v2493_v30  ;;  %v2419_v18 = vpop.f32.mrb[87].mxu0  ;;  %vm5471_vm7 = vmmov %vm5460_vm0 }
 0xeeb   :  { %3866 = vmatprep.mubr.msk.bf16.mxu1 %vm5436_vm5, %v4240_v0 }
 0xeff   :  { %v3856_v45 = vpop.f32.mrb[88].mxu0 }
 0xf00   :  { %4106 = vrcp.f32 %v3856_v45  ;;  %v2464_v21 = vpop.f32.mrb[89].mxu0 }
 0xf01   :  { %4108 = vrcp.f32 %v2464_v21  ;;  %v3857_v33 = vpop.f32.mrb[90].mxu0 }
 0xf02   :  { %v2467_v17 = vpop.f32.mrb[91].mxu0 }
 0xf03   :  { %4110 = vrcp.f32 %v2467_v17 }
 0xf0a   :  { %v4107_v50 = vpop.eup %4106 }
 0xf0b   :  { %v4109_v55 = vpop.eup %4108  ;;  %v2483_v57 = vmul.f32 %v4107_v50, %v3840_v28  ;;  %v4005_v28 = vld [vmem:[#allocation9 + $0x158] sm:$0xff]  }
 0xf0c   :  { %v2481_v52 = vmul.f32 %v4109_v55, %v2416_v6  ;;  %3877 = vmatpush3.bf16.msra.mxu0 %v4005_v28  ;;  %v4010_v28 = vld [vmem:[#allocation9 + $0x180] sm:$0xff]  }
 0xf0d   :  { %v4111_v8 = vpop.eup %4110  ;;  %2486 = vst.msk [vmem:[#allocation5 + $0x28] sm:$0xff] %vm5457_vm3, %v2483_v57  ;;  %3918 = vmatprep.subr.bf16.mxu0 %v4240_v0  ;;  %vm5472_vm3 = vmmov %vm5460_vm0 }
 0xf0e   :  { %2484 = vst.msk [vmem:[#allocation5 + $0x18] sm:$0xff] %vm5458_vm15, %v2481_v52  ;;  %v2482_v11 = vmul.f32 %v4111_v8, %v2419_v18  ;;  %vm5473_vm15 = vmmov %vm5460_vm0 }
 0xf10   :  { %2485 = vst.msk [vmem:[#allocation5 + $0x20] sm:$0xff] %vm5459_vm12, %v2482_v11  ;;  %vm5474_vm12 = vmmov %vm5460_vm0 }
 0xf14   :  { %v2492_v62 = vld [vmem:[#allocation5 + $0x28] sm:$0xff] }
 0xf15   :  { %v2490_v54 = vld [vmem:[#allocation5 + $0x18] sm:$0xff] }
 0xf16   :  { %v2494_v9 = vpack.c.bf16 %v2490_v54, %v2489_v13 }
 0xf17   :  { %v2491_v60 = vld [vmem:[#allocation5 + $0x20] sm:$0xff] }
 0xf18   :  { %3867 = vmatmul.mubr.msk.bf16.gmra.mrb[80].mxu1 %vm5460_vm0, %v2494_v9  ;;  %v2495_v24 = vpack.c.bf16 %v2492_v62, %v2491_v60  ;;  %v5174_v62 = vld [vmem:[#allocation11 + $0xe] ss:$0 sm:$0xff] }
 0xf19   :  { %3870 = vmatprep.mubr.msk.bf16.mxu1 %vm5436_vm5, %v4240_v0 }
 0xf20   :  { %3871 = vmatmul.mubr.msk.bf16.gmra.mrb[84].mxu1 %vm5461_vm13, %v2495_v24  ;;  %vm5475_vm13 = vmmov %vm5460_vm0 }
 0xf21   :  { %3906 = vmatprep.mubr.msk.bf16.mxu1 %vm5436_vm5, %v4240_v0 }
 0xfbd   :  { %v2560_v26 = vpop.f32.mrb[76].mxu1 }
 0xfbe   :  { %v2561_v34 = vadd.f32 %v3271_v14, %v2560_v26  ;;  %v3864_v3 = vpop.f32.mrb[77].mxu1 }
 0xfbf   :  { %v2563_v27 = vpop.f32.mrb[78].mxu1 }
 0xfc0   :  { %v5149_v40 = vadd.f32 %v2561_v34, %v4844_v59  ;;  %v2564_v5 = vadd.f32 %v3271_v14, %v2563_v27  ;;  %v3865_v10 = vpop.f32.mrb[79].mxu1  ;;  %v5177_v34 = vld [vmem:[#allocation11 + $0xf] ss:$0 sm:$0xff] }
 0xfc2   :  { %v2591_v46 = vsel %vm5462_vm6, %v5149_v40, 0.0  ;;  %v2584_v47 = vadd.f32 %v2564_v5, %v4847_v32  ;;  %vm2968_vm6 = vcmask 254976  }
 0xfc3   :  { %2592 = vadd.xlane.f32.xlu0 %v2591_v46 }
 0xfc4   :  { %v2594_v31 = vsel %vm5463_vm14, %v2584_v47, 0.0  ;;  %vm5476_vm14 = vmmov %vm5460_vm0 }
 0xfc5   :  { %2595 = vadd.xlane.f32.xlu1 %v2594_v31 }
 0xfeb   :  { %v2568_v19 = vpop.f32.mrb[80].mxu1 }
 0xfec   :  { %v2569_v42 = vadd.f32 %v3271_v14, %v2568_v19  ;;  %v3868_v2 = vpop.f32.mrb[81].mxu1 }
 0xfed   :  { %v2571_v23 = vpop.f32.mrb[82].mxu1 }
 0xfee   :  { %v2572_v25 = vadd.f32 %v3271_v14, %v2571_v23  ;;  %v3869_v49 = vpop.f32.mrb[83].mxu1  ;;  %v2585_v59 = vadd.f32 %v2569_v42, %v4854_v56 }
 0xff0   :  { %v5157_v43 = vadd.f32 %v2572_v25, %v4857_v63  ;;  %v2597_v58 = vsel %vm5464_vm10, %v2585_v59, 0.0 }
 0xff1   :  { %2598 = vadd.xlane.f32.xlu0 %v2597_v58 }
 0xff2   :  { %v2600_v32 = vsel %vm5465_vm2, %v5157_v43, 0.0 }
 0xff3   :  { %2601 = vadd.xlane.f32.xlu1 %v2600_v32  ;;  %v2576_v61 = vpop.f32.mrb[84].mxu1 }
 0xff4   :  { %v2577_v1 = vadd.f32 %v3271_v14, %v2576_v61  ;;  %v3872_v4 = vpop.f32.mrb[85].mxu1 }
 0xff5   :  { %v2579_v39 = vpop.f32.mrb[86].mxu1 }
 0xff6   :  { %v2580_v44 = vadd.f32 %v3271_v14, %v2579_v39  ;;  %v3873_v7 = vpop.f32.mrb[87].mxu1  ;;  %v2587_v17 = vadd.f32 %v2577_v1, %v4864_v12 }
 0xff8   :  { %v2588_v55 = vadd.f32 %v2580_v44, %v4867_v15  ;;  %v2603_v57 = vsel %vm5470_vm4, %v2587_v17, 0.0 }
 0xffa   :  { %v2606_v52 = vsel %vm5471_vm7, %v2588_v55, 0.0 }
0x1050   :  { %v2593_v48 = vpop.xlane.xlu0 %2592 }
0x1051   :  { %v2609_v51 = vmul.f32 0.03125, %v2593_v48 }
0x1052   :  { %v2596_v53 = vpop.xlane.xlu1 %2595 }
0x1053   :  { %v2615_v56 = vsub.f32 %v5149_v40, %v2609_v51  ;;  %v2610_v63 = vmul.f32 0.03125, %v2596_v53 }
0x1055   :  { %v2616_v22 = vsub.f32 %v2584_v47, %v2610_v63  ;;  %v2621_v16 = vmul.f32 %v2615_v56, %v2615_v56 }
0x1057   :  { %v2627_v41 = vsel %vm5466_vm1, %v2621_v16, 0.0  ;;  %v2622_v20 = vmul.f32 %v2616_v22, %v2616_v22 }
0x1058   :  { %2628 = vadd.xlane.f32.xlu0 %v2627_v41  ;;  %v4006_v41 = vld [vmem:[#allocation9 + $0x160] sm:$0xff]  }
0x1059   :  { %v2630_v35 = vsel %vm5467_vm8, %v2622_v20, 0.0  ;;  %3891 = vmatpush3.bf16.msra.mxu1 %v4006_v41  ;;  %v4007_v20 = vld [vmem:[#allocation9 + $0x168] sm:$0xff]  }
0x105a   :  { %2631 = vadd.xlane.f32.xlu1 %v2630_v35  ;;  %3892 = vmatprep.subr.bf16.mxu1 %v4240_v0  ;;  %v4008_v35 = vld [vmem:[#allocation9 + $0x170] sm:$0xff]  }
0x105d   :  { %3893 = vmatpush3.bf16.msra.mxu1 %v4007_v20 }
0x105e   :  { %3894 = vmatprep.subr.bf16.mxu1 %v4240_v0 }
0x1061   :  { %3895 = vmatpush3.bf16.msra.mxu1 %v4008_v35 }
0x1062   :  { %3896 = vmatprep.subr.bf16.mxu1 %v4240_v0 }
0x1065   :  { %3897 = vmatpush3.bf16.msra.mxu1 %v4009_v36 }
0x1066   :  { %3898 = vmatprep.subr.bf16.mxu1 %v4240_v0 }
0x1069   :  { %3899 = vmatpush3.bf16.msra.mxu1 %v4010_v28 }
0x106a   :  { %3900 = vmatprep.subr.bf16.mxu1 %v4240_v0 }
0x107e   :  { %v2599_v37 = vpop.xlane.xlu0 %2598 }
0x107f   :  { %v2611_v38 = vmul.f32 0.03125, %v2599_v37  ;;  %v4011_v37 = vld [vmem:[#allocation9 + $0x188] sm:$0xff]  }
0x1080   :  { %v2602_v6 = vpop.xlane.xlu1 %2601  ;;  %3901 = vmatpush3.bf16.msra.mxu1 %v4011_v37 }
0x1081   :  { %v2617_v30 = vsub.f32 %v2585_v59, %v2611_v38  ;;  %v2612_v29 = vmul.f32 0.03125, %v2602_v6  ;;  %v4012_v38 = vld [vmem:[#allocation9 + $0x190] sm:$0xff]   ;;  %3902 = vmatprep.subr.bf16.mxu1 %v4240_v0  ;;  %v4013_v6 = vld [vmem:[#allocation9 + $0x198] sm:$0xff]  }
0x1083   :  { %v2618_v18 = vsub.f32 %v5157_v43, %v2612_v29  ;;  %v2623_v45 = vmul.f32 %v2617_v30, %v2617_v30 }
0x1084   :  { %3903 = vmatpush3.bf16.msra.mxu1 %v4012_v38 }
0x1085   :  { %v2633_v21 = vsel %vm5468_vm11, %v2623_v45, 0.0  ;;  %v2624_v33 = vmul.f32 %v2618_v18, %v2618_v18  ;;  %3904 = vmatprep.subr.bf16.mxu1 %v4240_v0 }
0x1086   :  { %2634 = vadd.xlane.f32.xlu0 %v2633_v21 }
0x1087   :  { %v2636_v50 = vsel %vm5469_vm9, %v2624_v33, 0.0 }
0x1088   :  { %2637 = vadd.xlane.f32.xlu1 %v2636_v50  ;;  %3905 = vmatpush3.bf16.msra.mxu1 %v4013_v6 }
0x108a   :  { %2604 = vadd.xlane.f32.xlu0 %v2603_v57 }
0x108c   :  { %2607 = vadd.xlane.f32.xlu1 %v2606_v52 }
0x10e5   :  { %v2629_v8 = vpop.xlane.xlu0 %2628 }
0x10e6   :  { %v2645_v11 = vmul.f32 0.03125, %v2629_v8 }
0x10e7   :  { %v2632_v13 = vpop.xlane.xlu1 %2631 }
0x10e8   :  { %v2651_v54 = vadd.f32 1e-05, %v2645_v11  ;;  %v2646_v9 = vmul.f32 0.03125, %v2632_v13 }
0x10ea   :  { %4112 = vrsqrt.f32 %v2651_v54  ;;  %v2652_v60 = vadd.f32 1e-05, %v2646_v9  ;;  %v5208_v9 = vld [vmem:[#allocation11 + $0x10] ss:$0 sm:$0xff] }
0x10ec   :  { %4114 = vrsqrt.f32 %v2652_v60 }
0x10f4   :  { %v4113_v12 = vpop.eup %4112 }
0x10f5   :  { %v2663_v24 = vmul.f32 %v4113_v12, %v2615_v56 }
0x10f6   :  { %v4115_v15 = vpop.eup %4114 }
0x10f7   :  { %v2673_v14 = vmul.f32 %v5174_v62, %v2663_v24  ;;  %v2664_v26 = vmul.f32 %v4115_v15, %v2616_v22 }
0x10f9   :  { %v2674_v3 = vmul.f32 %v5174_v62, %v2664_v26  ;;  %v2683_v27 = vadd.f32 %v5177_v34, %v2673_v14 }
0x10fb   :  { %v2684_v5 = vadd.f32 %v5177_v34, %v2674_v3 }
0x10fd   :  { %v2689_v10 = vpack.c.bf16 %v2684_v5, %v2683_v27 }
0x10ff   :  { %3879 = vmatmul.mubr.msk.bf16.vlgmr.msra.gmra.mrb[92].mxu0 %vm5472_vm3, %v2689_v10 }
0x1100   :  { %3882 = vmatprep.mubr.msk.bf16.mxu0 %vm5436_vm5, %v4240_v0 }
0x1113   :  { %v2635_v46 = vpop.xlane.xlu0 %2634 }
0x1114   :  { %v2647_v47 = vmul.f32 0.03125, %v2635_v46 }
0x1115   :  { %v2638_v31 = vpop.xlane.xlu1 %2637 }
0x1116   :  { %v2653_v19 = vadd.f32 1e-05, %v2647_v47  ;;  %v2648_v42 = vmul.f32 0.03125, %v2638_v31 }
0x1117   :  { %v2605_v2 = vpop.xlane.xlu0 %2604 }
0x1118   :  { %4116 = vrsqrt.f32 %v2653_v19  ;;  %v2654_v23 = vadd.f32 1e-05, %v2648_v42  ;;  %v2613_v25 = vmul.f32 0.03125, %v2605_v2 }
0x1119   :  { %v2608_v49 = vpop.xlane.xlu1 %2607 }
0x111a   :  { %4118 = vrsqrt.f32 %v2654_v23  ;;  %v2619_v59 = vsub.f32 %v2587_v17, %v2613_v25  ;;  %v2614_v58 = vmul.f32 0.03125, %v2608_v49 }
0x111c   :  { %v2620_v32 = vsub.f32 %v2588_v55, %v2614_v58  ;;  %v2625_v61 = vmul.f32 %v2619_v59, %v2619_v59 }
0x111e   :  { %v2639_v1 = vsel %vm5473_vm15, %v2625_v61, 0.0  ;;  %v2626_v4 = vmul.f32 %v2620_v32, %v2620_v32 }
0x111f   :  { %2640 = vadd.xlane.f32.xlu0 %v2639_v1 }
0x1120   :  { %v2642_v39 = vsel %vm5474_vm12, %v2626_v4, 0.0 }
0x1121   :  { %2643 = vadd.xlane.f32.xlu1 %v2642_v39 }
0x1122   :  { %v4117_v44 = vpop.eup %4116 }
0x1123   :  { %v2665_v7 = vmul.f32 %v4117_v44, %v2617_v30 }
0x1124   :  { %v4119_v48 = vpop.eup %4118 }
0x1125   :  { %v2666_v51 = vmul.f32 %v4119_v48, %v2618_v18  ;;  %v2675_v53 = vmul.f32 %v5174_v62, %v2665_v7 }
0x1127   :  { %v2676_v56 = vmul.f32 %v5174_v62, %v2666_v51  ;;  %v2685_v63 = vadd.f32 %v5177_v34, %v2675_v53 }
0x1129   :  { %v2686_v22 = vadd.f32 %v5177_v34, %v2676_v56 }
0x112b   :  { %v2690_v16 = vpack.c.bf16 %v2686_v22, %v2685_v63 }
0x112d   :  { %3883 = vmatmul.mubr.msk.bf16.gmra.mrb[96].mxu0 %vm5460_vm0, %v2690_v16 }
0x112e   :  { %3886 = vmatprep.mubr.msk.bf16.mxu0 %vm5436_vm5, %v4240_v0 }
0x11ac   :  { %v2641_v30 = vpop.xlane.xlu0 %2640 }
0x11ad   :  { %v2649_v29 = vmul.f32 0.03125, %v2641_v30 }
0x11ae   :  { %v2644_v18 = vpop.xlane.xlu1 %2643 }
0x11af   :  { %v2655_v45 = vadd.f32 1e-05, %v2649_v29  ;;  %v2650_v21 = vmul.f32 0.03125, %v2644_v18 }
0x11b1   :  { %4120 = vrsqrt.f32 %v2655_v45  ;;  %v2656_v33 = vadd.f32 1e-05, %v2650_v21 }
0x11b3   :  { %4122 = vrsqrt.f32 %v2656_v33 }
0x11bb   :  { %v4121_v17 = vpop.eup %4120 }
0x11bc   :  { %v2667_v50 = vmul.f32 %v4121_v17, %v2619_v59 }
0x11bd   :  { %v4123_v55 = vpop.eup %4122 }
0x11be   :  { %v2668_v57 = vmul.f32 %v4123_v55, %v2620_v32  ;;  %v2677_v52 = vmul.f32 %v5174_v62, %v2667_v50 }
0x11c0   :  { %v2678_v8 = vmul.f32 %v5174_v62, %v2668_v57  ;;  %v2687_v11 = vadd.f32 %v5177_v34, %v2677_v52 }
0x11c2   :  { %v2688_v13 = vadd.f32 %v5177_v34, %v2678_v8 }
0x11c4   :  { %v2691_v54 = vpack.c.bf16 %v2688_v13, %v2687_v11 }
0x11c6   :  { %3887 = vmatmul.mubr.msk.bf16.gmra.mrb[100].mxu0 %vm5475_vm13, %v2691_v54 }
0x11c7   :  { %3922 = vmatprep.mubr.msk.bf16.mxu0 %vm5436_vm5, %v4240_v0 }
0x11d2   :  { %v2756_v60 = vpop.f32.mrb[92].mxu0 }
0x11d3   :  { %v2757_v12 = vadd.f32 %v5208_v9, %v2756_v60  ;;  %v3880_v24 = vpop.f32.mrb[93].mxu0 }
0x11d4   :  { %v2759_v15 = vpop.f32.mrb[94].mxu0 }
0x11d5   :  { %v2785_v14 = vmul.f32 0.044715, %v2757_v12  ;;  %v2760_v62 = vadd.f32 %v5208_v9, %v2759_v15  ;;  %v3881_v26 = vpop.f32.mrb[95].mxu0  ;;  %v2779_v25 = vmul.f32 0.5, %v2757_v12 }
0x11d7   :  { %v2791_v3 = vmul.f32 %v2785_v14, %v2757_v12  ;;  %v2786_v27 = vmul.f32 0.044715, %v2760_v62  ;;  %v2780_v49 = vmul.f32 0.5, %v2760_v62 }
0x11d9   :  { %v2797_v34 = vmul.f32 %v2791_v3, %v2757_v12  ;;  %v2792_v5 = vmul.f32 %v2786_v27, %v2760_v62 }
0x11db   :  { %v2803_v10 = vadd.f32 %v2797_v34, %v2757_v12  ;;  %v2798_v46 = vmul.f32 %v2792_v5, %v2760_v62 }
0x11dd   :  { %v2809_v47 = vmul.f32 0.7978846, %v2803_v10  ;;  %v2804_v31 = vadd.f32 %v2798_v46, %v2760_v62 }
0x11df   :  { %4124 = vtanh.f32 %v2809_v47  ;;  %v2810_v19 = vmul.f32 0.7978846, %v2804_v31 }
0x11e1   :  { %4126 = vtanh.f32 %v2810_v19 }
0x11e9   :  { %v4125_v42 = vpop.eup %4124 }
0x11ea   :  { %v2821_v2 = vadd.f32 1.0, %v4125_v42 }
0x11eb   :  { %v4127_v23 = vpop.eup %4126 }
0x11ec   :  { %v2822_v59 = vadd.f32 1.0, %v4127_v23  ;;  %v2827_v58 = vmul.f32 %v2821_v2, %v2779_v25  ;;  %v3285_v23 = vld [vmem:[#allocation11 + $0x11] ss:$0 sm:$0xff] }
0x11ee   :  { %v2828_v32 = vmul.f32 %v2822_v59, %v2780_v49 }
0x11f0   :  { %v2833_v61 = vpack.c.bf16 %v2828_v32, %v2827_v58 }
0x11f2   :  { %3907 = vmatmul.mubr.bf16.vlgmr.msra.gmra.mrb[88].mxu1 %v2833_v61 }
0x11f3   :  { %3910 = vmatprep.mubr.msk.bf16.mxu1 %vm5436_vm5, %v4240_v0 }
0x1200   :  { %v2764_v1 = vpop.f32.mrb[96].mxu0 }
0x1201   :  { %v2765_v4 = vadd.f32 %v5208_v9, %v2764_v1  ;;  %v3884_v39 = vpop.f32.mrb[97].mxu0 }
0x1202   :  { %v2767_v44 = vpop.f32.mrb[98].mxu0 }
0x1203   :  { %v2787_v7 = vmul.f32 0.044715, %v2765_v4  ;;  %v2768_v48 = vadd.f32 %v5208_v9, %v2767_v44  ;;  %v3885_v51 = vpop.f32.mrb[99].mxu0  ;;  %v2781_v6 = vmul.f32 0.5, %v2765_v4 }
0x1205   :  { %v2793_v53 = vmul.f32 %v2787_v7, %v2765_v4  ;;  %v2788_v56 = vmul.f32 0.044715, %v2768_v48  ;;  %v2782_v30 = vmul.f32 0.5, %v2768_v48 }
0x1207   :  { %v2799_v63 = vmul.f32 %v2793_v53, %v2765_v4  ;;  %v2794_v22 = vmul.f32 %v2788_v56, %v2768_v48 }
0x1209   :  { %v2800_v16 = vmul.f32 %v2794_v22, %v2768_v48  ;;  %v2805_v41 = vadd.f32 %v2799_v63, %v2765_v4 }
0x120b   :  { %v2806_v20 = vadd.f32 %v2800_v16, %v2768_v48  ;;  %v2811_v35 = vmul.f32 0.7978846, %v2805_v41 }
0x120d   :  { %v2812_v36 = vmul.f32 0.7978846, %v2806_v20  ;;  %4128 = vtanh.f32 %v2811_v35 }
0x120f   :  { %4130 = vtanh.f32 %v2812_v36 }
0x1217   :  { %v4129_v28 = vpop.eup %4128 }
0x1218   :  { %v2823_v37 = vadd.f32 1.0, %v4129_v28 }
0x1219   :  { %v4131_v38 = vpop.eup %4130 }
0x121a   :  { %v2824_v29 = vadd.f32 1.0, %v4131_v38  ;;  %v2829_v18 = vmul.f32 %v2823_v37, %v2781_v6  ;;  %v4014_v37 = vld [vmem:[#allocation9 + $0x70] sm:$0xff]   ;;  %v4015_v38 = vld [vmem:[#allocation9 + $0x78] sm:$0xff]  }
0x121b   :  { %3919 = vmatpush3.bf16.msra.mxu0 %v4014_v37 }
0x121c   :  { %v2830_v45 = vmul.f32 %v2824_v29, %v2782_v30  ;;  %3920 = vmatprep.subr.bf16.mxu0 %v4240_v0 }
0x121e   :  { %v2834_v21 = vpack.c.bf16 %v2830_v45, %v2829_v18  ;;  %v3294_v45 = vld [vmem:[#allocation11 + $0x1] ss:$0 sm:$0xff] }
0x121f   :  { %3921 = vmatpush3.bf16.msra.mxu0 %v4015_v38 }
0x1220   :  { %3911 = vmatmul.mubr.bf16.gmra.mrb[92].mxu1 %v2834_v21 }
0x1221   :  { %3914 = vmatprep.mubr.msk.bf16.mxu1 %vm5436_vm5, %v4240_v0  ;;  %vm2965_vm5 = vcmask 1041409  }
0x1299   :  { %v2772_v33 = vpop.f32.mrb[100].mxu0 }
0x129a   :  { %v2773_v17 = vadd.f32 %v5208_v9, %v2772_v33  ;;  %v3888_v50 = vpop.f32.mrb[101].mxu0 }
0x129b   :  { %v2775_v55 = vpop.f32.mrb[102].mxu0 }
0x129c   :  { %v2789_v57 = vmul.f32 0.044715, %v2773_v17  ;;  %v2776_v52 = vadd.f32 %v5208_v9, %v2775_v55  ;;  %v3889_v8 = vpop.f32.mrb[103].mxu0  ;;  %v2783_v34 = vmul.f32 0.5, %v2773_v17 }
0x129e   :  { %v2795_v11 = vmul.f32 %v2789_v57, %v2773_v17  ;;  %v2790_v13 = vmul.f32 0.044715, %v2776_v52  ;;  %v2784_v5 = vmul.f32 0.5, %v2776_v52 }
0x12a0   :  { %v2801_v54 = vmul.f32 %v2795_v11, %v2773_v17  ;;  %v2796_v60 = vmul.f32 %v2790_v13, %v2776_v52 }
0x12a2   :  { %v2802_v12 = vmul.f32 %v2796_v60, %v2776_v52  ;;  %v2807_v24 = vadd.f32 %v2801_v54, %v2773_v17  ;;  %v3295_v17 = vld [vmem:[#allocation11 + $0x2] ss:$0 sm:$0xff] }
0x12a4   :  { %v2808_v15 = vadd.f32 %v2802_v12, %v2776_v52  ;;  %v2813_v14 = vmul.f32 0.7978846, %v2807_v24 }
0x12a6   :  { %v2814_v62 = vmul.f32 0.7978846, %v2808_v15  ;;  %4132 = vtanh.f32 %v2813_v14  ;;  %v3296_v15 = vld [vmem:[#allocation11 + $0x3] ss:$0 sm:$0xff] }
0x12a8   :  { %4134 = vtanh.f32 %v2814_v62 }
0x12b0   :  { %v4133_v26 = vpop.eup %4132 }
0x12b1   :  { %v2825_v3 = vadd.f32 1.0, %v4133_v26 }
0x12b2   :  { %v4135_v27 = vpop.eup %4134 }
0x12b3   :  { %v2826_v10 = vadd.f32 1.0, %v4135_v27  ;;  %v2831_v46 = vmul.f32 %v2825_v3, %v2783_v34 }
0x12b5   :  { %v2832_v9 = vmul.f32 %v2826_v10, %v2784_v5 }
0x12b7   :  { %v2835_v47 = vpack.c.bf16 %v2832_v9, %v2831_v46 }
0x12b9   :  { %3915 = vmatmul.mubr.bf16.gmra.mrb[96].mxu1 %v2835_v47 }
0x12c5   :  { %v2939_v31 = vpop.f32.mrb[88].mxu1 }
0x12c6   :  { %v3908_v19 = vpop.f32.mrb[89].mxu1  ;;  %v2940_v58 = vadd.f32 %v3285_v23, %v2939_v31 }
0x12c7   :  { %v2942_v42 = vpop.f32.mrb[90].mxu1 }
0x12c8   :  { %v3909_v2 = vpop.f32.mrb[91].mxu1  ;;  %v2958_v4 = vadd.f32 %v2940_v58, %v5149_v40 }
0x12f3   :  { %v2946_v25 = vpop.f32.mrb[92].mxu1 }
0x12f4   :  { %v3912_v49 = vpop.f32.mrb[93].mxu1 }
0x12f5   :  { %v2948_v59 = vpop.f32.mrb[94].mxu1 }
0x12f6   :  { %v2949_v32 = vadd.f32 %v3285_v23, %v2948_v59  ;;  %v3913_v61 = vpop.f32.mrb[95].mxu1 }
0x12f8   :  { %v2959_v1 = vadd.f32 %v2949_v32, %v5157_v43 }
0x12fa   :  { %v2964_v39 = vrot.slane %v2959_v1, 7 }
0x12fc   :  { %v2966_v44 = vsel %vm2965_vm5, %v2964_v39, %v2958_v4 }
0x12fd   :  { %v2969_v7 = vsel %vm2968_vm6, %v2966_v44, 0.0 }
0x12fe   :  { %2970 = vadd.xlane.f32.xlu0 %v2969_v7 }
0x138b   :  { %v2971_v48 = vpop.xlane.xlu0 %2970 }
0x138c   :  { %v2972_v51 = vmul.f32 0.03125, %v2971_v48  ;;  %v2953_v53 = vpop.f32.mrb[96].mxu1 }
0x138d   :  { %v3916_v56 = vpop.f32.mrb[97].mxu1 }
0x138e   :  { %v2974_v63 = vrot.slane %v2972_v51, 1  ;;  %v2955_v22 = vpop.f32.mrb[98].mxu1  ;;  %v2977_v41 = vsub.f32 %v2958_v4, %v2972_v51 }
0x138f   :  { %v3917_v16 = vpop.f32.mrb[99].mxu1 }
0x1390   :  { %v2978_v20 = vsub.f32 %v2959_v1, %v2974_v63  ;;  %v2979_v35 = vmul.f32 %v2977_v41, %v2977_v41 }
0x1392   :  { %v2980_v43 = vmul.f32 %v2978_v20, %v2978_v20 }
0x1394   :  { %v2983_v36 = vrot.slane %v2980_v43, 7 }
0x1396   :  { %v2984_v40 = vsel %vm2965_vm5, %v2983_v36, %v2979_v35 }
0x1397   :  { %v2986_v28 = vsel %vm2968_vm6, %v2984_v40, 0.0 }
0x1398   :  { %2987 = vadd.xlane.f32.xlu1 %v2986_v28 }
0x1425   :  { %v2988_v6 = vpop.xlane.xlu1 %2987 }
0x1426   :  { %v2989_v30 = vmul.f32 0.03125, %v2988_v6 }
0x1428   :  { %v2990_v29 = vadd.f32 1e-05, %v2989_v30 }
0x142a   :  { %4136 = vrsqrt.f32 %v2990_v29 }
0x1434   :  { %v4137_v18 = vpop.eup %4136 }
0x1435   :  { %v2993_v21 = vrot.slane %v4137_v18, 1  ;;  %v2996_v33 = vmul.f32 %v4137_v18, %v2977_v41 }
0x1437   :  { %v2997_v50 = vmul.f32 %v2993_v21, %v2978_v20  ;;  %v3002_v55 = vmul.f32 %v3294_v45, %v2996_v33 }
0x1439   :  { %v3003_v57 = vmul.f32 %v3294_v45, %v2997_v50  ;;  %v3008_v52 = vadd.f32 %v3295_v17, %v3002_v55 }
0x143b   :  { %v3009_v8 = vadd.f32 %v3295_v17, %v3003_v57  ;;  %v3010_v11 = vpack.c.bf16 %v3008_v52, %v3008_v52 }
0x143d   :  { %v3011_v13 = vpack.c.bf16 %v3009_v8, %v3009_v8  ;;  %v3023_v0 = vunpack.c.l.b16 %v3010_v11 }
0x143f   :  { %v3024_v54 = vunpack.c.l.b16 %v3011_v13 }
0x1441   :  { %v3025_v60 = vrot.slane %v3024_v54, 7 }
0x1443   :  { %v3026_v12 = vsel %vm2965_vm5, %v3025_v60, %v3023_v0 }
0x1444   :  { %v3027_v24 = vpack.c.b16 %v3026_v12, %v3026_v12 }
0x1446   :  { %3923 = vmatmul.mubr.msk.bf16.vlgmr.msra.gmra.mrb[104].mxu0 %vm5476_vm14, %v3027_v24 }
0x1519   :  { %v3077_v14 = vpop.f32.mrb[104].mxu0 }
0x151a   :  { %v3078_v62 = vadd.f32 %v3296_v15, %v3077_v14  ;;  %v3924_v26 = vpop.f32.mrb[105].mxu0 }
0x151b   :  { %v3080_v3 = vpop.f32.mrb[106].mxu0 }
0x151c   :  { %3083 = vst [vmem:[#allocation12] sm:$0x3] %v3078_v62  ;;  %v3925_v27 = vpop.f32.mrb[107].mxu0 }
0x151d   :  { %4216 = shalt.err (!%p4213_p0)
}
0x151e   :  { %s4217_s27 = scalar_lea.hbm %s5244_s3, 32 }
0x151f   :  { %p4218_p1 = scmp.ne.s32.totalorder %s5244_s3, %s4217_s27  ;;  %p4221_p2 = scmp.lt.u32.totalorder %s4217_s27, %s5244_s3 }
0x1521   :  { %p4223_p3 = pnand %p4221_p2, %p4218_p1 }
0x1523   :  { %4226 = shalt.err (!%p4223_p3)
}
0x1524   :  { %3093 = dma.vmem_to_hbm [thread:$0]  %s3091_s23, 32, %s5244_s3, [#allocation8]  }
0x1525   :  { %4231 = dma.done.wait [#allocation8], 32  }
0x1526   :  { %4232 = vsyncadd [#allocation8], 4294967264 }
0x1527   :  { %3097 = vsyncpa [#allocation7], 1 }
0x1528   :  { %3098 = vsyncpa [#allocation10], 1 }
0x1529   :  { %3099 = vsyncpa [#allocation8], 1 }

</bundles_post_ra>
